<compile_context>
chip_gen: v7x
topology: tpu7x:2x2x1
jax: 0.10.0
libtpu: 0.0.40
codegen_flags: <defaults>
</compile_context>

<pallas_src>
import jax
import jax.numpy as jnp
from jax.experimental import pallas as pl
from jax.experimental.pallas import tpu as pltpu

EPS = 1e-5
LANE = 128
N_PHASES = 4  # 0: BN1 stats, 1: BN2 stats, 2: BN3 stats, 3: normalize+output


def _rup(x, m):
    return ((x + m - 1) // m) * m


# ----------------------------- fused Pallas kernel --------------------------

def _make_kernel(tb, h, w, m_total, wd_p, cout_p):
    mt = tb * h * w
    inv_m = 1.0 / float(m_total)

    def bn_scale_shift(s_ref, g_ref, b_ref):
        # Global train-mode BN (biased variance), accumulated in f32.
        # TODO(synk): switch to a centered two-pass variance when M grows to
        # production size (one-pass E[x^2]-E[x]^2 cancellation).
        mean = s_ref[0:1, :] * inv_m
        var = s_ref[1:2, :] * inv_m - mean * mean
        scale = g_ref[...] * jax.lax.rsqrt(var + EPS)
        shift = b_ref[...] - mean * scale
        return scale, shift

    def accumulate(s_ref, y):
        s_ref[0:1, :] += jnp.sum(y, axis=0, keepdims=True)
        s_ref[1:2, :] += jnp.sum(y * y, axis=0, keepdims=True)

    def kernel(x_ref, w1_ref, w2_ref, w3_ref,
               g1_ref, b1_ref, g2_ref, b2_ref, g3_ref, b3_ref,
               o_ref, h1p, s1, s2, s3):
        p = pl.program_id(0)
        t = pl.program_id(1)

        @pl.when((p == 0) & (t == 0))
        def _init():
            # Zero the halo guard ring and stat accumulators exactly once.
            # The h1p interior is fully overwritten every later step, so no
            # per-step full-buffer zeroing (saves a vst sweep per tile).
            h1p[...] = jnp.zeros_like(h1p)
            s1[...] = jnp.zeros_like(s1)
            s2[...] = jnp.zeros_like(s2)
            s3[...] = jnp.zeros_like(s3)

        x_f32 = x_ref[...]                                       # (mt, cin_p)

        # ---- conv1 (1x1): bf16 MXU operands, f32 accumulation ---------------
        y1 = jnp.dot(x_f32.astype(jnp.bfloat16), w1_ref[...],
                     preferred_element_type=jnp.float32)         # (mt, wd_p)

        @pl.when(p == 0)
        def _phase0():
            accumulate(s1, y1)

        @pl.when(p >= 1)
        def _phases123():
            sc1, sh1 = bn_scale_shift(s1, g1_ref, b1_ref)
            h1 = jnp.maximum(y1 * sc1 + sh1, 0.0)                # f32

            # Stash h1 (bf16) into the spatially zero-padded scratch so every
            # 3x3 tap is a plain shifted static slice: no boundary masks.
            h1p[:, 1:h + 1, 1:w + 1, :] = (
                h1.astype(jnp.bfloat16).reshape(tb, h, w, wd_p))

            # ---- conv2 (3x3, pad=1): 9 shifted accumulated MXU matmuls ------
            # TODO(synk): pair taps along K (or build a (mt, 9*wd_p) patch
            # slab) to fill the 256-deep MXU on v6e/v7x, and use pltpu.roll
            # for the dx shift to avoid sublane-misaligned slice relayouts.
            y2 = jnp.zeros((mt, wd_p), jnp.float32)
            tap_i = 0
            for ky in (0, 1, 2):
                for kx in (0, 1, 2):
                    tap = h1p[:, ky:ky + h, kx:kx + w, :].reshape(mt, wd_p)
                    y2 = y2 + jnp.dot(tap, w2_ref[tap_i],
                                      preferred_element_type=jnp.float32)
                    tap_i += 1

            @pl.when(p == 1)
            def _phase1():
                accumulate(s2, y2)

            @pl.when(p >= 2)
            def _phases23():
                sc2, sh2 = bn_scale_shift(s2, g2_ref, b2_ref)
                h2 = jnp.maximum(y2 * sc2 + sh2, 0.0)

                # ---- conv3 (1x1) -------------------------------------------
                y3 = jnp.dot(h2.astype(jnp.bfloat16), w3_ref[...],
                             preferred_element_type=jnp.float32)  # (mt, cout_p)

                @pl.when(p == 2)
                def _phase2():
                    accumulate(s3, y3)

                @pl.when(p == N_PHASES - 1)
                def _phase3():
                    sc3, sh3 = bn_scale_shift(s3, g3_ref, b3_ref)
                    # identity residual (downsample=None, cin_p == cout_p)
                    out = y3 * sc3 + sh3 + x_f32
                    o_ref[...] = jnp.maximum(out, 0.0)

    return kernel


# --------------------------- parameter preprocessing ------------------------

def prepare_params(p):
    """One-time: conv weights -> (Cin, Cout) matmul layout, zero-padded to
    lane-dense multiples of 128, cast to bf16 (MXU operands). BN affine stays
    f32."""
    width, cin = p["w1"].shape[0], p["w1"].shape[1]
    cout = p["w3"].shape[0]
    cin_p, wd_p, cout_p = _rup(cin, LANE), _rup(width, LANE), _rup(cout, LANE)
    assert cin_p == cout_p, "identity residual requires inplanes == planes*expansion"

    w1 = jnp.zeros((cin_p, wd_p), jnp.bfloat16).at[:cin, :width].set(
        jnp.transpose(p["w1"][:, :, 0, 0], (1, 0)).astype(jnp.bfloat16))
    w2t = jnp.transpose(p["w2"], (2, 3, 1, 0)).reshape(9, width, width)
    w2 = jnp.zeros((9, wd_p, wd_p), jnp.bfloat16).at[:, :width, :width].set(
        w2t.astype(jnp.bfloat16))
    w3 = jnp.zeros((wd_p, cout_p), jnp.bfloat16).at[:width, :cout].set(
        jnp.transpose(p["w3"][:, :, 0, 0], (1, 0)).astype(jnp.bfloat16))

    def vec(v, cp):
        return jnp.zeros((1, cp), jnp.float32).at[:, :v.shape[0]].set(
            v.astype(jnp.float32)[None, :])

    return {
        "w1": w1, "w2": w2, "w3": w3,
        "g1": vec(p["g1"], wd_p), "b1": vec(p["b1"], wd_p),
        "g2": vec(p["g2"], wd_p), "b2": vec(p["b2"], wd_p),
        "g3": vec(p["g3"], cout_p), "b3": vec(p["b3"], cout_p),
        "dims": (cin, width, cout),
    }


# --------------------------------- wrapper -----------------------------------

def bottleneck_forward(x_nchw, prep, *, tile_batch=2):
    cin, width, cout = prep["dims"]
    cin_p, wd_p = prep["w1"].shape
    cout_p = prep["w3"].shape[1]

    n, c, h, w = x_nchw.shape
    assert c == cin
    assert n % tile_batch == 0, "tiles are whole images (no halo / row masks)"
    assert (h * w) % 8 == 0, "sublane-aligned image tiles"
    m = n * h * w
    mt = tile_batch * h * w
    n_tiles = n // tile_batch

    # Single layout pass: NCHW -> channel-padded flattened NHWC rows.
    # TODO(synk): in a full ResNet keep activations in this padded-NHWC (bf16)
    # layout between blocks so this transpose/pad and the final crop vanish.
    x = jnp.transpose(x_nchw, (0, 2, 3, 1)).reshape(m, cin).astype(jnp.float32)
    x = jnp.zeros((m, cin_p), jnp.float32).at[:, :cin].set(x)

    kernel = _make_kernel(tile_batch, h, w, m, wd_p, cout_p)

    def _full(shape):
        zeros = (0,) * len(shape)
        return pl.BlockSpec(shape, lambda p, t: zeros)

    out2d = pl.pallas_call(
        kernel,
        out_shape=jax.ShapeDtypeStruct((m, cout_p), jnp.float32),
        grid=(N_PHASES, n_tiles),
        in_specs=[
            pl.BlockSpec((mt, cin_p), lambda p, t: (t, 0)),
            _full((cin_p, wd_p)),
            _full((9, wd_p, wd_p)),
            _full((wd_p, cout_p)),
            _full((1, wd_p)), _full((1, wd_p)),
            _full((1, wd_p)), _full((1, wd_p)),
            _full((1, cout_p)), _full((1, cout_p)),
        ],
        # Phases 0-2 park the (unwritten) output block at tile 0, so nothing
        # is written back to HBM until phase 3 produces real data per tile.
        out_specs=pl.BlockSpec(
            (mt, cout_p),
            lambda p, t: (jnp.where(p == N_PHASES - 1, t, 0), 0)),
        scratch_shapes=[
            pltpu.VMEM((tile_batch, h + 2, w + 2, wd_p), jnp.bfloat16),  # h1+halo
            pltpu.VMEM((2, wd_p), jnp.float32),    # BN1 sum / sumsq
            pltpu.VMEM((2, wd_p), jnp.float32),    # BN2 sum / sumsq
            pltpu.VMEM((2, cout_p), jnp.float32),  # BN3 sum / sumsq
        ],
        compiler_params=pltpu.CompilerParams(
            # Both axes are sequential: tiles accumulate global BN stats and
            # later phases consume stats produced by earlier phases.
            # TODO(synk): on v7x shard the tile axis across the 2 TensorCores
            # and combine per-core partial stats through CMEM.
            dimension_semantics=("arbitrary", "arbitrary"),
            vmem_limit_bytes=64 * 1024 * 1024),
    )(x, prep["w1"], prep["w2"], prep["w3"],
      prep["g1"], prep["b1"], prep["g2"], prep["b2"],
      prep["g3"], prep["b3"])

    out = out2d[:, :cout].reshape(n, h, w, cout)
    return jnp.transpose(out, (0, 3, 1, 2))      # NHWC -> NCHW


# --------------------------- pure-JAX reference ------------------------------

def _ref_bottleneck(x_nchw, p):
    x = jnp.transpose(x_nchw, (0, 2, 3, 1))

    def bn(y, g, b):
        mean = jnp.mean(y, axis=(0, 1, 2), keepdims=True)
        var = jnp.mean(jnp.square(y - mean), axis=(0, 1, 2), keepdims=True)
        return (y - mean) * jax.lax.rsqrt(var + EPS) * g + b

    def conv(y, wt, padding):
        wh = jnp.transpose(wt, (2, 3, 1, 0))  # OIHW -> HWIO
        return jax.lax.conv_general_dilated(
            y, wh, (1, 1), padding,
            dimension_numbers=("NHWC", "HWIO", "NHWC"))

    out = jax.nn.relu(bn(conv(x, p["w1"], "VALID"), p["g1"], p["b1"]))
    out = jax.nn.relu(bn(conv(out, p["w2"], [(1, 1), (1, 1)]), p["g2"], p["b2"]))
    out = bn(conv(out, p["w3"], "VALID"), p["g3"], p["b3"])
    out = jax.nn.relu(out + x)
    return jnp.transpose(out, (0, 3, 1, 2))


# ----------------------------------- main -------------------------------------

if __name__ == "__main__":
    # Bottleneck(inplanes=16, planes=4): width=4, out channels 16, stride=1,
    # downsample=None (identity residual), train-mode BatchNorm.
    N, INPLANES, PLANES, H, W = 4, 16, 4, 8, 8
    WIDTH = PLANES          # base_width=64, groups=1
    COUT = PLANES * 4

    key = jax.random.PRNGKey(0)
    ks = jax.random.split(key, 10)
    params = {
        "w1": 0.1 * jax.random.normal(ks[0], (WIDTH, INPLANES, 1, 1), jnp.float32),
        "g1": 1.0 + 0.1 * jax.random.normal(ks[1], (WIDTH,), jnp.float32),
        "b1": 0.1 * jax.random.normal(ks[2], (WIDTH,), jnp.float32),
        "w2": 0.1 * jax.random.normal(ks[3], (WIDTH, WIDTH, 3, 3), jnp.float32),
        "g2": 1.0 + 0.1 * jax.random.normal(ks[4], (WIDTH,), jnp.float32),
        "b2": 0.1 * jax.random.normal(ks[5], (WIDTH,), jnp.float32),
        "w3": 0.1 * jax.random.normal(ks[6], (COUT, WIDTH, 1, 1), jnp.float32),
        "g3": 1.0 + 0.1 * jax.random.normal(ks[7], (COUT,), jnp.float32),
        "b3": 0.1 * jax.random.normal(ks[8], (COUT,), jnp.float32),
    }
    x = jax.random.normal(ks[9], (N, INPLANES, H, W), jnp.float32)  # NCHW

    fwd = jax.jit(lambda xx, pp: bottleneck_forward(xx, prepare_params(pp)))
    out = jax.block_until_ready(fwd(x, params))
    ref = jax.block_until_ready(_ref_bottleneck(x, params))

    assert out.shape == (N, COUT, H, W), out.shape
    err = float(jnp.max(jnp.abs(out - ref)))
    # bf16 MXU operands (f32 accumulation / f32 BN stats) vs. all-f32 reference
    # -> typical abs error ~1e-3, allow up to 5e-2 on the ~unit-scale output.
    assert err < 5e-2, f"max abs err {err}"
    print("KERNEL_OK")
</pallas_src>

<mosaic_0001>
module attributes {stable_mosaic.version = 11 : i64} {
  func.func @kernel(%arg0: i32, %arg1: i32, %arg2: memref<128x128xf32, #tpu.memory_space<vmem>>, %arg3: memref<128x128xbf16, #tpu.memory_space<vmem>>, %arg4: memref<9x128x128xbf16, #tpu.memory_space<vmem>>, %arg5: memref<128x128xbf16, #tpu.memory_space<vmem>>, %arg6: memref<1x128xf32, #tpu.memory_space<vmem>>, %arg7: memref<1x128xf32, #tpu.memory_space<vmem>>, %arg8: memref<1x128xf32, #tpu.memory_space<vmem>>, %arg9: memref<1x128xf32, #tpu.memory_space<vmem>>, %arg10: memref<1x128xf32, #tpu.memory_space<vmem>>, %arg11: memref<1x128xf32, #tpu.memory_space<vmem>>, %arg12: memref<128x128xf32, #tpu.memory_space<vmem>>, %arg13: memref<2x10x10x128xbf16, #tpu.memory_space<vmem>>, %arg14: memref<2x128xf32, #tpu.memory_space<vmem>>, %arg15: memref<2x128xf32, #tpu.memory_space<vmem>>, %arg16: memref<2x128xf32, #tpu.memory_space<vmem>>) attributes {dimension_semantics = [#tpu.dimension_semantics<arbitrary>, #tpu.dimension_semantics<arbitrary>], iteration_bounds = array<i64: 4, 2>, scalar_prefetch = 0 : i64, scratch_operands = 4 : i64, tpu.core_type = #tpu.core_type<tc>, window_params = [{transform_indices = @transform_0, window_bounds = array<i64: 128, 128>}, {pipeline_mode = #tpu.pipeline_mode<synchronous>, transform_indices = @transform_1, window_bounds = array<i64: 128, 128>}, {pipeline_mode = #tpu.pipeline_mode<synchronous>, transform_indices = @transform_2, window_bounds = array<i64: 9, 128, 128>}, {pipeline_mode = #tpu.pipeline_mode<synchronous>, transform_indices = @transform_3, window_bounds = array<i64: 128, 128>}, {pipeline_mode = #tpu.pipeline_mode<synchronous>, transform_indices = @transform_4, window_bounds = array<i64: 1, 128>}, {pipeline_mode = #tpu.pipeline_mode<synchronous>, transform_indices = @transform_5, window_bounds = array<i64: 1, 128>}, {pipeline_mode = #tpu.pipeline_mode<synchronous>, transform_indices = @transform_6, window_bounds = array<i64: 1, 128>}, {pipeline_mode = #tpu.pipeline_mode<synchronous>, transform_indices = @transform_7, window_bounds = array<i64: 1, 128>}, {pipeline_mode = #tpu.pipeline_mode<synchronous>, transform_indices = @transform_8, window_bounds = array<i64: 1, 128>}, {pipeline_mode = #tpu.pipeline_mode<synchronous>, transform_indices = @transform_9, window_bounds = array<i64: 1, 128>}, {transform_indices = @transform_10, window_bounds = array<i64: 128, 128>}]} {
    %c0_i32 = arith.constant 0 : i32
    %0 = arith.cmpi eq, %arg0, %c0_i32 : i32
    %c0_i32_0 = arith.constant 0 : i32
    %1 = arith.cmpi eq, %arg1, %c0_i32_0 : i32
    %2 = arith.andi %0, %1 : i1
    %3 = arith.extui %2 : i1 to i32
    %c0_i32_1 = arith.constant 0 : i32
    %4 = arith.cmpi ne, %3, %c0_i32_1 : i32
    scf.if %4 {
      %cst_8 = arith.constant 0.000000e+00 : bf16
      %15 = vector.broadcast %cst_8 : bf16 to vector<2x10x10x128xbf16>
      %c0_9 = arith.constant 0 : index
      %c0_10 = arith.constant 0 : index
      %c0_11 = arith.constant 0 : index
      %c0_12 = arith.constant 0 : index
      %16 = vector.load %arg13[%c0_9, %c0_10, %c0_11, %c0_12] : memref<2x10x10x128xbf16, #tpu.memory_space<vmem>>, vector<2x10x10x128xbf16>
      tpu.vector_store %arg13[%c0_9, %c0_10, %c0_11, %c0_12], %15 {strides = array<i32>} : memref<2x10x10x128xbf16, #tpu.memory_space<vmem>>, vector<2x10x10x128xbf16>,
      %cst_13 = arith.constant 0.000000e+00 : f32
      %17 = vector.broadcast %cst_13 : f32 to vector<2x128xf32>
      %c0_14 = arith.constant 0 : index
      %c0_15 = arith.constant 0 : index
      %18 = vector.load %arg14[%c0_14, %c0_15] : memref<2x128xf32, #tpu.memory_space<vmem>>, vector<2x128xf32>
      tpu.vector_store %arg14[%c0_14, %c0_15], %17 {strides = array<i32>} : memref<2x128xf32, #tpu.memory_space<vmem>>, vector<2x128xf32>,
      %cst_16 = arith.constant 0.000000e+00 : f32
      %19 = vector.broadcast %cst_16 : f32 to vector<2x128xf32>
      %c0_17 = arith.constant 0 : index
      %c0_18 = arith.constant 0 : index
      %20 = vector.load %arg15[%c0_17, %c0_18] : memref<2x128xf32, #tpu.memory_space<vmem>>, vector<2x128xf32>
      tpu.vector_store %arg15[%c0_17, %c0_18], %19 {strides = array<i32>} : memref<2x128xf32, #tpu.memory_space<vmem>>, vector<2x128xf32>,
      %cst_19 = arith.constant 0.000000e+00 : f32
      %21 = vector.broadcast %cst_19 : f32 to vector<2x128xf32>
      %c0_20 = arith.constant 0 : index
      %c0_21 = arith.constant 0 : index
      %22 = vector.load %arg16[%c0_20, %c0_21] : memref<2x128xf32, #tpu.memory_space<vmem>>, vector<2x128xf32>
      tpu.vector_store %arg16[%c0_20, %c0_21], %21 {strides = array<i32>} : memref<2x128xf32, #tpu.memory_space<vmem>>, vector<2x128xf32>,
    } else {
    }
    %c0 = arith.constant 0 : index
    %c0_2 = arith.constant 0 : index
    %5 = vector.load %arg2[%c0, %c0_2] : memref<128x128xf32, #tpu.memory_space<vmem>>, vector<128x128xf32>
    %6 = arith.truncf %5 : vector<128x128xf32> to vector<128x128xbf16>
    %c0_3 = arith.constant 0 : index
    %c0_4 = arith.constant 0 : index
    %7 = vector.load %arg3[%c0_3, %c0_4] : memref<128x128xbf16, #tpu.memory_space<vmem>>, vector<128x128xbf16>
    %cst = arith.constant dense<0.000000e+00> : vector<128x128xf32>
    %8 = tpu.matmul %6, %7, %cst {dimension_numbers = #tpu.dot_dimension_numbers<[1], [0], [0], [1], [0, 0, 1, 1], [], []>} : vector<128x128xbf16>, vector<128x128xbf16>, vector<128x128xf32> -> vector<128x128xf32>
    %c0_i32_5 = arith.constant 0 : i32
    %9 = arith.cmpi eq, %arg0, %c0_i32_5 : i32
    %10 = arith.extui %9 : i1 to i32
    %c0_i32_6 = arith.constant 0 : i32
    %11 = arith.cmpi ne, %10, %c0_i32_6 : i32
    scf.if %11 {
      %c0_8 = arith.constant 0 : index
      %c0_9 = arith.constant 0 : index
      %15 = vector.load %arg14[%c0_8, %c0_9] : memref<2x128xf32, #tpu.memory_space<vmem>>, vector<1x128xf32>
      %cst_10 = arith.constant dense<0.000000e+00> : vector<128xf32>
      %16 = vector.multi_reduction <add>, %8, %cst_10 [0] : vector<128x128xf32> to vector<128xf32>
      %17 = vector.shape_cast %16 : vector<128xf32> to vector<1x128xf32>
      %18 = arith.addf %15, %17 : vector<1x128xf32>
      %c0_11 = arith.constant 0 : index
      %c0_12 = arith.constant 0 : index
      %19 = vector.load %arg14[%c0_11, %c0_12] : memref<2x128xf32, #tpu.memory_space<vmem>>, vector<1x128xf32>
      tpu.vector_store %arg14[%c0_11, %c0_12], %18 {strides = array<i32>} : memref<2x128xf32, #tpu.memory_space<vmem>>, vector<1x128xf32>,
      %c1 = arith.constant 1 : index
      %c0_13 = arith.constant 0 : index
      %20 = vector.load %arg14[%c1, %c0_13] : memref<2x128xf32, #tpu.memory_space<vmem>>, vector<1x128xf32>
      %21 = arith.mulf %8, %8 : vector<128x128xf32>
      %cst_14 = arith.constant dense<0.000000e+00> : vector<128xf32>
      %22 = vector.multi_reduction <add>, %21, %cst_14 [0] : vector<128x128xf32> to vector<128xf32>
      %23 = vector.shape_cast %22 : vector<128xf32> to vector<1x128xf32>
      %24 = arith.addf %20, %23 : vector<1x128xf32>
      %c1_15 = arith.constant 1 : index
      %c0_16 = arith.constant 0 : index
      %25 = vector.load %arg14[%c1_15, %c0_16] : memref<2x128xf32, #tpu.memory_space<vmem>>, vector<1x128xf32>
      tpu.vector_store %arg14[%c1_15, %c0_16], %24 {strides = array<i32>} : memref<2x128xf32, #tpu.memory_space<vmem>>, vector<1x128xf32>,
    } else {
    }
    %c1_i32 = arith.constant 1 : i32
    %12 = arith.cmpi sge, %arg0, %c1_i32 : i32
    %13 = arith.extui %12 : i1 to i32
    %c0_i32_7 = arith.constant 0 : i32
    %14 = arith.cmpi ne, %13, %c0_i32_7 : i32
    scf.if %14 {
      %c0_8 = arith.constant 0 : index
      %c0_9 = arith.constant 0 : index
      %15 = vector.load %arg14[%c0_8, %c0_9] : memref<2x128xf32, #tpu.memory_space<vmem>>, vector<1x128xf32>
      %cst_10 = arith.constant 3.906250e-03 : f32
      %16 = vector.broadcast %cst_10 : f32 to vector<1x128xf32>
      %17 = arith.mulf %15, %16 : vector<1x128xf32>
      %c1 = arith.constant 1 : index
      %c0_11 = arith.constant 0 : index
      %18 = vector.load %arg14[%c1, %c0_11] : memref<2x128xf32, #tpu.memory_space<vmem>>, vector<1x128xf32>
      %cst_12 = arith.constant 3.906250e-03 : f32
      %19 = vector.broadcast %cst_12 : f32 to vector<1x128xf32>
      %20 = arith.mulf %18, %19 : vector<1x128xf32>
      %21 = arith.mulf %17, %17 : vector<1x128xf32>
      %22 = arith.subf %20, %21 : vector<1x128xf32>
      %c0_13 = arith.constant 0 : index
      %c0_14 = arith.constant 0 : index
      %23 = vector.load %arg6[%c0_13, %c0_14] : memref<1x128xf32, #tpu.memory_space<vmem>>, vector<1x128xf32>
      %cst_15 = arith.constant 9.99999974E-6 : f32
      %24 = vector.broadcast %cst_15 : f32 to vector<1x128xf32>
      %25 = arith.addf %22, %24 : vector<1x128xf32>
      %26 = math.rsqrt %25 : vector<1x128xf32>
      %27 = arith.mulf %23, %26 : vector<1x128xf32>
      %c0_16 = arith.constant 0 : index
      %c0_17 = arith.constant 0 : index
      %28 = vector.load %arg7[%c0_16, %c0_17] : memref<1x128xf32, #tpu.memory_space<vmem>>, vector<1x128xf32>
      %29 = arith.mulf %17, %27 : vector<1x128xf32>
      %30 = arith.subf %28, %29 : vector<1x128xf32>
      %31 = vector.broadcast %27 : vector<1x128xf32> to vector<128x128xf32>
      %32 = arith.mulf %8, %31 : vector<128x128xf32>
      %33 = vector.broadcast %30 : vector<1x128xf32> to vector<128x128xf32>
      %34 = arith.addf %32, %33 : vector<128x128xf32>
      %cst_18 = arith.constant 0.000000e+00 : f32
      %35 = vector.broadcast %cst_18 : f32 to vector<128x128xf32>
      %36 = arith.maximumf %34, %35 : vector<128x128xf32>
      %37 = arith.truncf %36 : vector<128x128xf32> to vector<128x128xbf16>
      %38 = vector.shape_cast %37 : vector<128x128xbf16> to vector<2x8x8x128xbf16>
      %c0_19 = arith.constant 0 : index
      %c1_20 = arith.constant 1 : index
      %c1_21 = arith.constant 1 : index
      %c0_22 = arith.constant 0 : index
      %39 = vector.load %arg13[%c0_19, %c1_20, %c1_21, %c0_22] : memref<2x10x10x128xbf16, #tpu.memory_space<vmem>>, vector<2x8x8x128xbf16>
      tpu.vector_store %arg13[%c0_19, %c1_20, %c1_21, %c0_22], %38 {strides = array<i32>} : memref<2x10x10x128xbf16, #tpu.memory_space<vmem>>, vector<2x8x8x128xbf16>,
      %cst_23 = arith.constant 0.000000e+00 : f32
      %40 = vector.broadcast %cst_23 : f32 to vector<128x128xf32>
      %c0_24 = arith.constant 0 : index
      %c0_25 = arith.constant 0 : index
      %c0_26 = arith.constant 0 : index
      %c0_27 = arith.constant 0 : index
      %41 = vector.load %arg13[%c0_24, %c0_25, %c0_26, %c0_27] : memref<2x10x10x128xbf16, #tpu.memory_space<vmem>>, vector<2x8x8x128xbf16>
      %42 = vector.shape_cast %41 : vector<2x8x8x128xbf16> to vector<128x128xbf16>
      %c0_28 = arith.constant 0 : index
      %c0_29 = arith.constant 0 : index
      %c0_30 = arith.constant 0 : index
      %43 = vector.load %arg4[%c0_28, %c0_29, %c0_30] : memref<9x128x128xbf16, #tpu.memory_space<vmem>>, vector<1x128x128xbf16>
      %44 = vector.shape_cast %43 : vector<1x128x128xbf16> to vector<128x128xbf16>
      %cst_31 = arith.constant dense<0.000000e+00> : vector<128x128xf32>
      %45 = tpu.matmul %42, %44, %cst_31 {dimension_numbers = #tpu.dot_dimension_numbers<[1], [0], [0], [1], [0, 0, 1, 1], [], []>} : vector<128x128xbf16>, vector<128x128xbf16>, vector<128x128xf32> -> vector<128x128xf32>
      %46 = arith.addf %40, %45 : vector<128x128xf32>
      %c0_32 = arith.constant 0 : index
      %c0_33 = arith.constant 0 : index
      %c1_34 = arith.constant 1 : index
      %c0_35 = arith.constant 0 : index
      %47 = vector.load %arg13[%c0_32, %c0_33, %c1_34, %c0_35] : memref<2x10x10x128xbf16, #tpu.memory_space<vmem>>, vector<2x8x8x128xbf16>
      %48 = vector.shape_cast %47 : vector<2x8x8x128xbf16> to vector<128x128xbf16>
      %c1_36 = arith.constant 1 : index
      %c0_37 = arith.constant 0 : index
      %c0_38 = arith.constant 0 : index
      %49 = vector.load %arg4[%c1_36, %c0_37, %c0_38] : memref<9x128x128xbf16, #tpu.memory_space<vmem>>, vector<1x128x128xbf16>
      %50 = vector.shape_cast %49 : vector<1x128x128xbf16> to vector<128x128xbf16>
      %cst_39 = arith.constant dense<0.000000e+00> : vector<128x128xf32>
      %51 = tpu.matmul %48, %50, %cst_39 {dimension_numbers = #tpu.dot_dimension_numbers<[1], [0], [0], [1], [0, 0, 1, 1], [], []>} : vector<128x128xbf16>, vector<128x128xbf16>, vector<128x128xf32> -> vector<128x128xf32>
      %52 = arith.addf %46, %51 : vector<128x128xf32>
      %c0_40 = arith.constant 0 : index
      %c0_41 = arith.constant 0 : index
      %c2 = arith.constant 2 : index
      %c0_42 = arith.constant 0 : index
      %53 = vector.load %arg13[%c0_40, %c0_41, %c2, %c0_42] : memref<2x10x10x128xbf16, #tpu.memory_space<vmem>>, vector<2x8x8x128xbf16>
      %54 = vector.shape_cast %53 : vector<2x8x8x128xbf16> to vector<128x128xbf16>
      %c2_43 = arith.constant 2 : index
      %c0_44 = arith.constant 0 : index
      %c0_45 = arith.constant 0 : index
      %55 = vector.load %arg4[%c2_43, %c0_44, %c0_45] : memref<9x128x128xbf16, #tpu.memory_space<vmem>>, vector<1x128x128xbf16>
      %56 = vector.shape_cast %55 : vector<1x128x128xbf16> to vector<128x128xbf16>
      %cst_46 = arith.constant dense<0.000000e+00> : vector<128x128xf32>
      %57 = tpu.matmul %54, %56, %cst_46 {dimension_numbers = #tpu.dot_dimension_numbers<[1], [0], [0], [1], [0, 0, 1, 1], [], []>} : vector<128x128xbf16>, vector<128x128xbf16>, vector<128x128xf32> -> vector<128x128xf32>
      %58 = arith.addf %52, %57 : vector<128x128xf32>
      %c0_47 = arith.constant 0 : index
      %c1_48 = arith.constant 1 : index
      %c0_49 = arith.constant 0 : index
      %c0_50 = arith.constant 0 : index
      %59 = vector.load %arg13[%c0_47, %c1_48, %c0_49, %c0_50] : memref<2x10x10x128xbf16, #tpu.memory_space<vmem>>, vector<2x8x8x128xbf16>
      %60 = vector.shape_cast %59 : vector<2x8x8x128xbf16> to vector<128x128xbf16>
      %c3 = arith.constant 3 : index
      %c0_51 = arith.constant 0 : index
      %c0_52 = arith.constant 0 : index
      %61 = vector.load %arg4[%c3, %c0_51, %c0_52] : memref<9x128x128xbf16, #tpu.memory_space<vmem>>, vector<1x128x128xbf16>
      %62 = vector.shape_cast %61 : vector<1x128x128xbf16> to vector<128x128xbf16>
      %cst_53 = arith.constant dense<0.000000e+00> : vector<128x128xf32>
      %63 = tpu.matmul %60, %62, %cst_53 {dimension_numbers = #tpu.dot_dimension_numbers<[1], [0], [0], [1], [0, 0, 1, 1], [], []>} : vector<128x128xbf16>, vector<128x128xbf16>, vector<128x128xf32> -> vector<128x128xf32>
      %64 = arith.addf %58, %63 : vector<128x128xf32>
      %c0_54 = arith.constant 0 : index
      %c1_55 = arith.constant 1 : index
      %c1_56 = arith.constant 1 : index
      %c0_57 = arith.constant 0 : index
      %65 = vector.load %arg13[%c0_54, %c1_55, %c1_56, %c0_57] : memref<2x10x10x128xbf16, #tpu.memory_space<vmem>>, vector<2x8x8x128xbf16>
      %66 = vector.shape_cast %65 : vector<2x8x8x128xbf16> to vector<128x128xbf16>
      %c4 = arith.constant 4 : index
      %c0_58 = arith.constant 0 : index
      %c0_59 = arith.constant 0 : index
      %67 = vector.load %arg4[%c4, %c0_58, %c0_59] : memref<9x128x128xbf16, #tpu.memory_space<vmem>>, vector<1x128x128xbf16>
      %68 = vector.shape_cast %67 : vector<1x128x128xbf16> to vector<128x128xbf16>
      %cst_60 = arith.constant dense<0.000000e+00> : vector<128x128xf32>
      %69 = tpu.matmul %66, %68, %cst_60 {dimension_numbers = #tpu.dot_dimension_numbers<[1], [0], [0], [1], [0, 0, 1, 1], [], []>} : vector<128x128xbf16>, vector<128x128xbf16>, vector<128x128xf32> -> vector<128x128xf32>
      %70 = arith.addf %64, %69 : vector<128x128xf32>
      %c0_61 = arith.constant 0 : index
      %c1_62 = arith.constant 1 : index
      %c2_63 = arith.constant 2 : index
      %c0_64 = arith.constant 0 : index
      %71 = vector.load %arg13[%c0_61, %c1_62, %c2_63, %c0_64] : memref<2x10x10x128xbf16, #tpu.memory_space<vmem>>, vector<2x8x8x128xbf16>
      %72 = vector.shape_cast %71 : vector<2x8x8x128xbf16> to vector<128x128xbf16>
      %c5 = arith.constant 5 : index
      %c0_65 = arith.constant 0 : index
      %c0_66 = arith.constant 0 : index
      %73 = vector.load %arg4[%c5, %c0_65, %c0_66] : memref<9x128x128xbf16, #tpu.memory_space<vmem>>, vector<1x128x128xbf16>
      %74 = vector.shape_cast %73 : vector<1x128x128xbf16> to vector<128x128xbf16>
      %cst_67 = arith.constant dense<0.000000e+00> : vector<128x128xf32>
      %75 = tpu.matmul %72, %74, %cst_67 {dimension_numbers = #tpu.dot_dimension_numbers<[1], [0], [0], [1], [0, 0, 1, 1], [], []>} : vector<128x128xbf16>, vector<128x128xbf16>, vector<128x128xf32> -> vector<128x128xf32>
      %76 = arith.addf %70, %75 : vector<128x128xf32>
      %c0_68 = arith.constant 0 : index
      %c2_69 = arith.constant 2 : index
      %c0_70 = arith.constant 0 : index
      %c0_71 = arith.constant 0 : index
      %77 = vector.load %arg13[%c0_68, %c2_69, %c0_70, %c0_71] : memref<2x10x10x128xbf16, #tpu.memory_space<vmem>>, vector<2x8x8x128xbf16>
      %78 = vector.shape_cast %77 : vector<2x8x8x128xbf16> to vector<128x128xbf16>
      %c6 = arith.constant 6 : index
      %c0_72 = arith.constant 0 : index
      %c0_73 = arith.constant 0 : index
      %79 = vector.load %arg4[%c6, %c0_72, %c0_73] : memref<9x128x128xbf16, #tpu.memory_space<vmem>>, vector<1x128x128xbf16>
      %80 = vector.shape_cast %79 : vector<1x128x128xbf16> to vector<128x128xbf16>
      %cst_74 = arith.constant dense<0.000000e+00> : vector<128x128xf32>
      %81 = tpu.matmul %78, %80, %cst_74 {dimension_numbers = #tpu.dot_dimension_numbers<[1], [0], [0], [1], [0, 0, 1, 1], [], []>} : vector<128x128xbf16>, vector<128x128xbf16>, vector<128x128xf32> -> vector<128x128xf32>
      %82 = arith.addf %76, %81 : vector<128x128xf32>
      %c0_75 = arith.constant 0 : index
      %c2_76 = arith.constant 2 : index
      %c1_77 = arith.constant 1 : index
      %c0_78 = arith.constant 0 : index
      %83 = vector.load %arg13[%c0_75, %c2_76, %c1_77, %c0_78] : memref<2x10x10x128xbf16, #tpu.memory_space<vmem>>, vector<2x8x8x128xbf16>
      %84 = vector.shape_cast %83 : vector<2x8x8x128xbf16> to vector<128x128xbf16>
      %c7 = arith.constant 7 : index
      %c0_79 = arith.constant 0 : index
      %c0_80 = arith.constant 0 : index
      %85 = vector.load %arg4[%c7, %c0_79, %c0_80] : memref<9x128x128xbf16, #tpu.memory_space<vmem>>, vector<1x128x128xbf16>
      %86 = vector.shape_cast %85 : vector<1x128x128xbf16> to vector<128x128xbf16>
      %cst_81 = arith.constant dense<0.000000e+00> : vector<128x128xf32>
      %87 = tpu.matmul %84, %86, %cst_81 {dimension_numbers = #tpu.dot_dimension_numbers<[1], [0], [0], [1], [0, 0, 1, 1], [], []>} : vector<128x128xbf16>, vector<128x128xbf16>, vector<128x128xf32> -> vector<128x128xf32>
      %88 = arith.addf %82, %87 : vector<128x128xf32>
      %c0_82 = arith.constant 0 : index
      %c2_83 = arith.constant 2 : index
      %c2_84 = arith.constant 2 : index
      %c0_85 = arith.constant 0 : index
      %89 = vector.load %arg13[%c0_82, %c2_83, %c2_84, %c0_85] : memref<2x10x10x128xbf16, #tpu.memory_space<vmem>>, vector<2x8x8x128xbf16>
      %90 = vector.shape_cast %89 : vector<2x8x8x128xbf16> to vector<128x128xbf16>
      %c8 = arith.constant 8 : index
      %c0_86 = arith.constant 0 : index
      %c0_87 = arith.constant 0 : index
      %91 = vector.load %arg4[%c8, %c0_86, %c0_87] : memref<9x128x128xbf16, #tpu.memory_space<vmem>>, vector<1x128x128xbf16>
      %92 = vector.shape_cast %91 : vector<1x128x128xbf16> to vector<128x128xbf16>
      %cst_88 = arith.constant dense<0.000000e+00> : vector<128x128xf32>
      %93 = tpu.matmul %90, %92, %cst_88 {dimension_numbers = #tpu.dot_dimension_numbers<[1], [0], [0], [1], [0, 0, 1, 1], [], []>} : vector<128x128xbf16>, vector<128x128xbf16>, vector<128x128xf32> -> vector<128x128xf32>
      %94 = arith.addf %88, %93 : vector<128x128xf32>
      %c1_i32_89 = arith.constant 1 : i32
      %95 = arith.cmpi eq, %arg0, %c1_i32_89 : i32
      %96 = arith.extui %95 : i1 to i32
      %c0_i32_90 = arith.constant 0 : i32
      %97 = arith.cmpi ne, %96, %c0_i32_90 : i32
      scf.if %97 {
        %c0_92 = arith.constant 0 : index
        %c0_93 = arith.constant 0 : index
        %101 = vector.load %arg15[%c0_92, %c0_93] : memref<2x128xf32, #tpu.memory_space<vmem>>, vector<1x128xf32>
        %cst_94 = arith.constant dense<0.000000e+00> : vector<128xf32>
        %102 = vector.multi_reduction <add>, %94, %cst_94 [0] : vector<128x128xf32> to vector<128xf32>
        %103 = vector.shape_cast %102 : vector<128xf32> to vector<1x128xf32>
        %104 = arith.addf %101, %103 : vector<1x128xf32>
        %c0_95 = arith.constant 0 : index
        %c0_96 = arith.constant 0 : index
        %105 = vector.load %arg15[%c0_95, %c0_96] : memref<2x128xf32, #tpu.memory_space<vmem>>, vector<1x128xf32>
        tpu.vector_store %arg15[%c0_95, %c0_96], %104 {strides = array<i32>} : memref<2x128xf32, #tpu.memory_space<vmem>>, vector<1x128xf32>,
        %c1_97 = arith.constant 1 : index
        %c0_98 = arith.constant 0 : index
        %106 = vector.load %arg15[%c1_97, %c0_98] : memref<2x128xf32, #tpu.memory_space<vmem>>, vector<1x128xf32>
        %107 = arith.mulf %94, %94 : vector<128x128xf32>
        %cst_99 = arith.constant dense<0.000000e+00> : vector<128xf32>
        %108 = vector.multi_reduction <add>, %107, %cst_99 [0] : vector<128x128xf32> to vector<128xf32>
        %109 = vector.shape_cast %108 : vector<128xf32> to vector<1x128xf32>
        %110 = arith.addf %106, %109 : vector<1x128xf32>
        %c1_100 = arith.constant 1 : index
        %c0_101 = arith.constant 0 : index
        %111 = vector.load %arg15[%c1_100, %c0_101] : memref<2x128xf32, #tpu.memory_space<vmem>>, vector<1x128xf32>
        tpu.vector_store %arg15[%c1_100, %c0_101], %110 {strides = array<i32>} : memref<2x128xf32, #tpu.memory_space<vmem>>, vector<1x128xf32>,
      } else {
      }
      %c2_i32 = arith.constant 2 : i32
      %98 = arith.cmpi sge, %arg0, %c2_i32 : i32
      %99 = arith.extui %98 : i1 to i32
      %c0_i32_91 = arith.constant 0 : i32
      %100 = arith.cmpi ne, %99, %c0_i32_91 : i32
      scf.if %100 {
        %c0_92 = arith.constant 0 : index
        %c0_93 = arith.constant 0 : index
        %101 = vector.load %arg15[%c0_92, %c0_93] : memref<2x128xf32, #tpu.memory_space<vmem>>, vector<1x128xf32>
        %cst_94 = arith.constant 3.906250e-03 : f32
        %102 = vector.broadcast %cst_94 : f32 to vector<1x128xf32>
        %103 = arith.mulf %101, %102 : vector<1x128xf32>
        %c1_95 = arith.constant 1 : index
        %c0_96 = arith.constant 0 : index
        %104 = vector.load %arg15[%c1_95, %c0_96] : memref<2x128xf32, #tpu.memory_space<vmem>>, vector<1x128xf32>
        %cst_97 = arith.constant 3.906250e-03 : f32
        %105 = vector.broadcast %cst_97 : f32 to vector<1x128xf32>
        %106 = arith.mulf %104, %105 : vector<1x128xf32>
        %107 = arith.mulf %103, %103 : vector<1x128xf32>
        %108 = arith.subf %106, %107 : vector<1x128xf32>
        %c0_98 = arith.constant 0 : index
        %c0_99 = arith.constant 0 : index
        %109 = vector.load %arg8[%c0_98, %c0_99] : memref<1x128xf32, #tpu.memory_space<vmem>>, vector<1x128xf32>
        %cst_100 = arith.constant 9.99999974E-6 : f32
        %110 = vector.broadcast %cst_100 : f32 to vector<1x128xf32>
        %111 = arith.addf %108, %110 : vector<1x128xf32>
        %112 = math.rsqrt %111 : vector<1x128xf32>
        %113 = arith.mulf %109, %112 : vector<1x128xf32>
        %c0_101 = arith.constant 0 : index
        %c0_102 = arith.constant 0 : index
        %114 = vector.load %arg9[%c0_101, %c0_102] : memref<1x128xf32, #tpu.memory_space<vmem>>, vector<1x128xf32>
        %115 = arith.mulf %103, %113 : vector<1x128xf32>
        %116 = arith.subf %114, %115 : vector<1x128xf32>
        %117 = vector.broadcast %113 : vector<1x128xf32> to vector<128x128xf32>
        %118 = arith.mulf %94, %117 : vector<128x128xf32>
        %119 = vector.broadcast %116 : vector<1x128xf32> to vector<128x128xf32>
        %120 = arith.addf %118, %119 : vector<128x128xf32>
        %cst_103 = arith.constant 0.000000e+00 : f32
        %121 = vector.broadcast %cst_103 : f32 to vector<128x128xf32>
        %122 = arith.maximumf %120, %121 : vector<128x128xf32>
        %123 = arith.truncf %122 : vector<128x128xf32> to vector<128x128xbf16>
        %c0_104 = arith.constant 0 : index
        %c0_105 = arith.constant 0 : index
        %124 = vector.load %arg5[%c0_104, %c0_105] : memref<128x128xbf16, #tpu.memory_space<vmem>>, vector<128x128xbf16>
        %cst_106 = arith.constant dense<0.000000e+00> : vector<128x128xf32>
        %125 = tpu.matmul %123, %124, %cst_106 {dimension_numbers = #tpu.dot_dimension_numbers<[1], [0], [0], [1], [0, 0, 1, 1], [], []>} : vector<128x128xbf16>, vector<128x128xbf16>, vector<128x128xf32> -> vector<128x128xf32>
        %c2_i32_107 = arith.constant 2 : i32
        %126 = arith.cmpi eq, %arg0, %c2_i32_107 : i32
        %127 = arith.extui %126 : i1 to i32
        %c0_i32_108 = arith.constant 0 : i32
        %128 = arith.cmpi ne, %127, %c0_i32_108 : i32
        scf.if %128 {
          %c0_110 = arith.constant 0 : index
          %c0_111 = arith.constant 0 : index
          %132 = vector.load %arg16[%c0_110, %c0_111] : memref<2x128xf32, #tpu.memory_space<vmem>>, vector<1x128xf32>
          %cst_112 = arith.constant dense<0.000000e+00> : vector<128xf32>
          %133 = vector.multi_reduction <add>, %125, %cst_112 [0] : vector<128x128xf32> to vector<128xf32>
          %134 = vector.shape_cast %133 : vector<128xf32> to vector<1x128xf32>
          %135 = arith.addf %132, %134 : vector<1x128xf32>
          %c0_113 = arith.constant 0 : index
          %c0_114 = arith.constant 0 : index
          %136 = vector.load %arg16[%c0_113, %c0_114] : memref<2x128xf32, #tpu.memory_space<vmem>>, vector<1x128xf32>
          tpu.vector_store %arg16[%c0_113, %c0_114], %135 {strides = array<i32>} : memref<2x128xf32, #tpu.memory_space<vmem>>, vector<1x128xf32>,
          %c1_115 = arith.constant 1 : index
          %c0_116 = arith.constant 0 : index
          %137 = vector.load %arg16[%c1_115, %c0_116] : memref<2x128xf32, #tpu.memory_space<vmem>>, vector<1x128xf32>
          %138 = arith.mulf %125, %125 : vector<128x128xf32>
          %cst_117 = arith.constant dense<0.000000e+00> : vector<128xf32>
          %139 = vector.multi_reduction <add>, %138, %cst_117 [0] : vector<128x128xf32> to vector<128xf32>
          %140 = vector.shape_cast %139 : vector<128xf32> to vector<1x128xf32>
          %141 = arith.addf %137, %140 : vector<1x128xf32>
          %c1_118 = arith.constant 1 : index
          %c0_119 = arith.constant 0 : index
          %142 = vector.load %arg16[%c1_118, %c0_119] : memref<2x128xf32, #tpu.memory_space<vmem>>, vector<1x128xf32>
          tpu.vector_store %arg16[%c1_118, %c0_119], %141 {strides = array<i32>} : memref<2x128xf32, #tpu.memory_space<vmem>>, vector<1x128xf32>,
        } else {
        }
        %c3_i32 = arith.constant 3 : i32
        %129 = arith.cmpi eq, %arg0, %c3_i32 : i32
        %130 = arith.extui %129 : i1 to i32
        %c0_i32_109 = arith.constant 0 : i32
        %131 = arith.cmpi ne, %130, %c0_i32_109 : i32
        scf.if %131 {
          %c0_110 = arith.constant 0 : index
          %c0_111 = arith.constant 0 : index
          %132 = vector.load %arg16[%c0_110, %c0_111] : memref<2x128xf32, #tpu.memory_space<vmem>>, vector<1x128xf32>
          %cst_112 = arith.constant 3.906250e-03 : f32
          %133 = vector.broadcast %cst_112 : f32 to vector<1x128xf32>
          %134 = arith.mulf %132, %133 : vector<1x128xf32>
          %c1_113 = arith.constant 1 : index
          %c0_114 = arith.constant 0 : index
          %135 = vector.load %arg16[%c1_113, %c0_114] : memref<2x128xf32, #tpu.memory_space<vmem>>, vector<1x128xf32>
          %cst_115 = arith.constant 3.906250e-03 : f32
          %136 = vector.broadcast %cst_115 : f32 to vector<1x128xf32>
          %137 = arith.mulf %135, %136 : vector<1x128xf32>
          %138 = arith.mulf %134, %134 : vector<1x128xf32>
          %139 = arith.subf %137, %138 : vector<1x128xf32>
          %c0_116 = arith.constant 0 : index
          %c0_117 = arith.constant 0 : index
          %140 = vector.load %arg10[%c0_116, %c0_117] : memref<1x128xf32, #tpu.memory_space<vmem>>, vector<1x128xf32>
          %cst_118 = arith.constant 9.99999974E-6 : f32
          %141 = vector.broadcast %cst_118 : f32 to vector<1x128xf32>
          %142 = arith.addf %139, %141 : vector<1x128xf32>
          %143 = math.rsqrt %142 : vector<1x128xf32>
          %144 = arith.mulf %140, %143 : vector<1x128xf32>
          %c0_119 = arith.constant 0 : index
          %c0_120 = arith.constant 0 : index
          %145 = vector.load %arg11[%c0_119, %c0_120] : memref<1x128xf32, #tpu.memory_space<vmem>>, vector<1x128xf32>
          %146 = arith.mulf %134, %144 : vector<1x128xf32>
          %147 = arith.subf %145, %146 : vector<1x128xf32>
          %148 = vector.broadcast %144 : vector<1x128xf32> to vector<128x128xf32>
          %149 = arith.mulf %125, %148 : vector<128x128xf32>
          %150 = vector.broadcast %147 : vector<1x128xf32> to vector<128x128xf32>
          %151 = arith.addf %149, %150 : vector<128x128xf32>
          %152 = arith.addf %151, %5 : vector<128x128xf32>
          %cst_121 = arith.constant 0.000000e+00 : f32
          %153 = vector.broadcast %cst_121 : f32 to vector<128x128xf32>
          %154 = arith.maximumf %152, %153 : vector<128x128xf32>
          %c0_122 = arith.constant 0 : index
          %c0_123 = arith.constant 0 : index
          %155 = vector.load %arg12[%c0_122, %c0_123] : memref<128x128xf32, #tpu.memory_space<vmem>>, vector<128x128xf32>
          tpu.vector_store %arg12[%c0_122, %c0_123], %154 {strides = array<i32>} : memref<128x128xf32, #tpu.memory_space<vmem>>, vector<128x128xf32>,
        } else {
        }
      } else {
      }
    } else {
    }
    return
  }
  func.func @transform_0(%arg0: i32, %arg1: i32) -> (i32, i32) {
    %c0_i32 = arith.constant 0 : i32
    %c0_i32_0 = arith.constant 0 : i32
    return %arg1, %c0_i32 : i32, i32
  }
  func.func @transform_1(%arg0: i32, %arg1: i32) -> (i32, i32) {
    %c0_i32 = arith.constant 0 : i32
    %c0_i32_0 = arith.constant 0 : i32
    %c0_i32_1 = arith.constant 0 : i32
    return %c0_i32, %c0_i32_0 : i32, i32
  }
  func.func @transform_2(%arg0: i32, %arg1: i32) -> (i32, i32, i32) {
    %c0_i32 = arith.constant 0 : i32
    %c0_i32_0 = arith.constant 0 : i32
    %c0_i32_1 = arith.constant 0 : i32
    %c0_i32_2 = arith.constant 0 : i32
    return %c0_i32, %c0_i32_0, %c0_i32_1 : i32, i32, i32
  }
  func.func @transform_3(%arg0: i32, %arg1: i32) -> (i32, i32) {
    %c0_i32 = arith.constant 0 : i32
    %c0_i32_0 = arith.constant 0 : i32
    %c0_i32_1 = arith.constant 0 : i32
    return %c0_i32, %c0_i32_0 : i32, i32
  }
  func.func @transform_4(%arg0: i32, %arg1: i32) -> (i32, i32) {
    %c0_i32 = arith.constant 0 : i32
    %c0_i32_0 = arith.constant 0 : i32
    %c0_i32_1 = arith.constant 0 : i32
    return %c0_i32, %c0_i32_0 : i32, i32
  }
  func.func @transform_5(%arg0: i32, %arg1: i32) -> (i32, i32) {
    %c0_i32 = arith.constant 0 : i32
    %c0_i32_0 = arith.constant 0 : i32
    %c0_i32_1 = arith.constant 0 : i32
    return %c0_i32, %c0_i32_0 : i32, i32
  }
  func.func @transform_6(%arg0: i32, %arg1: i32) -> (i32, i32) {
    %c0_i32 = arith.constant 0 : i32
    %c0_i32_0 = arith.constant 0 : i32
    %c0_i32_1 = arith.constant 0 : i32
    return %c0_i32, %c0_i32_0 : i32, i32
  }
  func.func @transform_7(%arg0: i32, %arg1: i32) -> (i32, i32) {
    %c0_i32 = arith.constant 0 : i32
    %c0_i32_0 = arith.constant 0 : i32
    %c0_i32_1 = arith.constant 0 : i32
    return %c0_i32, %c0_i32_0 : i32, i32
  }
  func.func @transform_8(%arg0: i32, %arg1: i32) -> (i32, i32) {
    %c0_i32 = arith.constant 0 : i32
    %c0_i32_0 = arith.constant 0 : i32
    %c0_i32_1 = arith.constant 0 : i32
    return %c0_i32, %c0_i32_0 : i32, i32
  }
  func.func @transform_9(%arg0: i32, %arg1: i32) -> (i32, i32) {
    %c0_i32 = arith.constant 0 : i32
    %c0_i32_0 = arith.constant 0 : i32
    %c0_i32_1 = arith.constant 0 : i32
    return %c0_i32, %c0_i32_0 : i32, i32
  }
  func.func @transform_10(%arg0: i32, %arg1: i32) -> (i32, i32) {
    %c3_i32 = arith.constant 3 : i32
    %0 = arith.cmpi eq, %arg0, %c3_i32 : i32
    %c0_i32 = arith.constant 0 : i32
    %1 = arith.select %0, %arg1, %c0_i32 : i32
    %c0_i32_0 = arith.constant 0 : i32
    %c0_i32_1 = arith.constant 0 : i32
    return %1, %c0_i32_0 : i32, i32
  }
}

</mosaic_0001>

<bundles_post_ra>
// kernel: _lambda_.1
= control target key start
LH: loop header
LB: loop body
LE: loop exit
PB: predicated region body
PF: predicated region fallthrough
CT: control target
= control target key end

     0   :  { %s8454_s0 = inlined_call_operand.hbm [shape: f32[256,128], index: 0, kind: input, shape index: {}]   ;;  %s8455_s1 = inlined_call_operand.hbm [shape: bf16[128,128], index: 1, kind: input, shape index: {}]   ;;  %s8456_s2 = inlined_call_operand.hbm [shape: bf16[9,128,128], index: 2, kind: input, shape index: {}]   ;;  %s8457_s3 = inlined_call_operand.hbm [shape: bf16[128,128], index: 3, kind: input, shape index: {}]   ;;  %s8458_s4 = inlined_call_operand.hbm [shape: f32[1,128], index: 4, kind: input, shape index: {}]   ;;  %s8459_s5 = inlined_call_operand.hbm [shape: f32[1,128], index: 5, kind: input, shape index: {}]   ;;  %s8460_s6 = inlined_call_operand.hbm [shape: f32[1,128], index: 6, kind: input, shape index: {}]   ;;  %s8461_s7 = inlined_call_operand.hbm [shape: f32[1,128], index: 7, kind: input, shape index: {}]   ;;  %s8462_s8 = inlined_call_operand.hbm [shape: f32[1,128], index: 8, kind: input, shape index: {}]   ;;  %s8463_s9 = inlined_call_operand.hbm [shape: f32[1,128], index: 9, kind: input, shape index: {}]   ;;  %s8464_s10 = inlined_call_operand.hbm [shape: f32[256,128], index: 10, kind: output, shape index: {}]  }
   0x1   :  { %8500 = sst [smem:[#allocation56_spill]] %s8454_s0 }
   0x2   :  { %8501 = sst [smem:[#allocation57_spill]] %s8455_s1 }
   0x3   :  { %8502 = sst [smem:[#allocation58_spill]] %s8456_s2 }
   0x4   :  { %8503 = sst [smem:[#allocation59_spill]] %s8457_s3 }
   0x5   :  { %8504 = sst [smem:[#allocation60_spill]] %s8458_s4 }
   0x6   :  { %8505 = sst [smem:[#allocation61_spill]] %s8464_s10 }
   0x7   :  { %15 = vsyncpa [#allocation7], 0 }
   0x8   :  { %17 = vsyncpa [#allocation7 + $0x1], 0 }
   0x9   :  { %18 = vsyncpa [#allocation10], 0 }
   0xa   :  { %19 = vsyncpa [#allocation13], 0 }
   0xb   :  { %20 = vsyncpa [#allocation16], 0 }
   0xc   :  { %21 = vsyncpa [#allocation19], 0 }
   0xd   :  { %22 = vsyncpa [#allocation22], 0 }
   0xe   :  { %23 = vsyncpa [#allocation8], 0 }
   0xf   :  { %25 = vsyncpa [#allocation8 + $0x1], 0  ;;  %s6753_s13 = smov 0   ;;  %s6755_s14 = smov 0  }
  0x10   :  { %s6757_s15 = smov 0   ;;  %s6759_s16 = smov 0  }
  0x11   :  { %s6761_s17 = smov 0   ;;  %s6763_s18 = smov 0  }
  0x12   :  { %s6765_s19 = smov 0   ;;  %s6767_s20 = smov 0  }
  0x13   :  { %s6769_s21 = smov 0   ;;  %s6771_s22 = smov 0  }
  0x14   :  { %s6773_s23 = smov 0  }
  0x15 LB: > { %8506 = sst [smem:[#allocation31_spill]] %s6637_s13  ;;  %s8465_s24 = sadd.s32 4294967295, %s6677_s23   ;;  %s6677_s23 = sphi %s6773_s23, %s31_s23   ;;  %s6673_s22 = sphi %s6771_s22, %s8626_s22   ;;  %s6669_s21 = sphi %s6769_s21, %s8625_s21   ;;  %s6665_s20 = sphi %s6767_s20, %s8624_s20   ;;  %s6661_s19 = sphi %s6765_s19, %s8623_s19   ;;  %s6657_s18 = sphi %s6763_s18, %s8622_s18   ;;  %s6653_s17 = sphi %s6761_s17, %s8621_s17   ;;  %s6649_s16 = sphi %s6759_s16, %s8620_s16   ;;  %s6645_s15 = sphi %s6757_s15, %s8619_s15   ;;  %s6641_s14 = sphi %s6755_s14, %s8618_s14   ;;  %s6637_s13 = sphi %s6753_s13, %s8614_s13  }
  0x16   : > { %8507 = sst [smem:[#allocation32_spill]] %s6641_s14  ;;  %p4934_p0 = scmp.ge.s32.totalorder %s6677_s23, 1 }
  0x17   : > { %8508 = sst [smem:[#allocation33_spill]] %s6645_s15  ;;  %p6812_p1 = scmp.eq.s32.totalorder %s8465_s24, 0 }
  0x18   : > { %8509 = sst [smem:[#allocation34_spill]] %s6661_s19  ;;  %p293_p2 = scmp.lt.s32.totalorder %s6677_s23, 9 }
  0x19   : > { %8510 = sst [smem:[#allocation35_spill]] %s6665_s20  ;;  %s6679_s27 = smov [#allocation9]  }
  0x1a   : > { %s8511_s25 = scalar_select %p6812_p1, 1, 0 }
  0x1b   : > { %p6817_p3 = pnand %p4934_p0, %p293_p2  ;;  %s305_s28 = sshll.u32 %s6679_s27, 4  ;;  %s6821_s28 = int_to_ptr.vmem [resolvable:$true] %s305_s28 }
  0x1c   : > { %8512 = sst [smem:[#allocation36_spill]] %s8511_s25  ;;  %s6680_s30 = smov [#allocation12]  }
  0x1d   : > { %s8513_s26 = scalar_select %p6817_p3, 1, 0 }
  0x1e   : > { %p5957_p4 = pneg %p6817_p3  ;;  %s331_s11 = sshll.u32 %s6680_s30, 4  ;;  %s6831_s11 = int_to_ptr.vmem [resolvable:$true] %s331_s11 }
  0x1f   : > { %8514 = sst [smem:[#allocation37_spill]] %s8513_s26  ;;  %s6681_s12 = smov [#allocation15]  }
  0x20   : > { %p6827_p5 = pnand %p5957_p4, %p6812_p1  ;;  %s6833_s24 = sshll.u32 %s6681_s12, 4  ;;  %s357_s24 = int_to_ptr.vmem [resolvable:$true] %s6833_s24 }
  0x21   : > { %s8516_s1 = sld [smem:[#allocation57_spill]] }
  0x22   : > { %p6843_p7 = pneg %p6827_p5 }
  0x27   : > { %s6253_s27 = scalar_lea.hbm %s8516_s1, 1024 }
  0x28   : > { %p6254_p6 = scmp.ne.s32.totalorder %s8516_s1, %s6253_s27  ;;  %p6260_p10 = scmp.lt.u32.totalorder %s6253_s27, %s8516_s1 }
  0x2a   : > { %p6256_p8 = pnand %p6843_p7, %p6254_p6 }
  0x2c   : > { %p6257_p9 = pneg %p6256_p8 }
  0x2e   : > { %p6262_p11 = pnand %p6260_p10, %p6257_p9 }
  0x30   : > { %6265 = shalt.err (!%p6262_p11)
}
  0x31   : > { %s6266_s10 = scalar_lea.vmem %s6821_s28, 1024  ;;  %p6274_p2 = scmp.lt.s32.totalorder %s6821_s28, %s6821_s28 }
  0x32   : > { %p6267_p12 = scmp.ne.s32.totalorder %s6821_s28, %s6266_s10  ;;  %p6275_p4 = scmp.lt.s32.totalorder %s6266_s10, %s6266_s10 }
  0x34   : > { %p6269_p13 = pnand %p6267_p12, %p6843_p7  ;;  %p6276_p6 = por %p6275_p4, %p6274_p2 }
  0x36   : > { %p6270_p0 = pneg %p6269_p13 }
  0x38   : > { %p6277_p8 = pnand %p6276_p6, %p6270_p0 }
  0x3a   : > { %6280 = shalt.err (!%p6277_p8)
}
  0x3b   : > { %s8477_s19 = smov 64   ;;  %s6683_s20 = smov 4  }
  0x3c   : > { %5960 = dma.hbm_to_vmem [thread:$0]  (!%p6827_p5), %s8516_s1, 1024, %s6821_s28, [#allocation10], %s8477_s19, %s8477_s19, %s6683_s20  }
  0x3d   : > { %s8518_s3 = sld [smem:[#allocation59_spill]] }
  0x43   : > { %s6281_s10 = scalar_lea.hbm %s8518_s3, 1024 }
  0x44   : > { %p6282_p9 = scmp.ne.s32.totalorder %s8518_s3, %s6281_s10  ;;  %p6288_p12 = scmp.lt.u32.totalorder %s6281_s10, %s8518_s3 }
  0x46   : > { %p6284_p10 = pnand %p6282_p9, %p6843_p7 }
  0x48   : > { %p6285_p11 = pneg %p6284_p10 }
  0x4a   : > { %p6290_p13 = pnand %p6288_p12, %p6285_p11 }
  0x4c   : > { %6293 = shalt.err (!%p6290_p13)
}
  0x4d   : > { %s6294_s28 = scalar_lea.vmem %s6831_s11, 1024  ;;  %p6302_p6 = scmp.lt.s32.totalorder %s6831_s11, %s6831_s11 }
  0x4e   : > { %p6295_p0 = scmp.ne.s32.totalorder %s6831_s11, %s6294_s28  ;;  %p6303_p8 = scmp.lt.s32.totalorder %s6294_s28, %s6294_s28 }
  0x50   : > { %p6297_p2 = pnand %p6295_p0, %p6843_p7  ;;  %p6304_p9 = por %p6303_p8, %p6302_p6 }
  0x52   : > { %p6298_p4 = pneg %p6297_p2 }
  0x54   : > { %p6305_p10 = pnand %p6304_p9, %p6298_p4 }
  0x56   : > { %6308 = shalt.err (!%p6305_p10)
}
  0x57   : > { %5966 = dma.hbm_to_vmem [thread:$0]  (!%p6827_p5), %s8518_s3, 1024, %s6831_s11, [#allocation13], %s8477_s19, %s8477_s19, %s6683_s20  }
  0x58   : > { %s6309_s26 = scalar_lea.hbm %s8459_s5, 16 }
  0x59   : > { %p6310_p11 = scmp.ne.s32.totalorder %s8459_s5, %s6309_s26  ;;  %p6316_p0 = scmp.lt.u32.totalorder %s6309_s26, %s8459_s5 }
  0x5b   : > { %p6312_p12 = pnand %p6310_p11, %p6843_p7 }
  0x5d   : > { %p6313_p13 = pneg %p6312_p12 }
  0x5f   : > { %p6318_p2 = pnand %p6316_p0, %p6313_p13 }
  0x61   : > { %6321 = shalt.err (!%p6318_p2)
}
  0x62   : > { %s6322_s28 = scalar_lea.vmem %s357_s24, 16  ;;  %s6329_s11 = scalar_lea.vmem %s357_s24, 32 }
  0x63   : > { %p6323_p4 = scmp.ne.s32.totalorder %s357_s24, %s6322_s28  ;;  %p6330_p9 = scmp.lt.s32.totalorder %s357_s24, %s357_s24 }
  0x64   : > { %p6331_p10 = scmp.lt.s32.totalorder %s6329_s11, %s6322_s28 }
  0x65   : > { %p6325_p6 = pnand %p6323_p4, %p6843_p7 }
  0x66   : > { %p6332_p3 = por %p6331_p10, %p6330_p9 }
  0x67   : > { %p6326_p8 = pneg %p6325_p6 }
  0x69   : > { %p6333_p1 = pnand %p6332_p3, %p6326_p8 }
  0x6b   : > { %6336 = shalt.err (!%p6333_p1)
}
  0x6c   : > { %5972 = dma.hbm_to_vmem [thread:$0]  (!%p6827_p5), %s8459_s5, 16, %s357_s24, [#allocation16]  }
  0x6d   : > { %s6684_s15 = smov [#allocation18]   ;;  %s6685_s26 = smov [#allocation11]  }
  0x6e   : > { %s378_s25 = sshll.u32 %s6684_s15, 4  ;;  %s318_s27 = sshll.u32 %s6685_s26, 4  ;;  %s379_s25 = int_to_ptr.vmem [resolvable:$true] %s378_s25  ;;  %s319_s27 = int_to_ptr.vmem [resolvable:$true] %s318_s27 }
  0x6f   : > { %s6337_s10 = scalar_lea.hbm %s8461_s7, 16 }
  0x70   : > { %p6338_p1 = scmp.ne.s32.totalorder %s8461_s7, %s6337_s10  ;;  %p6344_p12 = scmp.lt.u32.totalorder %s6337_s10, %s8461_s7 }
  0x72   : > { %p6340_p3 = pnand %p6338_p1, %p6843_p7 }
  0x74   : > { %p6341_p11 = pneg %p6340_p3 }
  0x76   : > { %p6346_p13 = pnand %p6344_p12, %p6341_p11 }
  0x78   : > { %6349 = shalt.err (!%p6346_p13)
}
  0x79   : > { %s6350_s24 = scalar_lea.vmem %s379_s25, 16  ;;  %s6357_s14 = scalar_lea.vmem %s379_s25, 32 }
  0x7a   : > { %p6351_p0 = scmp.ne.s32.totalorder %s379_s25, %s6350_s24  ;;  %p6358_p6 = scmp.lt.s32.totalorder %s379_s25, %s379_s25 }
  0x7b   : > { %p6359_p8 = scmp.lt.s32.totalorder %s6357_s14, %s6350_s24 }
  0x7c   : > { %p6353_p2 = pnand %p6351_p0, %p6843_p7 }
  0x7d   : > { %p6360_p9 = por %p6359_p8, %p6358_p6 }
  0x7e   : > { %p6354_p4 = pneg %p6353_p2 }
  0x80   : > { %p6361_p10 = pnand %p6360_p9, %p6354_p4 }
  0x82   : > { %6364 = shalt.err (!%p6361_p10)
}
  0x83   : > { %5978 = dma.hbm_to_vmem [thread:$0]  (!%p6827_p5), %s8461_s7, 16, %s379_s25, [#allocation19]  }
  0x84   : > { %s8519_s2 = sld [smem:[#allocation58_spill]] }
  0x8a   : > { %s6365_s12 = scalar_lea.hbm %s8519_s2, 9216 }
  0x8b   : > { %p6366_p1 = scmp.ne.s32.totalorder %s8519_s2, %s6365_s12  ;;  %p6372_p12 = scmp.lt.u32.totalorder %s6365_s12, %s8519_s2 }
  0x8d   : > { %p6368_p3 = pnand %p6366_p1, %p6843_p7 }
  0x8f   : > { %p6369_p11 = pneg %p6368_p3 }
  0x91   : > { %p6374_p13 = pnand %p6372_p12, %p6369_p11 }
  0x93   : > { %6377 = shalt.err (!%p6374_p13)
}
  0x94   : > { %s6378_s24 = scalar_lea.vmem %s319_s27, 9216  ;;  %p6386_p6 = scmp.lt.s32.totalorder %s319_s27, %s319_s27 }
  0x95   : > { %p6379_p0 = scmp.ne.s32.totalorder %s319_s27, %s6378_s24  ;;  %p6387_p8 = scmp.lt.s32.totalorder %s6378_s24, %s6378_s24 }
  0x97   : > { %p6381_p2 = pnand %p6379_p0, %p6843_p7  ;;  %p6388_p9 = por %p6387_p8, %p6386_p6 }
  0x99   : > { %p6382_p4 = pneg %p6381_p2 }
  0x9b   : > { %p6389_p10 = pnand %p6388_p9, %p6382_p4 }
  0x9d   : > { %6392 = shalt.err (!%p6389_p10)
}
  0x9e   : > { %s8520_s25 = smov 64   ;;  %s6686_s26 = smov [#allocation14]  }
  0x9f   : > { %5963 = dma.hbm_to_vmem [thread:$0]  (!%p6827_p5), %s8519_s2, 9216, %s319_s27, [#allocation10], %s8520_s25, %s8520_s25, %s6683_s20  }
  0xa0   : > { %s345_s19 = sshll.u32 %s6686_s26, 4  ;;  %s6687_s30 = smov [#allocation17]   ;;  %s346_s19 = int_to_ptr.vmem [resolvable:$true] %s345_s19 }
  0xa1   : > { %s367_s12 = sshll.u32 %s6687_s30, 4  ;;  %s8521_s4 = sld [smem:[#allocation60_spill]]  ;;  %s368_s12 = int_to_ptr.vmem [resolvable:$true] %s367_s12 }
  0xa7   : > { %s6393_s11 = scalar_lea.hbm %s8521_s4, 16 }
  0xa8   : > { %p6394_p1 = scmp.ne.s32.totalorder %s8521_s4, %s6393_s11  ;;  %p6400_p12 = scmp.lt.u32.totalorder %s6393_s11, %s8521_s4 }
  0xaa   : > { %p6396_p3 = pnand %p6394_p1, %p6843_p7 }
  0xac   : > { %p6397_p11 = pneg %p6396_p3 }
  0xae   : > { %p6402_p13 = pnand %p6400_p12, %p6397_p11 }
  0xb0   : > { %6405 = shalt.err (!%p6402_p13)
}
  0xb1   : > { %s6406_s20 = scalar_lea.vmem %s346_s19, 16  ;;  %s6413_s27 = scalar_lea.vmem %s346_s19, 32 }
  0xb2   : > { %p6407_p0 = scmp.ne.s32.totalorder %s346_s19, %s6406_s20  ;;  %p6414_p6 = scmp.lt.s32.totalorder %s346_s19, %s346_s19 }
  0xb3   : > { %p6415_p8 = scmp.lt.s32.totalorder %s6413_s27, %s6406_s20 }
  0xb4   : > { %p6409_p2 = pnand %p6407_p0, %p6843_p7 }
  0xb5   : > { %p6416_p9 = por %p6415_p8, %p6414_p6 }
  0xb6   : > { %p6410_p4 = pneg %p6409_p2 }
  0xb8   : > { %p6417_p10 = pnand %p6416_p9, %p6410_p4 }
  0xba   : > { %6420 = shalt.err (!%p6417_p10)
}
  0xbb   : > { %5969 = dma.hbm_to_vmem [thread:$0]  (!%p6827_p5), %s8521_s4, 16, %s346_s19, [#allocation13]  }
  0xbc   : > { %s6421_s30 = scalar_lea.hbm %s8460_s6, 16 }
  0xbd   : > { %p6422_p1 = scmp.ne.s32.totalorder %s8460_s6, %s6421_s30  ;;  %p6428_p12 = scmp.lt.u32.totalorder %s6421_s30, %s8460_s6 }
  0xbf   : > { %p6424_p3 = pnand %p6422_p1, %p6843_p7 }
  0xc1   : > { %p6425_p11 = pneg %p6424_p3 }
  0xc3   : > { %p6430_p13 = pnand %p6428_p12, %p6425_p11 }
  0xc5   : > { %6433 = shalt.err (!%p6430_p13)
}
  0xc6   : > { %s6434_s24 = scalar_lea.vmem %s368_s12, 16  ;;  %s6441_s19 = scalar_lea.vmem %s368_s12, 32 }
  0xc7   : > { %p6435_p0 = scmp.ne.s32.totalorder %s368_s12, %s6434_s24  ;;  %p6442_p6 = scmp.lt.s32.totalorder %s368_s12, %s368_s12 }
  0xc8   : > { %p6443_p8 = scmp.lt.s32.totalorder %s6441_s19, %s6434_s24 }
  0xc9   : > { %p6437_p2 = pnand %p6435_p0, %p6843_p7 }
  0xca   : > { %p6444_p9 = por %p6443_p8, %p6442_p6 }
  0xcb   : > { %p6438_p4 = pneg %p6437_p2 }
  0xcd   : > { %p6445_p10 = pnand %p6444_p9, %p6438_p4 }
  0xcf   : > { %6448 = shalt.err (!%p6445_p10)
}
  0xd0   : > { %5975 = dma.hbm_to_vmem [thread:$0]  (!%p6827_p5), %s8460_s6, 16, %s368_s12, [#allocation16]  }
  0xd1   : > { %s6688_s27 = smov [#allocation20]   ;;  %s6689_s15 = smov [#allocation21]  }
  0xd2   : > { %s389_s25 = sshll.u32 %s6688_s27, 4  ;;  %s400_s1 = sshll.u32 %s6689_s15, 4  ;;  %s390_s25 = int_to_ptr.vmem [resolvable:$true] %s389_s25  ;;  %s401_s1 = int_to_ptr.vmem [resolvable:$true] %s400_s1 }
  0xd3   : > { %s6449_s10 = scalar_lea.hbm %s8462_s8, 16 }
  0xd4   : > { %p6450_p1 = scmp.ne.s32.totalorder %s8462_s8, %s6449_s10  ;;  %p6456_p12 = scmp.lt.u32.totalorder %s6449_s10, %s8462_s8 }
  0xd6   : > { %p6452_p3 = pnand %p6450_p1, %p6843_p7 }
  0xd8   : > { %p6453_p11 = pneg %p6452_p3 }
  0xda   : > { %p6458_p13 = pnand %p6456_p12, %p6453_p11 }
  0xdc   : > { %6461 = shalt.err (!%p6458_p13)
}
  0xdd   : > { %s6462_s12 = scalar_lea.vmem %s390_s25, 16  ;;  %s6469_s19 = scalar_lea.vmem %s390_s25, 32 }
  0xde   : > { %p6463_p0 = scmp.ne.s32.totalorder %s390_s25, %s6462_s12  ;;  %p6470_p6 = scmp.lt.s32.totalorder %s390_s25, %s390_s25 }
  0xdf   : > { %p6471_p8 = scmp.lt.s32.totalorder %s6469_s19, %s6462_s12 }
  0xe0   : > { %p6465_p2 = pnand %p6463_p0, %p6843_p7 }
  0xe1   : > { %p6472_p9 = por %p6471_p8, %p6470_p6 }
  0xe2   : > { %p6466_p4 = pneg %p6465_p2 }
  0xe4   : > { %p6473_p10 = pnand %p6472_p9, %p6466_p4 }
  0xe6   : > { %6476 = shalt.err (!%p6473_p10)
}
  0xe7   : > { %5981 = dma.hbm_to_vmem [thread:$0]  (!%p6827_p5), %s8462_s8, 16, %s390_s25, [#allocation19]  }
  0xe8   : > { %s6477_s26 = scalar_lea.hbm %s8463_s9, 16 }
  0xe9   : > { %p6478_p1 = scmp.ne.s32.totalorder %s8463_s9, %s6477_s26  ;;  %p6484_p12 = scmp.lt.u32.totalorder %s6477_s26, %s8463_s9 }
  0xeb   : > { %p6480_p3 = pnand %p6478_p1, %p6843_p7 }
  0xed   : > { %p6481_p11 = pneg %p6480_p3 }
  0xef   : > { %p6486_p13 = pnand %p6484_p12, %p6481_p11 }
  0xf1   : > { %6489 = shalt.err (!%p6486_p13)
}
  0xf2   : > { %s6490_s13 = scalar_lea.vmem %s401_s1, 16  ;;  %s6497_s25 = scalar_lea.vmem %s401_s1, 32 }
  0xf3   : > { %p6491_p0 = scmp.ne.s32.totalorder %s401_s1, %s6490_s13  ;;  %p6498_p6 = scmp.lt.s32.totalorder %s401_s1, %s401_s1 }
  0xf4   : > { %p6499_p8 = scmp.lt.s32.totalorder %s6497_s25, %s6490_s13 }
  0xf5   : > { %p6493_p2 = pnand %p6491_p0, %p6843_p7 }
  0xf6   : > { %p6500_p9 = por %p6499_p8, %p6498_p6 }
  0xf7   : > { %p6494_p4 = pneg %p6493_p2 }
  0xf9   : > { %p6501_p10 = pnand %p6500_p9, %p6494_p4 }
  0xfb   : > { %6504 = shalt.err (!%p6501_p10)
}
  0xfc   : > { %5984 = dma.hbm_to_vmem [thread:$0]  (!%p6827_p5), %s8463_s9, 16, %s401_s1, [#allocation22]  }
  0xfd   : > { %s4933_s0 = sadd.s32 4294967294, %s6677_s23   ;;  %s40_s19 = sadd.s32 1, %s6669_s21 }
  0xfe   : > { %s8522_s29 = sld [smem:[#allocation36_spill]]  ;;  %s43_s14 = sadd.s32 1, %s6673_s22 }
  0xff   : > { %p41_p7 = scmp.ge.s32.totalorder %s40_s19, 2  ;;  %s50_s20 = sadd.s32 1, %s6657_s18 }
 0x100   : > { %p57_p1 = scmp.ne.s32.totalorder %s6657_s18, %s6653_s17  ;;  %s8523_s27 = sld [smem:[#allocation33_spill]] }
 0x101   : > { %p58_p3 = scmp.eq.s32.totalorder %s6677_s23, 0  ;;  %s8524_s15 = sld [smem:[#allocation32_spill]] }
 0x102   : > { %s8628_s19 = smov (%p41_p7, %s40_s19), 0  ;;  %s8630_s14 = smov (!%p41_p7, %s43_s14), %s6673_s22 }
 0x103   : > { %s47_s1 = ssub.s32 %s6669_s21, %s8628_s19  ;;  %p7035_p5 = por %p58_p3, %p57_p1 }
 0x104   : > { %s8526_s30 = sld [smem:[#allocation31_spill]]  ;;  %p45_p11 = scmp.ge.s32.totalorder %s8630_s14, 4 }
 0x105   : > { %p48_p12 = scmp.eq.s32.totalorder %s47_s1, 0  ;;  %p63_p13 = scmp.ne.s32.totalorder %s6653_s17, %s6649_s16 }
 0x106   : > { %p262_p0 = scmp.eq.s32.totalorder %s6673_s22, 3  ;;  %s8632_s14 = smov (%p45_p11, %s8630_s14), 0 }
 0x107   : > { %s7045_s10 = scalar_select %p48_p12, %s6657_s18, %s50_s20  }
 0x108   : > { %p8527_p2 = scmp.ne.s32.totalorder %s8522_s29, 0  ;;  %p264_p6 = scmp.eq.s32.totalorder %s8632_s14, 3 }
 0x109   : > { %s263_s11 = scalar_select %p262_p0, %s6669_s21, 0 }
 0x10a   : > { %p7049_p4 = por %p8527_p2, %p63_p13  ;;  %s269_s25 = sadd.s32 1, %s8523_s27 }
 0x10b   : > { %s265_s13 = scalar_select %p264_p6, %s8628_s19, 0 }
 0x10c   : > { %p279_p8 = scmp.ne.s32.totalorder %s8523_s27, %s8524_s15  ;;  %s8529_s24 = sadd.s32 4294967295, %s6677_s23  }
 0x10d   : > { %s266_s16 = ssub.s32 %s263_s11, %s265_s13  ;;  %p280_p9 = scmp.eq.s32.totalorder %s8529_s24, 7 }
 0x10e   : > { %p267_p10 = scmp.eq.s32.totalorder %s266_s16, 0  ;;  %p285_p7 = scmp.ne.s32.totalorder %s8524_s15, %s8526_s30 }
 0x10f   : > { %p7063_p1 = por %p280_p9, %p279_p8  ;;  %p286_p3 = scmp.eq.s32.totalorder %s4933_s0, 7 }
 0x110   : > { %s8634_s27 = smov (!%p267_p10, %s8523_s27), %s269_s25  ;;  %p6002_p12 = scmp.lt.s32.totalorder %s6677_s23, 8 }
 0x111   : > { %s8530_s12 = scalar_select %p7063_p1, 1, 0 }
 0x112   : > { %p7070_p11 = por %p286_p3, %p285_p7  ;;  %s411_s20 = sand.u32 1, %s6657_s18  }
 0x113   : > { %s5195_s1 = sshll.u32 %s6669_s21, 11  ;;  %s4945_s2 = sshll.u32 %s411_s20, 7 }
 0x114   : > { %s8531_s29 = scalar_select %p7070_p11, 1, 0 }
 0x115   : > { %s8532_s24 = sld [smem:[#allocation56_spill]]  ;;  %s415_s0 = scalar_lea.vmem [#allocation6], %s4945_s2 }
 0x116   : > { %s422_s15 = sshll.u32 %s415_s0, 4  ;;  %p7084_p13 = pnand %p6002_p12, %p7035_p5  ;;  %s7088_s15 = int_to_ptr.vmem [resolvable:$true] %s422_s15 }
 0x117   : > { %s7090_s25 = scalar_lea.sflag [#allocation7], %s411_s20 }
 0x118   : > { %p6507_p2 = pneg %p7084_p13 }
 0x11b   : > { %s7080_s16 = scalar_lea.hbm %s8532_s24, %s5195_s1  ;;  %s6510_s1 = scalar_lea.hbm %s8532_s24, 4096 }
 0x11c   : > { %s6505_s11 = scalar_lea.hbm %s7080_s16, 2048  ;;  %p6511_p5 = scmp.lt.u32.totalorder %s7080_s16, %s8532_s24 }
 0x11d   : > { %p6506_p0 = scmp.ne.s32.totalorder %s7080_s16, %s6505_s11  ;;  %p6512_p9 = scmp.lt.u32.totalorder %s6510_s1, %s6505_s11 }
 0x11e   : > { %p6514_p7 = scmp.lt.u32.totalorder %s6505_s11, %s7080_s16 }
 0x11f   : > { %p6508_p6 = pnand %p6507_p2, %p6506_p0  ;;  %p6513_p10 = por %p6512_p9, %p6511_p5 }
 0x121   : > { %p6509_p8 = pneg %p6508_p6  ;;  %p6515_p3 = por %p6514_p7, %p6513_p10 }
 0x123   : > { %p6516_p12 = pnand %p6515_p3, %p6509_p8 }
 0x125   : > { %6519 = shalt.err (!%p6516_p12)
}
 0x126   : > { %s6520_s20 = scalar_lea.vmem %s7088_s15, 2048  ;;  %s6690_s2 = smov [#allocation6]  }
 0x127   : > { %p6521_p0 = scmp.ne.s32.totalorder %s7088_s15, %s6520_s20  ;;  %s6525_s26 = sshll.u32 %s6690_s2, 4  ;;  %s6526_s26 = int_to_ptr.vmem [resolvable:$false] %s6525_s26 }
 0x128   : > { %s6527_s13 = scalar_lea.vmem %s6526_s26, 4096  ;;  %p6528_p1 = scmp.lt.s32.totalorder %s7088_s15, %s6526_s26 }
 0x129   : > { %p6523_p6 = pnand %p6521_p0, %p6507_p2  ;;  %p6529_p5 = scmp.lt.s32.totalorder %s6527_s13, %s6520_s20 }
 0x12b   : > { %p6524_p11 = pneg %p6523_p6  ;;  %p6530_p9 = por %p6529_p5, %p6528_p1 }
 0x12d   : > { %p6531_p10 = pnand %p6530_p9, %p6524_p11 }
 0x12f   : > { %6534 = shalt.err (!%p6531_p10)
}
 0x130   : > { %s6691_s11 = smov 128   ;;  %s6692_s1 = smov 8  }
 0x131   : > { %5988 = dma.hbm_to_vmem [thread:$0]  (!%p7084_p13), %s7080_s16, 2048, %s7088_s15, %s7090_s25, %s6691_s11, %s6691_s11, %s6692_s1  }
 0x132   : > { %s8534_s0 = sld [smem:[#allocation37_spill]] }
 0x138   : > { %p8535_p2 = scmp.ne.s32.totalorder %s8534_s0, 0 }
 0x13a   : > { %434 = sbr.rel (%p8535_p2) target bundleno = 1608 (0x648), region = 60 }
 0x141   : > { %s436_s2 = sand.u32 1, %s6653_s17  }
 0x142   : > { %s4949_s3 = sshll.u32 %s436_s2, 7  ;;  %s437_s26 = scalar_lea.sflag [#allocation7], %s436_s2 }
 0x143   : > { %s7121_s20 = scalar_lea.vmem [#allocation6], %s4949_s3 }
 0x144   : > { %6608 = dma.done.wait (%p7049_p4), %s437_s26, 2048  }
 0x145   : > { %6610 = vsyncadd (%p7049_p4), %s437_s26, 4294965248  ;;  %s8536_s13 = sld [smem:[#allocation36_spill]] }
 0x14b   : > { %p8537_p1 = scmp.ne.s32.totalorder %s8536_s13, 0 }
 0x14d   : > { %6612 = dma.done.wait (%p8537_p1), [#allocation10], 10240  }
 0x14e   : > { %6614 = vsyncadd (%p8537_p1), [#allocation10], 4294957056 }
 0x14f   : > { %6616 = dma.done.wait (%p8537_p1), [#allocation13], 1040  }
 0x150   : > { %6618 = vsyncadd (%p8537_p1), [#allocation13], 4294966256 }
 0x151   : > { %6620 = dma.done.wait (%p8537_p1), [#allocation16], 32  }
 0x152   : > { %6622 = vsyncadd (%p8537_p1), [#allocation16], 4294967264 }
 0x153   : > { %6624 = dma.done.wait (%p8537_p1), [#allocation19], 32  }
 0x154   : > { %6626 = vsyncadd (%p8537_p1), [#allocation19], 4294967264 }
 0x155   : > { %6628 = dma.done.wait (%p8537_p1), [#allocation22], 16  }
 0x156   : > { %6630 = vsyncadd (%p8537_p1), [#allocation22], 4294967280  ;;  %s8538_s3 = sld [smem:[#allocation32_spill]]  ;;  %s8539_s28 = sld [smem:[#allocation35_spill]] }
 0x157   : > { %s8540_s16 = sld [smem:[#allocation34_spill]] }
 0x15c   : > { %s510_s15 = sand.u32 1, %s8538_s3   ;;  %p518_p4 = scmp.eq.s32.totalorder %s8539_s28, 0 }
 0x15d   : > { %s4959_s30 = sshll.u32 %s510_s15, 7  ;;  %p519_p11 = scmp.eq.s32.totalorder %s8540_s16, 0 }
 0x15e   : > { %s7152_s25 = scalar_lea.vmem [#allocation23], %s4959_s30 }
 0x15f   : > { %p520_p13 = pnand %p519_p11, %p518_p4 }
 0x160   : > { %v6693_v0 = vmov (!%p520_p13), 0   ;;  %v6694_v1 = vmov (!%p520_p13), 0.0  }
 0x161   : > { %523 = sbr.rel (%p520_p13) target bundleno = 375 (0x177), region = 104  ;;  %524 = vst [vmem:[#allocation2] sm:$0xf] (!%p520_p13), %v6693_v0  ;;  %525 = vst [vmem:[#allocation2 + $0x4] sm:$0x1] (!%p520_p13), %v6693_v0 }
 0x162   : > { %526 = vst [vmem:[#allocation2 + $0x8] sm:$0xf] (!%p520_p13), %v6693_v0  ;;  %527 = vst [vmem:[#allocation2 + $0xc] sm:$0x1] (!%p520_p13), %v6693_v0 }
 0x163   : > { %528 = vst [vmem:[#allocation2 + $0x10] sm:$0xf] (!%p520_p13), %v6693_v0  ;;  %529 = vst [vmem:[#allocation2 + $0x14] sm:$0x1] (!%p520_p13), %v6693_v0 }
 0x164   : > { %530 = vst [vmem:[#allocation2 + $0x18] sm:$0xf] (!%p520_p13), %v6693_v0  ;;  %531 = vst [vmem:[#allocation2 + $0x1c] sm:$0x1] (!%p520_p13), %v6693_v0 }
 0x165   : > { %532 = vst [vmem:[#allocation2 + $0x20] sm:$0xf] (!%p520_p13), %v6693_v0  ;;  %533 = vst [vmem:[#allocation2 + $0x24] sm:$0x1] (!%p520_p13), %v6693_v0 }
 0x166   : > { %534 = vst [vmem:[#allocation2 + $0x28] sm:$0xf] (!%p520_p13), %v6693_v0  ;;  %535 = vst [vmem:[#allocation2 + $0x2c] sm:$0x1] (!%p520_p13), %v6693_v0 }
 0x167   : > { %536 = vst [vmem:[#allocation2 + $0x30] sm:$0xf] (!%p520_p13), %v6693_v0  ;;  %537 = vst [vmem:[#allocation2 + $0x34] sm:$0x1] (!%p520_p13), %v6693_v0 }
 0x168   : > { %538 = vst [vmem:[#allocation2 + $0x38] sm:$0xf] %v6693_v0  ;;  %539 = vst [vmem:[#allocation2 + $0x3c] sm:$0x1] %v6693_v0 }
 0x169   : > { %540 = vst [vmem:[#allocation2 + $0x40] sm:$0xf] %v6693_v0  ;;  %541 = vst [vmem:[#allocation2 + $0x44] sm:$0x1] %v6693_v0 }
 0x16a   : > { %542 = vst [vmem:[#allocation2 + $0x48] sm:$0xf] %v6693_v0  ;;  %543 = vst [vmem:[#allocation2 + $0x4c] sm:$0x1] %v6693_v0 }
 0x16b   : > { %544 = vst [vmem:[#allocation2 + $0x50] sm:$0xf] %v6693_v0  ;;  %545 = vst [vmem:[#allocation2 + $0x54] sm:$0x1] %v6693_v0 }
 0x16c   : > { %546 = vst [vmem:[#allocation2 + $0x58] sm:$0xf] %v6693_v0  ;;  %547 = vst [vmem:[#allocation2 + $0x5c] sm:$0x1] %v6693_v0 }
 0x16d   : > { %548 = vst [vmem:[#allocation2 + $0x60] sm:$0xf] %v6693_v0  ;;  %549 = vst [vmem:[#allocation2 + $0x64] sm:$0x1] %v6693_v0 }
 0x16e   : > { %550 = vst [vmem:[#allocation2 + $0x68] sm:$0xf] %v6693_v0  ;;  %551 = vst [vmem:[#allocation2 + $0x6c] sm:$0x1] %v6693_v0 }
 0x16f   : > { %552 = vst [vmem:[#allocation2 + $0x70] sm:$0xf] %v6693_v0  ;;  %553 = vst [vmem:[#allocation2 + $0x74] sm:$0x1] %v6693_v0 }
 0x170   : > { %554 = vst [vmem:[#allocation2 + $0x78] sm:$0xf] %v6693_v0  ;;  %555 = vst [vmem:[#allocation2 + $0x7c] sm:$0x1] %v6693_v0 }
 0x171   : > { %556 = vst [vmem:[#allocation2 + $0x80] sm:$0xf] %v6693_v0  ;;  %557 = vst [vmem:[#allocation2 + $0x84] sm:$0x1] %v6693_v0 }
 0x172   : > { %558 = vst [vmem:[#allocation2 + $0x88] sm:$0xf] %v6693_v0  ;;  %559 = vst [vmem:[#allocation2 + $0x8c] sm:$0x1] %v6693_v0 }
 0x173   : > { %560 = vst [vmem:[#allocation2 + $0x90] sm:$0xf] %v6693_v0  ;;  %561 = vst [vmem:[#allocation2 + $0x94] sm:$0x1] %v6693_v0 }
 0x174   : > { %562 = vst [vmem:[#allocation2 + $0x98] sm:$0xf] %v6693_v0  ;;  %563 = vst [vmem:[#allocation2 + $0x9c] sm:$0x1] %v6693_v0 }
 0x175   : > { %564 = vst [vmem:[#allocation3] sm:$0x3] %v6694_v1  ;;  %565 = vst [vmem:[#allocation4] sm:$0x3] %v6694_v1 }
 0x176   : > { %566 = vst [vmem:[#allocation5] sm:$0x3] %v6694_v1 }
 0x177 PF: > { %v6118_v2 = vld [vmem:[#allocation9] sm:$0xff]   ;;  %v6119_v3 = vld [vmem:[#allocation9 + $0x8] sm:$0xff]   ;;  %v6120_v4 = vld [vmem:[#allocation9 + $0x10] sm:$0xff]   ;;  %s8557_s11 = sld [smem:[#allocation35_spill]] }
 0x178   : > { %5389 = vmatprep.subr.bf16.mxu0 %v6118_v2  ;;  %5741 = vmatprep.subr.bf16.mxu1 %v6118_v2  ;;  %v6121_v5 = vld [vmem:[#allocation9 + $0x18] sm:$0xff]   ;;  %v7155_v6 = vld [vmem:[%s7121_s20] sm:$0xff]  ;;  %v7158_v7 = vld [vmem:[%s7121_s20 + $0x8] sm:$0xff] }
 0x179   : > { %5390 = vmatpush3.bf16.msra.mxu0 %v6118_v2  ;;  %5749 = vmatpush3.bf16.msra.mxu1 %v6118_v2  ;;  %8541 = vst [vmem:[#allocation38_spill] sm:$0xff] %v7155_v6  ;;  %8542 = vst [vmem:[#allocation39_spill] sm:$0xff] %v7158_v7  ;;  %v7161_v8 = vld [vmem:[%s7121_s20 + $0x40] sm:$0xff]  ;;  %v583_v9 = vpack.c.bf16 %v7158_v7, %v7155_v6  ;;  %v7166_v10 = vld [vmem:[%s7121_s20 + $0x48] sm:$0xff] }
 0x17a   : > { %5391 = vmatprep.subr.bf16.mxu0 %v6119_v3  ;;  %5742 = vmatprep.subr.bf16.mxu1 %v6119_v3  ;;  %8543 = vst [vmem:[#allocation40_spill] sm:$0xff] %v7161_v8  ;;  %8544 = vst [vmem:[#allocation41_spill] sm:$0xff] %v7166_v10  ;;  %v587_v11 = vpack.c.bf16 %v7166_v10, %v7161_v8  ;;  %v6122_v12 = vld [vmem:[#allocation9 + $0x20] sm:$0xff]   ;;  %v6123_v13 = vld [vmem:[#allocation9 + $0x28] sm:$0xff]  }
 0x17b   : > { %5405 = vmatprep.mubr.bf16.mxu0 %v583_v9  ;;  %v6124_v14 = vld [vmem:[#allocation9 + $0x30] sm:$0xff]   ;;  %v6125_v15 = vld [vmem:[#allocation9 + $0x38] sm:$0xff]   ;;  %v7183_v20 = vld [vmem:[%s7121_s20 + $0x20] sm:$0xff] }
 0x17c   : > { %5413 = vmatprep.mubr.bf16.mxu1 %v587_v11  ;;  %v7171_v16 = vld [vmem:[%s7121_s20 + $0x10] sm:$0xff]  ;;  %v7174_v17 = vld [vmem:[%s7121_s20 + $0x18] sm:$0xff]  ;;  %8549 = vst [vmem:[#allocation46_spill] sm:$0xff] %v7183_v20  ;;  %v7186_v21 = vld [vmem:[%s7121_s20 + $0x28] sm:$0xff] }
 0x17d   : > { %5392 = vmatpush3.bf16.msra.mxu0 %v6119_v3  ;;  %5750 = vmatpush3.bf16.msra.mxu1 %v6119_v3  ;;  %8545 = vst [vmem:[#allocation42_spill] sm:$0xff] %v7171_v16  ;;  %8546 = vst [vmem:[#allocation43_spill] sm:$0xff] %v7174_v17  ;;  %v7177_v18 = vld [vmem:[%s7121_s20 + $0x50] sm:$0xff]  ;;  %v7180_v19 = vld [vmem:[%s7121_s20 + $0x58] sm:$0xff]  ;;  %v584_v24 = vpack.c.bf16 %v7174_v17, %v7171_v16  ;;  %v585_v26 = vpack.c.bf16 %v7186_v21, %v7183_v20  ;;  %p4968_p8 = scmp.ne.s32.totalorder %s8557_s11, 0 }
 0x17e   : > { %5393 = vmatprep.subr.bf16.mxu0 %v6120_v4  ;;  %5743 = vmatprep.subr.bf16.mxu1 %v6120_v4  ;;  %8547 = vst [vmem:[#allocation44_spill] sm:$0xff] %v7177_v18  ;;  %8548 = vst [vmem:[#allocation45_spill] sm:$0xff] %v7180_v19  ;;  %v7189_v22 = vld [vmem:[%s7121_s20 + $0x60] sm:$0xff]  ;;  %v7192_v23 = vld [vmem:[%s7121_s20 + $0x68] sm:$0xff]  ;;  %v588_v25 = vpack.c.bf16 %v7180_v19, %v7177_v18 }
 0x17f   : > { %8550 = vst [vmem:[#allocation47_spill] sm:$0xff] %v7186_v21  ;;  %8551 = vst [vmem:[#allocation48_spill] sm:$0xff] %v7189_v22  ;;  %v589_v27 = vpack.c.bf16 %v7192_v23, %v7189_v22  ;;  %v7203_v28 = vld [vmem:[%s7121_s20 + $0x30] sm:$0xff]  ;;  %v7206_v29 = vld [vmem:[%s7121_s20 + $0x38] sm:$0xff] }
 0x180   : > { %8552 = vst [vmem:[#allocation49_spill] sm:$0xff] %v7192_v23  ;;  %8553 = vst [vmem:[#allocation50_spill] sm:$0xff] %v7203_v28  ;;  %v7209_v30 = vld [vmem:[%s7121_s20 + $0x70] sm:$0xff]  ;;  %v7212_v31 = vld [vmem:[%s7121_s20 + $0x78] sm:$0xff]  ;;  %v586_v32 = vpack.c.bf16 %v7206_v29, %v7203_v28 }
 0x181   : > { %5394 = vmatpush3.bf16.msra.mxu0 %v6120_v4  ;;  %5751 = vmatpush3.bf16.msra.mxu1 %v6120_v4  ;;  %8554 = vst [vmem:[#allocation51_spill] sm:$0xff] %v7206_v29  ;;  %8555 = vst [vmem:[#allocation52_spill] sm:$0xff] %v7209_v30  ;;  %v590_v33 = vpack.c.bf16 %v7212_v31, %v7209_v30 }
 0x182   : > { %5395 = vmatprep.subr.bf16.mxu0 %v6121_v5  ;;  %5744 = vmatprep.subr.bf16.mxu1 %v6121_v5  ;;  %8556 = vst [vmem:[#allocation53_spill] sm:$0xff] %v7212_v31 }
 0x185   : > { %5396 = vmatpush3.bf16.msra.mxu0 %v6121_v5  ;;  %5752 = vmatpush3.bf16.msra.mxu1 %v6121_v5 }
 0x186   : > { %5397 = vmatprep.subr.bf16.mxu0 %v6122_v12  ;;  %5745 = vmatprep.subr.bf16.mxu1 %v6122_v12 }
 0x189   : > { %5398 = vmatpush3.bf16.msra.mxu0 %v6122_v12  ;;  %5753 = vmatpush3.bf16.msra.mxu1 %v6122_v12 }
 0x18a   : > { %5399 = vmatprep.subr.bf16.mxu0 %v6123_v13  ;;  %5746 = vmatprep.subr.bf16.mxu1 %v6123_v13 }
 0x18d   : > { %5400 = vmatpush3.bf16.msra.mxu0 %v6123_v13  ;;  %5754 = vmatpush3.bf16.msra.mxu1 %v6123_v13 }
 0x18e   : > { %5401 = vmatprep.subr.bf16.mxu0 %v6124_v14  ;;  %5747 = vmatprep.subr.bf16.mxu1 %v6124_v14 }
 0x191   : > { %5402 = vmatpush3.bf16.msra.mxu0 %v6124_v14  ;;  %5755 = vmatpush3.bf16.msra.mxu1 %v6124_v14 }
 0x192   : > { %5403 = vmatprep.subr.bf16.mxu0 %v6125_v15  ;;  %5748 = vmatprep.subr.bf16.mxu1 %v6125_v15 }
 0x195   : > { %5404 = vmatpush3.bf16.msra.mxu0 %v6125_v15  ;;  %5756 = vmatpush3.bf16.msra.mxu1 %v6125_v15 }
 0x198   : > { %5406 = vmatmul.mubr.bf16.vlgmr.msra.gmra.mrb[0].mxu0 %v584_v24  ;;  %5414 = vmatmul.mubr.bf16.vlgmr.msra.gmra.mrb[0].mxu1 %v588_v25 }
 0x199   : > { %5409 = vmatprep.mubr.bf16.mxu0 %v585_v26  ;;  %5417 = vmatprep.mubr.bf16.mxu1 %v589_v27 }
 0x1a0   : > { %5410 = vmatmul.mubr.bf16.gmra.mrb[4].mxu0 %v586_v32  ;;  %5418 = vmatmul.mubr.bf16.gmra.mrb[4].mxu1 %v590_v33 }
 0x26b   : > { %v7218_v34 = vpop.f32.mrb[0].mxu0  ;;  %v7220_v35 = vpop.f32.mrb[0].mxu1 }
 0x26c   : > { %v7222_v36 = vpop.f32.mrb[1].mxu0  ;;  %v7224_v37 = vpop.f32.mrb[1].mxu1  ;;  %v782_v54 = vmul.f32 (!%p4968_p8), %v7218_v34, %v7218_v34  ;;  %v790_v25 = vmul.f32 (!%p4968_p8), %v7220_v35, %v7220_v35 }
 0x26d   : > { %v7226_v38 = vpop.f32.mrb[2].mxu0  ;;  %v7228_v39 = vpop.f32.mrb[2].mxu1  ;;  %v780_v51 = vmul.f32 (!%p4968_p8), %v7222_v36, %v7222_v36  ;;  %v788_v11 = vmul.f32 (!%p4968_p8), %v7224_v37, %v7224_v37 }
 0x26e   : > { %v7230_v40 = vpop.f32.mrb[3].mxu0  ;;  %v7232_v41 = vpop.f32.mrb[3].mxu1  ;;  %v783_v56 = vmul.f32 (!%p4968_p8), %v7226_v38, %v7226_v38  ;;  %v791_v32 = vmul.f32 (!%p4968_p8), %v7228_v39, %v7228_v39 }
 0x26f   : > { %v756_v50 = vadd.f32 (!%p4968_p8), %v7230_v40, %v7222_v36  ;;  %v781_v52 = vmul.f32 (!%p4968_p8), %v7230_v40, %v7230_v40  ;;  %v789_v14 = vmul.f32 (!%p4968_p8), %v7232_v41, %v7232_v41 }
 0x270   : > { %754 = sbr.rel (%p4968_p8) target bundleno = 670 (0x29e), region = 108 }
 0x271   : > { %v757_v53 = vadd.f32 (!%p4968_p8), %v7218_v34, %v756_v50  ;;  %v796_v57 = vadd.f32 (!%p4968_p8), %v781_v52, %v780_v51 }
 0x273   : > { %v7234_v42 = vpop.f32.mrb[4].mxu0  ;;  %v7236_v43 = vpop.f32.mrb[4].mxu1  ;;  %v758_v55 = vadd.f32 (!%p4968_p8), %v7226_v38, %v757_v53  ;;  %v797_v60 = vadd.f32 (!%p4968_p8), %v796_v57, %v782_v54 }
 0x274   : > { %v7238_v44 = vpop.f32.mrb[5].mxu0  ;;  %v7240_v45 = vpop.f32.mrb[5].mxu1  ;;  %v786_v1 = vmul.f32 (!%p4968_p8), %v7234_v42, %v7234_v42  ;;  %v794_v57 = vmul.f32 (!%p4968_p8), %v7236_v43, %v7236_v43 }
 0x275   : > { %v7242_v46 = vpop.f32.mrb[6].mxu0  ;;  %v7244_v47 = vpop.f32.mrb[6].mxu1  ;;  %v759_v58 = vadd.f32 (!%p4968_p8), %v758_v55, %v7238_v44  ;;  %v784_v59 = vmul.f32 (!%p4968_p8), %v7238_v44, %v7238_v44  ;;  %v798_v63 = vadd.f32 (!%p4968_p8), %v797_v60, %v783_v56  ;;  %v792_v51 = vmul.f32 (!%p4968_p8), %v7240_v45, %v7240_v45 }
 0x276   : > { %v7246_v48 = vpop.f32.mrb[7].mxu0  ;;  %v7248_v49 = vpop.f32.mrb[7].mxu1  ;;  %v787_v4 = vmul.f32 (!%p4968_p8), %v7242_v46, %v7242_v46  ;;  %v795_v60 = vmul.f32 (!%p4968_p8), %v7244_v47, %v7244_v47 }
 0x277   : > { %v760_v61 = vadd.f32 %v759_v58, %v7246_v48  ;;  %v785_v62 = vmul.f32 %v7246_v48, %v7246_v48  ;;  %v799_v2 = vadd.f32 %v798_v63, %v784_v59  ;;  %v793_v54 = vmul.f32 %v7248_v49, %v7248_v49 }
 0x279   : > { %v761_v0 = vadd.f32 %v7234_v42, %v760_v61  ;;  %v800_v5 = vadd.f32 %v799_v2, %v785_v62 }
 0x27b   : > { %v762_v3 = vadd.f32 %v7242_v46, %v761_v0  ;;  %v801_v12 = vadd.f32 %v800_v5, %v786_v1 }
 0x27d   : > { %v763_v9 = vadd.f32 %v762_v3, %v7224_v37  ;;  %v802_v15 = vadd.f32 %v801_v12, %v787_v4  ;;  %v755_v12 = vld [vmem:[#allocation3] sm:$0x1] }
 0x27f   : > { %v764_v13 = vadd.f32 %v763_v9, %v7232_v41  ;;  %v803_v26 = vadd.f32 %v802_v15, %v788_v11 }
 0x281   : > { %v765_v24 = vadd.f32 %v7220_v35, %v764_v13  ;;  %v804_v33 = vadd.f32 %v803_v26, %v789_v14 }
 0x283   : > { %v766_v27 = vadd.f32 %v7228_v39, %v765_v24  ;;  %v805_v52 = vadd.f32 %v804_v33, %v790_v25  ;;  %v779_v25 = vld [vmem:[#allocation3 + $0x1] sm:$0x1] }
 0x285   : > { %v767_v50 = vadd.f32 %v766_v27, %v7240_v45  ;;  %v806_v55 = vadd.f32 %v805_v52, %v791_v32 }
 0x287   : > { %v768_v53 = vadd.f32 %v767_v50, %v7248_v49  ;;  %v807_v58 = vadd.f32 %v806_v55, %v792_v51 }
 0x289   : > { %v769_v56 = vadd.f32 %v7236_v43, %v768_v53  ;;  %v808_v61 = vadd.f32 %v807_v58, %v793_v54 }
 0x28b   : > { %v770_v59 = vadd.f32 %v7244_v47, %v769_v56  ;;  %v809_v63 = vadd.f32 %v808_v61, %v794_v57 }
 0x28d   : > { %v771_v62 = vrot.slane %v770_v59, 4  ;;  %v810_v1 = vadd.f32 %v809_v63, %v795_v60 }
 0x28f   : > { %v772_v0 = vadd.f32 %v771_v62, %v770_v59  ;;  %v811_v3 = vrot.slane %v810_v1, 4 }
 0x291   : > { %v773_v2 = vrot.slane %v772_v0, 2  ;;  %v812_v5 = vadd.f32 %v811_v3, %v810_v1 }
 0x293   : > { %v774_v4 = vadd.f32 %v773_v2, %v772_v0  ;;  %v813_v11 = vrot.slane %v812_v5, 2 }
 0x295   : > { %v775_v9 = vrot.slane %v774_v4, 1  ;;  %v814_v14 = vadd.f32 %v813_v11, %v812_v5 }
 0x297   : > { %v776_v13 = vadd.f32 %v775_v9, %v774_v4  ;;  %v815_v24 = vrot.slane %v814_v14, 1 }
 0x299   : > { %v777_v15 = vadd.f32 %v776_v13, %v755_v12  ;;  %v816_v26 = vadd.f32 %v815_v24, %v814_v14 }
 0x29b   : > { %778 = vst [vmem:[#allocation3] sm:$0x1] %v777_v15  ;;  %v817_v27 = vadd.f32 %v816_v26, %v779_v25 }
 0x29d   : > { %818 = vst [vmem:[#allocation3 + $0x1] sm:$0x1] %v817_v27 }
 0x29e PF: > { %s8558_s1 = sld [smem:[#allocation35_spill]] }
 0x2a4   : > { %p4969_p7 = scmp.lt.s32.totalorder %s8558_s1, 1 }
 0x2a6   : > { %822 = sbr.rel (%p4969_p7) target bundleno = 1579 (0x62b), region = 112 }
 0x2ad   : > { %v6126_v32 = vld [vmem:[#allocation11 + $0x40] sm:$0xff]   ;;  %v6128_v50 = vld [vmem:[#allocation11 + $0x48] sm:$0xff]   ;;  %v6130_v52 = vld [vmem:[#allocation11 + $0x50] sm:$0xff]   ;;  %v837_v11 = vlaneseq  ;;  %vm1105_vm0 = vcmask 1043456   ;;  %vm1106_vm1 = vsmask.f32 7938 }
 0x2ae   : > { %v6127_v33 = vld [vmem:[#allocation11 + $0x100] sm:$0xff]   ;;  %5421 = vmatprep.subr.bf16.mxu1 %v6126_v32  ;;  %v6129_v51 = vld [vmem:[#allocation11 + $0x108] sm:$0xff]   ;;  %v6131_v53 = vld [vmem:[#allocation11 + $0x110] sm:$0xff]   ;;  %vm1111_vm2 = vcmask 1040384   ;;  %vm1112_vm3 = vsmask.f32 256 }
 0x2af   : > { %5549 = vmatprep.subr.bf16.mxu0 %v6127_v33  ;;  %5422 = vmatpush3.bf16.msra.mxu1 %v6126_v32  ;;  %v6132_v54 = vld [vmem:[#allocation11 + $0x58] sm:$0xff]   ;;  %v6134_v56 = vld [vmem:[#allocation11 + $0x60] sm:$0xff]   ;;  %v6136_v58 = vld [vmem:[#allocation11 + $0x68] sm:$0xff]   ;;  %v838_v15 = vshrl.u32 %v837_v11, 7  ;;  %vm1255_vm4 = vsmask.f32 3328 }
 0x2b0   : > { %5550 = vmatpush3.bf16.msra.mxu0 %v6127_v33  ;;  %5423 = vmatprep.subr.bf16.mxu1 %v6128_v50  ;;  %v6133_v55 = vld [vmem:[#allocation11 + $0x118] sm:$0xff]   ;;  %v6135_v57 = vld [vmem:[#allocation11 + $0x120] sm:$0xff]   ;;  %v6137_v61 = vld [vmem:[#allocation11 + $0x128] sm:$0xff]   ;;  %vm1256_vm5 = vsmask.f32 7440  ;;  %vm1917_vm9 = vcmask 1042432  }
 0x2b1   : > { %5551 = vmatprep.subr.bf16.mxu0 %v6129_v51  ;;  %v823_v59 = vld [vmem:[#allocation3] sm:$0x1]  ;;  %v825_v60 = vld [vmem:[#allocation3 + $0x1] sm:$0x1]  ;;  %v6138_v1 = vld [vmem:[#allocation11 + $0x70] sm:$0xff]   ;;  %v7306_v27 = vsub.s32 0, %v838_v15 }
 0x2b2   : > { %v824_v62 = vmul.f32 0.00390625, %v823_v59  ;;  %v826_v63 = vmul.f32 0.00390625, %v825_v60  ;;  %v6139_v2 = vld [vmem:[#allocation11 + $0x130] sm:$0xff]   ;;  %v6140_v5 = vld [vmem:[#allocation11 + $0x78] sm:$0xff]   ;;  %v7300_v13 = vld [vmem:[#allocation11] sm:$0xff]   ;;  %vm1918_vm10 = vcmask 1046532  }
 0x2b3   : > { %5424 = vmatpush3.bf16.msra.mxu1 %v6128_v50  ;;  %v6141_v9 = vld [vmem:[#allocation11 + $0x138] sm:$0xff]   ;;  %v7302_v14 = vld [vmem:[#allocation11 + $0x140] sm:$0xff]   ;;  %8559 = vst [vmem:[#allocation54_spill] sm:$0xff] %v7306_v27  ;;  %vm7364_vm6 = vmand %vm1105_vm0, %vm1106_vm1  ;;  %s8585_s0 = sld [smem:[#allocation35_spill]] }
 0x2b4   : > { %5552 = vmatpush3.bf16.msra.mxu0 %v6129_v51  ;;  %5425 = vmatprep.subr.bf16.mxu1 %v6130_v52  ;;  %v827_v0 = vmul.f32 %v824_v62, %v824_v62  ;;  %v1207_v12 = vld [vmem:[#allocation2] sm:$0xf]  ;;  %v829_v26 = vld [vmem:[#allocation14] sm:$0x1]  ;;  %v1239_v32 = vld [vmem:[#allocation2 + $0x4] sm:$0x1] }
 0x2b5   : > { %5553 = vmatprep.subr.bf16.mxu0 %v6131_v53  ;;  %v1259_v24 = vshrl.u32 %v1207_v12, 16  ;;  %v1262_v25 = vshll.u32 %v1207_v12, 16  ;;  %v1268_v60 = vshll.u32 %v1239_v32, 16  ;;  %vm7372_vm7 = vmand %vm1111_vm2, %vm1112_vm3 }
 0x2b6   : > { %v828_v3 = vsub.f32 %v826_v63, %v827_v0  ;;  %vm7396_vm8 = vmor %vm1255_vm4, %vm1256_vm5 }
 0x2b7   : > { %5426 = vmatpush3.bf16.msra.mxu1 %v6130_v52  ;;  %v1261_v50 = vrot.slane %v1259_v24, 4  ;;  %v1264_v51 = vrot.slane %v1262_v25, 5  ;;  %v1215_v52 = vld [vmem:[#allocation2 + $0x50] sm:$0xf]  ;;  %vm7728_vm11 = vmor %vm1917_vm9, %vm1918_vm10 }
 0x2b8   : > { %5554 = vmatpush3.bf16.msra.mxu0 %v6131_v53  ;;  %5427 = vmatprep.subr.bf16.mxu1 %v6132_v54  ;;  %v830_v4 = vadd.f32 1e-05, %v828_v3 }
 0x2b9   : > { %5555 = vmatprep.subr.bf16.mxu0 %v6133_v55  ;;  %p5178_p3 = scmp.ne.s32.totalorder %s8585_s0, 1 }
 0x2ba   : > { %6222 = vrsqrt.f32 %v830_v4 }
 0x2bb   : > { %5428 = vmatpush3.bf16.msra.mxu1 %v6132_v54  ;;  %v1247_v54 = vld [vmem:[#allocation2 + $0x54] sm:$0x1] }
 0x2bc   : > { %5556 = vmatpush3.bf16.msra.mxu0 %v6133_v55  ;;  %5429 = vmatprep.subr.bf16.mxu1 %v6134_v56  ;;  %v1371_v55 = vshrl.u32 %v1215_v52, 16 }
 0x2bd   : > { %5557 = vmatprep.subr.bf16.mxu0 %v6135_v57 }
 0x2be   : > { %v7311_v63 = vrot.slane %v1371_v55, 4 }
 0x2bf   : > { %5430 = vmatpush3.bf16.msra.mxu1 %v6134_v56  ;;  %v1374_v56 = vshll.u32 %v1215_v52, 16 }
 0x2c0   : > { %5558 = vmatpush3.bf16.msra.mxu0 %v6135_v57  ;;  %5431 = vmatprep.subr.bf16.mxu1 %v6136_v58  ;;  %v833_v57 = vld [vmem:[#allocation15] sm:$0x1] }
 0x2c1   : > { %5559 = vmatprep.subr.bf16.mxu0 %v6137_v61  ;;  %v7313_v0 = vrot.slane %v1374_v56, 5 }
 0x2c3   : > { %5432 = vmatpush3.bf16.msra.mxu1 %v6136_v58 }
 0x2c4   : > { %5560 = vmatpush3.bf16.msra.mxu0 %v6137_v61  ;;  %5433 = vmatprep.subr.bf16.mxu1 %v6138_v1  ;;  %v6223_v33 = vpop.eup %6222  ;;  %v1265_v61 = vor.u32 %v1264_v51, %v1261_v50 }
 0x2c5   : > { %5561 = vmatprep.subr.bf16.mxu0 %v6139_v2  ;;  %v832_v53 = vmul.f32 %v6223_v33, %v829_v26 }
 0x2c7   : > { %5434 = vmatpush3.bf16.msra.mxu1 %v6138_v1  ;;  %v834_v58 = vmul.f32 %v832_v53, %v824_v62  ;;  %v7309_v59 = vrot.slane %v832_v53, %v7306_v27  ;;  %v1380_v1 = vshll.u32 %v1247_v54, 16 }
 0x2c8   : > { %5562 = vmatpush3.bf16.msra.mxu0 %v6139_v2  ;;  %5435 = vmatprep.subr.bf16.mxu1 %v6140_v5 }
 0x2c9   : > { %5563 = vmatprep.subr.bf16.mxu0 %v6141_v9  ;;  %v835_v2 = vsub.f32 %v833_v57, %v834_v58  ;;  %v842_v3 = vmul.f32 %v7309_v59, %v7222_v36  ;;  %v843_v4 = vmul.f32 %v7309_v59, %v7230_v40  ;;  %v844_v62 = vmul.f32 %v7218_v34, %v7309_v59 }
 0x2ca   : > { %v847_v11 = vmul.f32 %v7309_v59, %v7246_v48  ;;  %v848_v36 = vmul.f32 %v7234_v42, %v7309_v59  ;;  %v7332_v34 = vrot.slane %v1268_v60, 5  ;;  %v849_v40 = vmul.f32 %v7242_v46, %v7309_v59 }
 0x2cb   : > { %5436 = vmatpush3.bf16.msra.mxu1 %v6140_v5  ;;  %v845_v5 = vmul.f32 %v7226_v38, %v7309_v59  ;;  %v7330_v12 = vrot.slane %v835_v2, %v7306_v27  ;;  %v7336_v38 = vrot.slane %v1265_v61, 4  ;;  %v7344_v42 = vrot.slane %v1380_v1, 5 }
 0x2cc   : > { %5564 = vmatpush3.bf16.msra.mxu0 %v6141_v9  ;;  %5453 = vmatprep.subr.bf16.mxu1 %v7300_v13  ;;  %v846_v9 = vmul.f32 %v7309_v59, %v7238_v44  ;;  %v7340_v44 = vmul.f32 %v7309_v59, %v7224_v37 }
 0x2cd   : > { %5581 = vmatprep.subr.bf16.mxu0 %v7302_v14  ;;  %v864_v15 = vadd.f32 %v7330_v12, %v842_v3  ;;  %v865_v24 = vadd.f32 %v7330_v12, %v843_v4  ;;  %v866_v25 = vadd.f32 %v7330_v12, %v844_v62  ;;  %v867_v26 = vadd.f32 %v7330_v12, %v845_v5 }
 0x2ce   : > { %v868_v46 = vadd.f32 %v7330_v12, %v846_v9  ;;  %v869_v32 = vadd.f32 %v7330_v12, %v847_v11  ;;  %v870_v37 = vadd.f32 %v7330_v12, %v848_v36  ;;  %v871_v33 = vadd.f32 %v7330_v12, %v849_v40  ;;  %v1108_v40 = vld [vmem:[#allocation2 + $0x8] sm:$0xf] }
 0x2cf   : > { %v880_v50 = vmax.f32 %v864_v15, 0.0  ;;  %v881_v51 = vmax.f32 %v865_v24, 0.0  ;;  %v882_v52 = vmax.f32 %v866_v25, 0.0  ;;  %v883_v53 = vmax.f32 %v867_v26, 0.0  ;;  %v1114_v15 = vld [vmem:[#allocation2 + $0xc] sm:$0x1] }
 0x2d0   : > { %v884_v54 = vmax.f32 %v868_v46, 0.0  ;;  %v885_v55 = vmax.f32 %v869_v32, 0.0  ;;  %v886_v56 = vmax.f32 %v870_v37, 0.0  ;;  %v887_v57 = vmax.f32 %v871_v33, 0.0  ;;  %v1117_v24 = vld [vmem:[#allocation2 + $0x10] sm:$0xf] }
 0x2d1   : > { %v5196_v58 = vpack.c.bf16 %v880_v50, %v880_v50  ;;  %v5197_v60 = vpack.c.bf16 %v881_v51, %v881_v51  ;;  %v5198_v61 = vpack.c.bf16 %v882_v52, %v882_v52  ;;  %v5199_v1 = vpack.c.bf16 %v883_v53, %v883_v53  ;;  %v1120_v25 = vld [vmem:[#allocation2 + $0x14] sm:$0x1]  ;;  %v1123_v52 = vld [vmem:[#allocation2 + $0x18] sm:$0xf]  ;;  %v1126_v53 = vld [vmem:[#allocation2 + $0x1c] sm:$0x1] }
 0x2d2   : > { %v7354_v2 = vpack.c.bf16 %v884_v54, %v884_v54  ;;  %v7356_v3 = vpack.c.bf16 %v885_v55, %v885_v55  ;;  %v7358_v4 = vpack.c.bf16 %v886_v56, %v886_v56  ;;  %v7360_v62 = vpack.c.bf16 %v887_v57, %v887_v57  ;;  %v1129_v54 = vld [vmem:[#allocation2 + $0x20] sm:$0xf]  ;;  %v1132_v55 = vld [vmem:[#allocation2 + $0x24] sm:$0x1] }
 0x2d3   : > { %v945_v5 = vshrl.u32 %v5196_v58, 16  ;;  %v948_v9 = vshll.u32 %v5196_v58, 16  ;;  %v953_v11 = vshrl.u32 %v5197_v60, 16  ;;  %v956_v36 = vshll.u32 %v5197_v60, 16 }
 0x2d4   : > { %v961_v26 = vshrl.u32 %v5198_v61, 16  ;;  %v964_v46 = vshll.u32 %v5198_v61, 16  ;;  %v969_v32 = vshrl.u32 %v5199_v1, 16  ;;  %v972_v37 = vshll.u32 %v5199_v1, 16 }
 0x2d5   : > { %v947_v33 = vrot.slane %v945_v5, 7  ;;  %v955_v51 = vrot.slane %v953_v11, 7  ;;  %v977_v56 = vshrl.u32 %v7354_v2, 16  ;;  %v980_v57 = vshll.u32 %v7354_v2, 16 }
 0x2d6   : > { %v963_v60 = vrot.slane %v961_v26, 7  ;;  %v971_v61 = vrot.slane %v969_v32, 7  ;;  %v985_v1 = vshrl.u32 %v7356_v3, 16  ;;  %v988_v5 = vshll.u32 %v7356_v3, 16 }
 0x2d7   : > { %v950_v11 = vor.u32 %v948_v9, %v947_v33  ;;  %v951_v48 = vrot.slane %v947_v33, 4  ;;  %v958_v31 = vor.u32 %v956_v36, %v955_v51  ;;  %v959_v30 = vrot.slane %v955_v51, 4 }
 0x2d8   : > { %v966_v23 = vor.u32 %v964_v46, %v963_v60  ;;  %v967_v22 = vrot.slane %v963_v60, 4  ;;  %v974_v19 = vor.u32 %v972_v37, %v971_v61  ;;  %v975_v2 = vrot.slane %v971_v61, 4  ;;  %v1150_v61 = vld [vmem:[#allocation2 + $0x3c] sm:$0x1] }
 0x2d9   : > { %v1109_v18 = vsel %vm7364_vm6, %v950_v11, %v1108_v40  ;;  %v1115_v10 = vsel %vm7372_vm7, %v951_v48, %v1114_v15  ;;  %v1118_v26 = vsel %vm7364_vm6, %v958_v31, %v1117_v24  ;;  %v1121_v3 = vsel %vm7372_vm7, %v959_v30, %v1120_v25  ;;  %v1135_v31 = vld [vmem:[#allocation2 + $0x28] sm:$0xf]  ;;  %v1138_v15 = vld [vmem:[#allocation2 + $0x2c] sm:$0x1]  ;;  %v1141_v24 = vld [vmem:[#allocation2 + $0x30] sm:$0xf] }
 0x2da   : > { %1110 = vst [vmem:[#allocation2 + $0x8] sm:$0xf] %v1109_v18  ;;  %1116 = vst [vmem:[#allocation2 + $0xc] sm:$0x1] %v1115_v10  ;;  %v1124_v9 = vsel %vm7364_vm6, %v966_v23, %v1123_v52  ;;  %v1127_v36 = vsel %vm7372_vm7, %v967_v22, %v1126_v53  ;;  %v1130_v40 = vsel %vm7364_vm6, %v974_v19, %v1129_v54  ;;  %v1144_v30 = vld [vmem:[#allocation2 + $0x34] sm:$0x1] }
 0x2db   : > { %1119 = vst [vmem:[#allocation2 + $0x10] sm:$0xf] %v1118_v26  ;;  %1122 = vst [vmem:[#allocation2 + $0x14] sm:$0x1] %v1121_v3  ;;  %v1133_v48 = vsel %vm7372_vm7, %v975_v2, %v1132_v55  ;;  %v8564_v10 = vmov 0  ;;  %v979_v18 = vrot.slane %v977_v56, 7  ;;  %v872_v32 = vadd.f32 %v7330_v12, %v7340_v44 }
 0x2dc   : > { %v8565_v10 = vsel %vm7396_vm8, 4294967295, %v8564_v10  ;;  %1125 = vst [vmem:[#allocation2 + $0x18] sm:$0xf] %v1124_v9  ;;  %1128 = vst [vmem:[#allocation2 + $0x1c] sm:$0x1] %v1127_v36  ;;  %v987_v22 = vrot.slane %v985_v1, 7  ;;  %v8567_v37 = vor.u32 %v7313_v0, %v7311_v63  ;;  %v851_v44 = vmul.f32 %v7309_v59, %v7232_v41 }
 0x2dd   : > { %8566 = vst [vmem:[#allocation55_spill] sm:$0xff] %v8565_v10  ;;  %1131 = vst [vmem:[#allocation2 + $0x20] sm:$0xf] %v1130_v40  ;;  %v993_v19 = vshrl.u32 %v7358_v4, 16  ;;  %v996_v23 = vshll.u32 %v7358_v4, 16  ;;  %v1001_v25 = vshrl.u32 %v7360_v62, 16  ;;  %v982_v51 = vor.u32 %v980_v57, %v979_v18 }
 0x2de   : > { %1134 = vst [vmem:[#allocation2 + $0x24] sm:$0x1] %v1133_v48  ;;  %v1004_v46 = vshll.u32 %v7360_v62, 16  ;;  %v7409_v33 = vrot.slane %v8567_v37, 4  ;;  %v983_v52 = vrot.slane %v979_v18, 4  ;;  %v990_v53 = vor.u32 %v988_v5, %v987_v22 }
 0x2df   : > { %v991_v54 = vrot.slane %v987_v22, 4  ;;  %v1271_v4 = vsel %vm7396_vm8, %v7336_v38, %v7332_v34  ;;  %v995_v55 = vrot.slane %v993_v19, 7  ;;  %v1147_v56 = vld [vmem:[#allocation2 + $0x38] sm:$0xf]  ;;  %v7415_v62 = vrot.slane %v1001_v25, 7 }
 0x2e0   : > { %v1136_v63 = vsel %vm7364_vm6, %v982_v51, %v1135_v31  ;;  %v1139_v0 = vsel %vm7372_vm7, %v983_v52, %v1138_v15  ;;  %v1142_v57 = vsel %vm7364_vm6, %v990_v53, %v1141_v24  ;;  %v888_v41 = vmax.f32 %v872_v32, 0.0  ;;  %v6146_v34 = vld [vmem:[#allocation11 + $0x10] sm:$0xff]  }
 0x2e1   : > { %v1145_v60 = vsel %vm7372_vm7, %v991_v54, %v1144_v30  ;;  %1137 = vst [vmem:[#allocation2 + $0x28] sm:$0xf] %v1136_v63  ;;  %1140 = vst [vmem:[#allocation2 + $0x2c] sm:$0x1] %v1139_v0  ;;  %v998_v1 = vor.u32 %v996_v23, %v995_v55  ;;  %v999_v5 = vrot.slane %v995_v55, 4  ;;  %v7429_v11 = vmul.f32 %v7220_v35, %v7309_v59 }
 0x2e2   : > { %1143 = vst [vmem:[#allocation2 + $0x30] sm:$0xf] %v1142_v57  ;;  %1146 = vst [vmem:[#allocation2 + $0x34] sm:$0x1] %v1145_v60  ;;  %v1208_v2 = vld [vmem:[#allocation2 + $0x8] sm:$0xf]  ;;  %v7432_v9 = vor.u32 %v1004_v46, %v7415_v62  ;;  %v7440_v40 = vmul.f32 %v7228_v39, %v7309_v59  ;;  %v7444_v48 = vmul.f32 %v7309_v59, %v7240_v45 }
 0x2e3   : > { %v1240_v26 = vld [vmem:[#allocation2 + $0xc] sm:$0x1]  ;;  %v2436_v3 = vld [vmem:[#allocation2 + $0x8] sm:$0xf]  ;;  %v1273_v35 = vshrl.u32 %v1208_v2, 16  ;;  %v1276_v31 = vshll.u32 %v1208_v2, 16  ;;  %v1148_v39 = vsel %vm7364_vm6, %v998_v1, %v1147_v56  ;;  %v1151_v25 = vsel %vm7372_vm7, %v999_v5, %v1150_v61 }
 0x2e4   : > { %v1282_v15 = vshll.u32 %v1240_v26, 16  ;;  %v7446_v24 = vld [vmem:[#allocation2 + $0xc] sm:$0x1]  ;;  %v2438_v18 = vld [vmem:[#allocation2 + $0x10] sm:$0xf]  ;;  %v2469_v19 = vshrl.u32 %v2436_v3, 16  ;;  %v7456_v37 = vpack.c.bf16 %v888_v41, %v888_v41  ;;  %v7460_v61 = vadd.f32 %v7330_v12, %v851_v44 }
 0x2e5   : > { %v7449_v22 = vld [vmem:[#allocation2 + $0x14] sm:$0x1]  ;;  %v2472_v23 = vshll.u32 %v2436_v3, 16  ;;  %v1275_v45 = vrot.slane %v1273_v35, 4  ;;  %v1278_v46 = vrot.slane %v1276_v31, 5  ;;  %v2478_v32 = vshll.u32 %v7446_v24, 16 }
 0x2e6   : > { %1149 = vst [vmem:[#allocation2 + $0x38] sm:$0xf] %v1148_v39  ;;  %1152 = vst [vmem:[#allocation2 + $0x3c] sm:$0x1] %v1151_v25  ;;  %v2471_v51 = vrot.slane %v2469_v19, 4  ;;  %v2483_v53 = vshrl.u32 %v2438_v18, 16 }
 0x2e7   : > { %v2474_v52 = vrot.slane %v2472_v23, 5  ;;  %v2486_v54 = vshll.u32 %v2438_v18, 16  ;;  %v1209_v55 = vld [vmem:[#allocation2 + $0x10] sm:$0xf]  ;;  %v1279_v63 = vor.u32 %v1278_v46, %v1275_v45  ;;  %v1284_v0 = vrot.slane %v1282_v15, 5 }
 0x2e8   : > { %v2492_v56 = vshll.u32 %v7449_v22, 16  ;;  %v1210_v57 = vld [vmem:[#allocation2 + $0x18] sm:$0xf]  ;;  %v1241_v60 = vld [vmem:[#allocation2 + $0x14] sm:$0x1]  ;;  %v2480_v5 = vrot.slane %v2478_v32, 5 }
 0x2e9   : > { %v2475_v1 = vor.u32 %v2474_v52, %v2471_v51  ;;  %v2485_v2 = vrot.slane %v2483_v53, 4  ;;  %v2488_v26 = vrot.slane %v2486_v54, 5  ;;  %v1280_v41 = vrot.slane %v1279_v63, 4  ;;  %v1242_v23 = vld [vmem:[#allocation2 + $0x1c] sm:$0x1] }
 0x2ea   : > { %v2494_v3 = vrot.slane %v2492_v56, 5  ;;  %v1287_v35 = vshrl.u32 %v1209_v55, 16  ;;  %v1290_v31 = vshll.u32 %v1209_v55, 16  ;;  %v1296_v39 = vshll.u32 %v1241_v60, 16  ;;  %v2440_v36 = vld [vmem:[#allocation2 + $0x18] sm:$0xf] }
 0x2eb   : > { %v2476_v19 = vrot.slane %v2475_v1, 4  ;;  %v2489_v18 = vor.u32 %v2488_v26, %v2485_v2  ;;  %v1301_v15 = vshrl.u32 %v1210_v57, 16  ;;  %v1285_v25 = vsel %vm7396_vm8, %v1280_v41, %v1284_v0  ;;  %v7471_v54 = vld [vmem:[#allocation2 + $0x1c] sm:$0x1]  ;;  %v2442_v60 = vld [vmem:[#allocation2 + $0x20] sm:$0xf] }
 0x2ec   : > { %v1289_v45 = vrot.slane %v1287_v35, 4  ;;  %v1292_v46 = vrot.slane %v1290_v31, 5  ;;  %v1304_v44 = vshll.u32 %v1210_v57, 16  ;;  %v4986_v32 = vcombine.low %v1271_v4, %v1285_v25  ;;  %v7477_v38 = vld [vmem:[#allocation2 + $0x24] sm:$0x1] }
 0x2ed   : > { %v2481_v51 = vsel %vm7396_vm8, %v2476_v19, %v2480_v5  ;;  %v2490_v52 = vrot.slane %v2489_v18, 4  ;;  %v1298_v53 = vrot.slane %v1296_v39, 5  ;;  %v1303_v63 = vrot.slane %v1301_v15, 4  ;;  %v7483_v25 = vld [vmem:[#allocation2 + $0x20] sm:$0xf] }
 0x2ee   : > { %v1293_v55 = vor.u32 %v1292_v46, %v1289_v45  ;;  %v1306_v0 = vrot.slane %v1304_v44, 5  ;;  %v1310_v56 = vshll.u32 %v1242_v23, 16  ;;  %5437 = vmatprep.mubr.bf16.mxu1 %v4986_v32  ;;  %v2497_v4 = vshrl.u32 %v2440_v36, 16  ;;  %v7485_v44 = vld [vmem:[#allocation2 + $0x28] sm:$0xf] }
 0x2ef   : > { %v2495_v57 = vsel %vm7396_vm8, %v2490_v52, %v2494_v3  ;;  %v2500_v31 = vshll.u32 %v2440_v36, 16  ;;  %v2506_v19 = vshll.u32 %v7471_v54, 16  ;;  %v2511_v18 = vshrl.u32 %v2442_v60, 16  ;;  %v1243_v32 = vld [vmem:[#allocation2 + $0x24] sm:$0x1] }
 0x2f0   : > { %v5066_v5 = vcombine.low %v2481_v51, %v2495_v57  ;;  %v1294_v2 = vrot.slane %v1293_v55, 4  ;;  %v1307_v26 = vor.u32 %v1306_v0, %v1303_v63  ;;  %v1312_v41 = vrot.slane %v1310_v56, 5  ;;  %v1244_v0 = vld [vmem:[#allocation2 + $0x2c] sm:$0x1]  ;;  %v6144_v57 = vld [vmem:[#allocation11 + $0x8] sm:$0xff]  }
 0x2f1   : > { %v2499_v35 = vrot.slane %v2497_v4, 4  ;;  %v2514_v39 = vshll.u32 %v2442_v60, 16  ;;  %v2520_v15 = vshll.u32 %v7477_v38, 16  ;;  %v2502_v45 = vrot.slane %v2500_v31, 5  ;;  %v2444_v31 = vld [vmem:[#allocation2 + $0x28] sm:$0xf] }
 0x2f2   : > { %5565 = vmatprep.mubr.bf16.mxu0 %v5066_v5  ;;  %v1299_v3 = vsel %vm7396_vm8, %v1294_v2, %v1298_v53  ;;  %v1308_v23 = vrot.slane %v1307_v26, 4  ;;  %v2513_v46 = vrot.slane %v2511_v18, 4  ;;  %v7489_v36 = vadd.f32 %v7330_v12, %v7429_v11  ;;  %v1245_v8 = vld [vmem:[#allocation2 + $0x34] sm:$0x1]  ;;  %v6233_v27 = vld [vmem:[#allocation2 + $0x1c] sm:$0x1] }
 0x2f3   : > { %v7493_v51 = vadd.f32 %v7330_v12, %v7440_v40  ;;  %v2508_v53 = vrot.slane %v2506_v19, 5  ;;  %v2516_v55 = vrot.slane %v2514_v39, 5  ;;  %v2522_v63 = vrot.slane %v2520_v15, 5  ;;  %v2445_v39 = vld [vmem:[#allocation2 + $0x2c] sm:$0x1] }
 0x2f4   : > { %v1313_v52 = vsel %vm7396_vm8, %v1308_v23, %v1312_v41  ;;  %v2503_v60 = vor.u32 %v2502_v45, %v2499_v35  ;;  %v1315_v4 = vshrl.u32 %v7483_v25, 16  ;;  %v1318_v5 = vshll.u32 %v7483_v25, 16 }
 0x2f5   : > { %v4987_v56 = vcombine.low %v1299_v3, %v1313_v52  ;;  %v2517_v11 = vor.u32 %v2516_v55, %v2513_v46  ;;  %v1324_v2 = vshll.u32 %v1243_v32, 16  ;;  %v1329_v26 = vshrl.u32 %v7485_v44, 16  ;;  %v2446_v52 = vld [vmem:[#allocation2 + $0x30] sm:$0xf] }
 0x2f6   : > { %v1332_v40 = vshll.u32 %v7485_v44, 16  ;;  %v2504_v41 = vrot.slane %v2503_v60, 4  ;;  %v1317_v19 = vrot.slane %v1315_v4, 4  ;;  %v1320_v18 = vrot.slane %v1318_v5, 5  ;;  %v2447_v4 = vld [vmem:[#allocation2 + $0x34] sm:$0x1] }
 0x2f7   : > { %5438 = vmatmul.mubr.bf16.vlgmr.msra.gmra.mrb[0].mxu1 %v4987_v56  ;;  %v1338_v23 = vshll.u32 %v1244_v0, 16  ;;  %v2518_v35 = vrot.slane %v2517_v11, 4  ;;  %v1326_v3 = vrot.slane %v1324_v2, 5  ;;  %v1331_v15 = vrot.slane %v1329_v26, 4  ;;  %v7506_v11 = vld [vmem:[#allocation2 + $0x30] sm:$0xf] }
 0x2f8   : > { %5454 = vmatpush3.bf16.msra.mxu1 %v7300_v13  ;;  %v1334_v45 = vrot.slane %v1332_v40, 5  ;;  %v2509_v46 = vsel %vm7396_vm8, %v2504_v41, %v2508_v53  ;;  %v1321_v32 = vor.u32 %v1320_v18, %v1317_v19  ;;  %v2525_v56 = vshrl.u32 %v2444_v31, 16  ;;  %v6145_v26 = vld [vmem:[#allocation11 + $0x148] sm:$0xff]   ;;  %v7508_v53 = vld [vmem:[#allocation2 + $0x38] sm:$0xf] }
 0x2f9   : > { %5455 = vmatprep.subr.bf16.mxu1 %v6144_v57  ;;  %v1340_v55 = vrot.slane %v1338_v23, 5  ;;  %v2523_v60 = vsel %vm7396_vm8, %v2518_v35, %v2522_v63  ;;  %v2528_v5 = vshll.u32 %v2444_v31, 16  ;;  %v2534_v13 = vshll.u32 %v2445_v39, 16  ;;  %v1153_v63 = vld [vmem:[#allocation2 + $0x40] sm:$0xf] }
 0x2fa   : > { %v1335_v0 = vor.u32 %v1334_v45, %v1331_v15  ;;  %v5067_v2 = vcombine.low %v2509_v46, %v2523_v60  ;;  %v1322_v40 = vrot.slane %v1321_v32, 4  ;;  %v2527_v1 = vrot.slane %v2525_v56, 4  ;;  %v1246_v15 = vld [vmem:[#allocation2 + $0x3c] sm:$0x1]  ;;  %v6148_v46 = vld [vmem:[#allocation11 + $0x18] sm:$0xff]  }
 0x2fb   : > { %v2539_v30 = vshrl.u32 %v2446_v52, 16  ;;  %v2530_v19 = vrot.slane %v2528_v5, 5  ;;  %v2536_v18 = vrot.slane %v2534_v13, 5  ;;  %v2542_v23 = vshll.u32 %v2446_v52, 16  ;;  %v1156_v60 = vld [vmem:[#allocation2 + $0x44] sm:$0x1] }
 0x2fc   : > { %5456 = vmatpush3.bf16.msra.mxu1 %v6144_v57  ;;  %v1336_v41 = vrot.slane %v1335_v0, 4  ;;  %5566 = vmatmul.mubr.bf16.vlgmr.msra.gmra.mrb[0].mxu0 %v5067_v2  ;;  %v1327_v31 = vsel %vm7396_vm8, %v1322_v40, %v1326_v3  ;;  %v2548_v35 = vshll.u32 %v2447_v4, 16  ;;  %v1343_v45 = vshrl.u32 %v7506_v11, 16  ;;  %v2448_v0 = vld [vmem:[#allocation2 + $0x38] sm:$0xf] }
 0x2fd   : > { %5457 = vmatprep.subr.bf16.mxu1 %v6146_v34  ;;  %v2541_v39 = vrot.slane %v2539_v30, 4  ;;  %5582 = vmatpush3.bf16.msra.mxu0 %v7302_v14  ;;  %v2531_v32 = vor.u32 %v2530_v19, %v2527_v1  ;;  %v2544_v52 = vrot.slane %v2542_v23, 5  ;;  %v1346_v56 = vshll.u32 %v7506_v11, 16  ;;  %v6147_v30 = vld [vmem:[#allocation11 + $0x150] sm:$0xff]   ;;  %v6150_v23 = vld [vmem:[#allocation11 + $0x20] sm:$0xff]  }
 0x2fe   : > { %v1341_v57 = vsel %vm7396_vm8, %v1336_v41, %v1340_v55  ;;  %5583 = vmatprep.subr.bf16.mxu0 %v6145_v26  ;;  %v2550_v5 = vrot.slane %v2548_v35, 5  ;;  %v1345_v4 = vrot.slane %v1343_v45, 4  ;;  %v1352_v13 = vshll.u32 %v1245_v8, 16  ;;  %v7517_v2 = vld [vmem:[#allocation2 + $0x3c] sm:$0x1] }
 0x2ff   : > { %v4988_v3 = vcombine.low %v1327_v31, %v1341_v57  ;;  %v2532_v40 = vrot.slane %v2531_v32, 4  ;;  %v2545_v29 = vor.u32 %v2544_v52, %v2541_v39  ;;  %v1348_v14 = vrot.slane %v1346_v56, 5 }
 0x300   : > { %v1357_v28 = vshrl.u32 %v7508_v53, 16  ;;  %5458 = vmatpush3.bf16.msra.mxu1 %v6146_v34  ;;  %v1354_v1 = vrot.slane %v1352_v13, 5  ;;  %v1360_v55 = vshll.u32 %v7508_v53, 16  ;;  %v1366_v41 = vshll.u32 %v1246_v15, 16 }
 0x301   : > { %5441 = vmatprep.mubr.bf16.mxu1 %v4988_v3  ;;  %v1154_v19 = vsel %vm7364_vm6, %v7432_v9, %v1153_v63  ;;  %5459 = vmatprep.subr.bf16.mxu1 %v6148_v46  ;;  %v2537_v8 = vsel %vm7396_vm8, %v2532_v40, %v2536_v18  ;;  %v2546_v31 = vrot.slane %v2545_v29, 4  ;;  %v1349_v39 = vor.u32 %v1348_v14, %v1345_v4  ;;  %v6149_v9 = vld [vmem:[#allocation11 + $0x158] sm:$0xff]  }
 0x302   : > { %5584 = vmatpush3.bf16.msra.mxu0 %v6145_v26  ;;  %v1359_v35 = vrot.slane %v1357_v28, 4  ;;  %1155 = vst [vmem:[#allocation2 + $0x40] sm:$0xf] %v1154_v19  ;;  %v1362_v34 = vrot.slane %v1360_v55, 5  ;;  %v1368_v45 = vrot.slane %v1366_v41, 5  ;;  %v8568_v57 = vrot.slane %v7415_v62, 4 }
 0x303   : > { %5585 = vmatprep.subr.bf16.mxu0 %v6147_v30  ;;  %v2553_v32 = vshrl.u32 %v2448_v0, 16  ;;  %v2551_v26 = vsel %vm7396_vm8, %v2546_v31, %v2550_v5  ;;  %v1350_v63 = vrot.slane %v1349_v39, 4  ;;  %v2556_v18 = vshll.u32 %v2448_v0, 16  ;;  %v6152_v28 = vld [vmem:[#allocation11 + $0x28] sm:$0xff]   ;;  %v1159_v0 = vld [vmem:[#allocation2 + $0x58] sm:$0xf] }
 0x304   : > { %v1157_v15 = vsel %vm7372_vm7, %v8568_v57, %v1156_v60  ;;  %v2562_v29 = vshll.u32 %v7517_v2, 16  ;;  %5460 = vmatpush3.bf16.msra.mxu1 %v6148_v46  ;;  %v5068_v52 = vcombine.low %v2537_v8, %v2551_v26  ;;  %v1363_v56 = vor.u32 %v1362_v34, %v1359_v35  ;;  %v6151_v55 = vld [vmem:[#allocation11 + $0x160] sm:$0xff]   ;;  %v1162_v8 = vld [vmem:[#allocation2 + $0x5c] sm:$0x1] }
 0x305   : > { %1158 = vst [vmem:[#allocation2 + $0x44] sm:$0x1] %v1157_v15  ;;  %v2555_v3 = vrot.slane %v2553_v32, 4  ;;  %v1009_v62 = vshrl.u32 %v7456_v37, 16  ;;  %5461 = vmatprep.subr.bf16.mxu1 %v6150_v23  ;;  %v1355_v60 = vsel %vm7396_vm8, %v1350_v63, %v1354_v1  ;;  %v2558_v4 = vrot.slane %v2556_v18, 5 }
 0x306   : > { %v7536_v13 = vrot.slane %v2562_v29, 5  ;;  %5586 = vmatpush3.bf16.msra.mxu0 %v6147_v30  ;;  %v1012_v5 = vshll.u32 %v7456_v37, 16  ;;  %5569 = vmatprep.mubr.bf16.mxu0 %v5068_v52  ;;  %v1364_v40 = vrot.slane %v1363_v56, 4  ;;  %v889_v14 = vmax.f32 %v7460_v61, 0.0 }
 0x307   : > { %5587 = vmatprep.subr.bf16.mxu0 %v6149_v9  ;;  %v1011_v46 = vrot.slane %v1009_v62, 7  ;;  %v890_v41 = vmax.f32 %v7489_v36, 0.0  ;;  %v2559_v19 = vor.u32 %v2558_v4, %v2555_v3  ;;  %v891_v1 = vmax.f32 %v7493_v51, 0.0  ;;  %v6153_v36 = vld [vmem:[#allocation11 + $0x168] sm:$0xff]   ;;  %v6154_v51 = vld [vmem:[#allocation11 + $0x30] sm:$0xff]  }
 0x308   : > { %5462 = vmatpush3.bf16.msra.mxu1 %v6150_v23  ;;  %v876_v30 = vadd.f32 %v7330_v12, %v7444_v48  ;;  %v855_v37 = vmul.f32 %v7309_v59, %v7248_v49  ;;  %v1369_v31 = vsel %vm7396_vm8, %v1364_v40, %v1368_v45  ;;  %v5205_v34 = vpack.c.bf16 %v889_v14, %v889_v14  ;;  %v1165_v3 = vld [vmem:[#allocation2 + $0x60] sm:$0xf] }
 0x309   : > { %v2450_v39 = vld [vmem:[#allocation2 + $0x40] sm:$0xf]  ;;  %v1014_v35 = vor.u32 %v1012_v5, %v1011_v46  ;;  %v1015_v61 = vrot.slane %v1011_v46, 4  ;;  %5463 = vmatprep.subr.bf16.mxu1 %v6152_v28  ;;  %v4989_v57 = vcombine.low %v1355_v60, %v1369_v31  ;;  %v2560_v15 = vrot.slane %v2559_v19, 4  ;;  %v1168_v46 = vld [vmem:[#allocation2 + $0x64] sm:$0x1] }
 0x30a   : > { %v2567_v23 = vshrl.u32 %v2450_v39, 16  ;;  %v2570_v32 = vshll.u32 %v2450_v39, 16  ;;  %5588 = vmatpush3.bf16.msra.mxu0 %v6149_v9  ;;  %v1017_v45 = vshrl.u32 %v5205_v34, 16  ;;  %v1020_v63 = vshll.u32 %v5205_v34, 16  ;;  %v6156_v19 = vld [vmem:[#allocation11 + $0x38] sm:$0xff]  }
 0x30b   : > { %v1160_v49 = vsel %vm7364_vm6, %v1014_v35, %v1159_v0  ;;  %v1163_v48 = vsel %vm7372_vm7, %v1015_v61, %v1162_v8  ;;  %5589 = vmatprep.subr.bf16.mxu0 %v6151_v55  ;;  %5442 = vmatmul.mubr.bf16.gmra.mrb[4].mxu1 %v4989_v57  ;;  %v5206_v62 = vpack.c.bf16 %v890_v41, %v890_v41  ;;  %v892_v4 = vmax.f32 %v876_v30, 0.0  ;;  %v1171_v30 = vld [vmem:[#allocation2 + $0x68] sm:$0xf] }
 0x30c   : > { %v7548_v26 = vld [vmem:[#allocation2 + $0x44] sm:$0x1]  ;;  %v2569_v29 = vrot.slane %v2567_v23, 4  ;;  %v2572_v52 = vrot.slane %v2570_v32, 5  ;;  %1161 = vst [vmem:[#allocation2 + $0x58] sm:$0xf] %v1160_v49  ;;  %v7556_v60 = vpack.c.bf16 %v891_v1, %v891_v1  ;;  %5464 = vmatpush3.bf16.msra.mxu1 %v6152_v28  ;;  %v2565_v5 = vsel %vm7396_vm8, %v2560_v15, %v7536_v13 }
 0x30d   : > { %v2576_v56 = vshll.u32 %v7548_v26, 16  ;;  %1164 = vst [vmem:[#allocation2 + $0x5c] sm:$0x1] %v1163_v48  ;;  %v1019_v9 = vrot.slane %v1017_v45, 7  ;;  %5465 = vmatprep.subr.bf16.mxu1 %v6154_v51  ;;  %v877_v14 = vadd.f32 %v7330_v12, %v855_v37  ;;  %v1025_v39 = vshrl.u32 %v5206_v62, 16  ;;  %v6155_v1 = vld [vmem:[#allocation11 + $0x170] sm:$0xff]  }
 0x30e   : > { %v2573_v0 = vor.u32 %v2572_v52, %v2569_v29  ;;  %5590 = vmatpush3.bf16.msra.mxu0 %v6151_v55  ;;  %v1028_v41 = vshll.u32 %v5206_v62, 16  ;;  %v1033_v35 = vshrl.u32 %v7556_v60, 16  ;;  %v1036_v13 = vshll.u32 %v7556_v60, 16  ;;  %v6157_v15 = vld [vmem:[#allocation11 + $0x178] sm:$0xff]   ;;  %v1174_v32 = vld [vmem:[#allocation2 + $0x6c] sm:$0x1] }
 0x30f   : > { %v2578_v40 = vrot.slane %v2576_v56, 5  ;;  %v1022_v8 = vor.u32 %v1020_v63, %v1019_v9  ;;  %v1023_v31 = vrot.slane %v1019_v9, 4  ;;  %5591 = vmatprep.subr.bf16.mxu0 %v6153_v36  ;;  %v7564_v61 = vpack.c.bf16 %v892_v4, %v892_v4  ;;  %v7576_v63 = vld [vmem:[#allocation11 + $0x80] sm:$0xff]  }
 0x310   : > { %v2574_v28 = vrot.slane %v2573_v0, 4  ;;  %v1027_v34 = vrot.slane %v1025_v39, 7  ;;  %v893_v57 = vmax.f32 %v877_v14, 0.0  ;;  %5466 = vmatpush3.bf16.msra.mxu1 %v6154_v51  ;;  %v7572_v49 = vrot.slane %v1033_v35, 7  ;;  %v7591_v39 = vld [vmem:[#allocation11 + $0x180] sm:$0xff]  }
 0x311   : > { %v1166_v55 = vsel %vm7364_vm6, %v1022_v8, %v1165_v3  ;;  %v1169_v37 = vsel %vm7372_vm7, %v1023_v31, %v1168_v46  ;;  %v1041_v48 = vshrl.u32 %v7564_v61, 16  ;;  %v1044_v45 = vshll.u32 %v7564_v61, 16  ;;  %5467 = vmatprep.subr.bf16.mxu1 %v6156_v19  ;;  %v1177_v31 = vld [vmem:[#allocation2 + $0x70] sm:$0xf] }
 0x312   : > { %v2579_v23 = vsel %vm7396_vm8, %v2574_v28, %v2578_v40  ;;  %1167 = vst [vmem:[#allocation2 + $0x60] sm:$0xf] %v1166_v55  ;;  %1170 = vst [vmem:[#allocation2 + $0x64] sm:$0x1] %v1169_v37  ;;  %5592 = vmatpush3.bf16.msra.mxu0 %v6153_v36  ;;  %v1030_v9 = vor.u32 %v1028_v41, %v1027_v34  ;;  %v7580_v3 = vpack.c.bf16 %v893_v57, %v893_v57 }
 0x313   : > { %v5069_v29 = vcombine.low %v2565_v5, %v2579_v23  ;;  %v7578_v52 = vld [vmem:[#allocation2 + $0x58] sm:$0xf]  ;;  %5593 = vmatprep.subr.bf16.mxu0 %v6155_v1  ;;  %v856_v62 = vmul.f32 %v7236_v43, %v7309_v59  ;;  %v1031_v14 = vrot.slane %v1027_v34, 4  ;;  %v1039_v57 = vrot.slane %v7572_v49, 4 }
 0x314   : > { %v1248_v51 = vld [vmem:[#allocation2 + $0x5c] sm:$0x1]  ;;  %v2452_v56 = vld [vmem:[#allocation2 + $0x58] sm:$0xf]  ;;  %v1385_v36 = vshrl.u32 %v7578_v52, 16  ;;  %v1388_v60 = vshll.u32 %v7578_v52, 16  ;;  %v1172_v8 = vsel %vm7364_vm6, %v1030_v9, %v1171_v30  ;;  %5468 = vmatpush3.bf16.msra.mxu1 %v6156_v19  ;;  %v1038_v30 = vor.u32 %v1036_v13, %v7572_v49 }
 0x315   : > { %v1394_v4 = vshll.u32 %v1248_v51, 16  ;;  %v7586_v0 = vld [vmem:[#allocation2 + $0x5c] sm:$0x1]  ;;  %v2581_v40 = vshrl.u32 %v2452_v56, 16  ;;  %5570 = vmatmul.mubr.bf16.gmra.mrb[4].mxu0 %v5069_v29  ;;  %v2584_v5 = vshll.u32 %v2452_v56, 16  ;;  %5485 = vmatprep.subr.bf16.mxu1 %v7576_v63  ;;  %v1175_v34 = vsel %vm7372_vm7, %v1031_v14, %v1174_v32 }
 0x316   : > { %v2590_v46 = vshll.u32 %v7586_v0, 16  ;;  %v1387_v43 = vrot.slane %v1385_v36, 4  ;;  %v1390_v41 = vrot.slane %v1388_v60, 5  ;;  %1173 = vst [vmem:[#allocation2 + $0x68] sm:$0xf] %v1172_v8  ;;  %5594 = vmatpush3.bf16.msra.mxu0 %v6155_v1  ;;  %v7600_v23 = vrot.slane %v1041_v48, 7 }
 0x317   : > { %v1396_v28 = vrot.slane %v1394_v4, 5  ;;  %v2583_v35 = vrot.slane %v2581_v40, 4  ;;  %v2586_v55 = vrot.slane %v2584_v5, 5  ;;  %5595 = vmatprep.subr.bf16.mxu0 %v6157_v15  ;;  %1176 = vst [vmem:[#allocation2 + $0x6c] sm:$0x1] %v1175_v34  ;;  %v1178_v32 = vsel %vm7364_vm6, %v1038_v30, %v1177_v31 }
 0x318   : > { %v7594_v37 = vrot.slane %v2590_v46, 5  ;;  %v1391_v19 = vor.u32 %v1390_v41, %v1387_v43  ;;  %v7610_v13 = vadd.f32 %v7330_v12, %v856_v62  ;;  %v7614_v36 = vmul.f32 %v7244_v47, %v7309_v59  ;;  %1179 = vst [vmem:[#allocation2 + $0x70] sm:$0xf] %v1178_v32  ;;  %v1180_v43 = vld [vmem:[#allocation2 + $0x74] sm:$0x1] }
 0x319   : > { %v2454_v1 = vld [vmem:[#allocation2 + $0x60] sm:$0xf]  ;;  %v7603_v51 = vld [vmem:[#allocation2 + $0x64] sm:$0x1]  ;;  %v2587_v56 = vor.u32 %v2586_v55, %v2583_v35  ;;  %v1046_v29 = vor.u32 %v1044_v45, %v7600_v23  ;;  %v8577_v50 = vrot.slane %v7477_v38, 5 }
 0x31a   : > { %v7605_v9 = vld [vmem:[#allocation2 + $0x60] sm:$0xf]  ;;  %v1392_v49 = vrot.slane %v1391_v19, 4  ;;  %v2595_v48 = vshrl.u32 %v2454_v1, 16  ;;  %v2598_v60 = vshll.u32 %v2454_v1, 16  ;;  %v2604_v4 = vshll.u32 %v7603_v51, 16  ;;  %5596 = vmatpush3.bf16.msra.mxu0 %v6157_v15 }
 0x31b   : > { %v7617_v40 = vld [vmem:[#allocation2 + $0x64] sm:$0x1]  ;;  %v2588_v5 = vrot.slane %v2587_v56, 4  ;;  %v1399_v46 = vshrl.u32 %v7605_v9, 16  ;;  %v1402_v14 = vshll.u32 %v7605_v9, 16  ;;  %5613 = vmatprep.subr.bf16.mxu0 %v7591_v39  ;;  %v8569_v15 = vsel %vm7396_vm8, %v7409_v33, %v7344_v42 }
 0x31c   : > { %v1408_v62 = vshll.u32 %v7617_v40, 16  ;;  %v1397_v47 = vsel %vm7396_vm8, %v1392_v49, %v1396_v28  ;;  %v2597_v59 = vrot.slane %v2595_v48, 4  ;;  %v2600_v8 = vrot.slane %v2598_v60, 5 }
 0x31d   : > { %v2606_v31 = vrot.slane %v2604_v4, 5  ;;  %v4990_v41 = vcombine.low %v8569_v15, %v1397_v47  ;;  %v2593_v35 = vsel %vm7396_vm8, %v2588_v5, %v7594_v37  ;;  %v7633_v55 = vld [vmem:[#allocation2 + $0x68] sm:$0xf]  ;;  %v1401_v34 = vrot.slane %v1399_v46, 4 }
 0x31e   : > { %v1404_v30 = vrot.slane %v1402_v14, 5  ;;  %v2456_v19 = vld [vmem:[#allocation2 + $0x68] sm:$0xf]  ;;  %v2601_v28 = vor.u32 %v2600_v8, %v2597_v59  ;;  %v1410_v1 = vrot.slane %v1408_v62, 5  ;;  %v1413_v56 = vshrl.u32 %v7633_v55, 16 }
 0x31f   : > { %v1416_v32 = vshll.u32 %v7633_v55, 16  ;;  %5445 = vmatprep.mubr.bf16.mxu1 %v4990_v41  ;;  %v7637_v49 = vld [vmem:[#allocation2 + $0x6c] sm:$0x1]  ;;  %v1181_v33 = vsel %vm7372_vm7, %v1039_v57, %v1180_v43  ;;  %v2609_v37 = vshrl.u32 %v2456_v19, 16  ;;  %v2612_v60 = vshll.u32 %v2456_v19, 16 }
 0x320   : > { %v1405_v42 = vor.u32 %v1404_v30, %v1401_v34  ;;  %v7641_v48 = vld [vmem:[#allocation2 + $0x6c] sm:$0x1]  ;;  %v2602_v4 = vrot.slane %v2601_v28, 4  ;;  %v1415_v5 = vrot.slane %v1413_v56, 4  ;;  %v1422_v14 = vshll.u32 %v7637_v49, 16 }
 0x321   : > { %v1418_v46 = vrot.slane %v1416_v32, 5  ;;  %1182 = vst [vmem:[#allocation2 + $0x74] sm:$0x1] %v1181_v33  ;;  %v2458_v47 = vld [vmem:[#allocation2 + $0x70] sm:$0xf]  ;;  %v2611_v59 = vrot.slane %v2609_v37, 4 }
 0x322   : > { %v1406_v62 = vrot.slane %v1405_v42, 4  ;;  %v2614_v8 = vrot.slane %v2612_v60, 5  ;;  %v2618_v15 = vshll.u32 %v7641_v48, 16  ;;  %v1183_v41 = vld [vmem:[#allocation2 + $0x78] sm:$0xf]  ;;  %v2607_v57 = vsel %vm7396_vm8, %v2602_v4, %v2606_v31 }
 0x323   : > { %v1419_v43 = vor.u32 %v1418_v46, %v1415_v5  ;;  %v1424_v34 = vrot.slane %v1422_v14, 5  ;;  %v2623_v30 = vshrl.u32 %v2458_v47, 16  ;;  %v1186_v19 = vld [vmem:[#allocation2 + $0x7c] sm:$0x1]  ;;  %v7647_v28 = vld [vmem:[#allocation2 + $0x70] sm:$0xf]  ;;  %v5070_v56 = vcombine.low %v2593_v35, %v2607_v57 }
 0x324   : > { %v1411_v32 = vsel %vm7396_vm8, %v1406_v62, %v1410_v1  ;;  %v2615_v42 = vor.u32 %v2614_v8, %v2611_v59  ;;  %v2620_v33 = vrot.slane %v2618_v15, 5  ;;  %v2626_v18 = vshll.u32 %v2458_v47, 16 }
 0x325   : > { %v1420_v37 = vrot.slane %v1419_v43, 4  ;;  %v2625_v60 = vrot.slane %v2623_v30, 4  ;;  %5573 = vmatprep.mubr.bf16.mxu0 %v5070_v56  ;;  %v1047_v4 = vrot.slane %v7600_v23, 4  ;;  %v1427_v5 = vshrl.u32 %v7647_v28, 16  ;;  %v1192_v43 = vld [vmem:[#allocation2 + $0x84] sm:$0x1] }
 0x326   : > { %v2616_v31 = vrot.slane %v2615_v42, 4  ;;  %v1430_v35 = vshll.u32 %v7647_v28, 16  ;;  %v2628_v46 = vrot.slane %v2626_v18, 5  ;;  %v1184_v14 = vsel %vm7364_vm6, %v1046_v29, %v1183_v41  ;;  %v1189_v56 = vld [vmem:[#allocation2 + $0x80] sm:$0xf] }
 0x327   : > { %v1425_v1 = vsel %vm7396_vm8, %v1420_v37, %v1424_v34  ;;  %v8570_v62 = vshrl.u32 %v7580_v3, 16  ;;  %1185 = vst [vmem:[#allocation2 + $0x78] sm:$0xf] %v1184_v14  ;;  %v1187_v59 = vsel %vm7372_vm7, %v1047_v4, %v1186_v19  ;;  %v1429_v15 = vrot.slane %v1427_v5, 4 }
 0x328   : > { %v4991_v61 = vcombine.low %v1411_v32, %v1425_v1  ;;  %v7663_v45 = vld [vmem:[#allocation2 + $0x74] sm:$0x1]  ;;  %v2621_v23 = vsel %vm7396_vm8, %v2616_v31, %v2620_v33  ;;  %v2629_v18 = vor.u32 %v2628_v46, %v2625_v60  ;;  %1188 = vst [vmem:[#allocation2 + $0x7c] sm:$0x1] %v1187_v59  ;;  %v1432_v29 = vrot.slane %v1430_v35, 5 }
 0x329   : > { %v1051_v47 = vrot.slane %v8570_v62, 7  ;;  %v7669_v8 = vld [vmem:[#allocation2 + $0x74] sm:$0x1]  ;;  %v2632_v57 = vshll.u32 %v7663_v45, 16  ;;  %v1052_v34 = vshll.u32 %v7580_v3, 16  ;;  %v894_v32 = vmax.f32 %v7610_v13, 0.0 }
 0x32a   : > { %v1436_v41 = vshll.u32 %v7669_v8, 16  ;;  %5446 = vmatmul.mubr.bf16.gmra.mrb[8].mxu1 %v4991_v61  ;;  %v879_v19 = vadd.f32 %v7330_v12, %v7614_v36  ;;  %v2630_v42 = vrot.slane %v2629_v18, 4  ;;  %v1433_v37 = vor.u32 %v1432_v29, %v1429_v15  ;;  %v7681_v1 = vld [vmem:[#allocation2 + $0x8] sm:$0xe]  ;;  %v7690_v62 = vld [vmem:[#allocation2 + $0x10] sm:$0xe] }
 0x32b   : > { %v1055_v30 = vrot.slane %v1051_v47, 4  ;;  %v2634_v33 = vrot.slane %v2632_v57, 5  ;;  %v1054_v31 = vor.u32 %v1052_v34, %v1051_v47  ;;  %v5210_v5 = vpack.c.bf16 %v894_v32, %v894_v32 }
 0x32c   : > { %v7677_v60 = vrot.slane %v1436_v41, 5  ;;  %v895_v35 = vmax.f32 %v879_v19, 0.0  ;;  %v7686_v46 = vrot.slane %v1433_v37, 4  ;;  %v8574_v7 = vrot.slane %v7681_v1, 9 }
 0x32d   : > { %v1193_v4 = vsel %vm7372_vm7, %v1055_v30, %v1192_v43  ;;  %v2635_v13 = vsel %vm7396_vm8, %v2630_v42, %v2634_v33  ;;  %v1190_v36 = vsel %vm7364_vm6, %v1054_v31, %v1189_v56  ;;  %v1057_v14 = vshrl.u32 %v5210_v5, 16  ;;  %v1195_v42 = vld [vmem:[#allocation2 + $0x88] sm:$0xf] }
 0x32e   : > { %1194 = vst [vmem:[#allocation2 + $0x84] sm:$0x1] %v1193_v4  ;;  %v5071_v12 = vcombine.low %v2621_v23, %v2635_v13  ;;  %v7692_v47 = vld [vmem:[#allocation2 + $0x78] sm:$0xf]  ;;  %1191 = vst [vmem:[#allocation2 + $0x80] sm:$0xf] %v1190_v36  ;;  %v5211_v15 = vpack.c.bf16 %v895_v35, %v895_v35  ;;  %v1439_v23 = vsel %vm7396_vm8, %v7686_v46, %v7677_v60 }
 0x32f   : > { %v2460_v61 = vld [vmem:[#allocation2 + $0x78] sm:$0xf]  ;;  %v1060_v59 = vshll.u32 %v5210_v5, 16  ;;  %v7695_v57 = vld [vmem:[#allocation2 + $0x7c] sm:$0x1]  ;;  %v1441_v29 = vshrl.u32 %v7692_v47, 16 }
 0x330   : > { %5574 = vmatmul.mubr.bf16.gmra.mrb[8].mxu0 %v5071_v12  ;;  %v1444_v41 = vshll.u32 %v7692_v47, 16  ;;  %v7703_v43 = vld [vmem:[#allocation2 + $0x7c] sm:$0x1]  ;;  %v1450_v30 = vshll.u32 %v7695_v57, 16  ;;  %v2637_v56 = vshrl.u32 %v2460_v61, 16  ;;  %v2640_v32 = vshll.u32 %v2460_v61, 16 }
 0x331   : > { %v2646_v19 = vshll.u32 %v7703_v43, 16  ;;  %v1443_v33 = vrot.slane %v1441_v29, 4  ;;  %v1059_v31 = vrot.slane %v1057_v14, 7  ;;  %v1065_v60 = vshrl.u32 %v5211_v15, 16  ;;  %v1198_v13 = vld [vmem:[#allocation2 + $0x8c] sm:$0x1] }
 0x332   : > { %v1446_v37 = vrot.slane %v1444_v41, 5  ;;  %v1452_v4 = vrot.slane %v1450_v30, 5  ;;  %v2639_v5 = vrot.slane %v2637_v56, 4  ;;  %v2642_v35 = vrot.slane %v2640_v32, 5  ;;  %v1204_v41 = vld [vmem:[#allocation2 + $0x94] sm:$0x1] }
 0x333   : > { %v5083_v46 = vrot.slane %v7690_v62, 9  ;;  %v1062_v34 = vor.u32 %v1060_v59, %v1059_v31  ;;  %v1063_v3 = vrot.slane %v1059_v31, 4  ;;  %v1067_v61 = vrot.slane %v1065_v60, 7 }
 0x334   : > { %v1447_v12 = vor.u32 %v1446_v37, %v1443_v33  ;;  %v2643_v21 = vor.u32 %v2642_v35, %v2639_v5  ;;  %v2648_v20 = vrot.slane %v2646_v19, 5  ;;  %v1068_v14 = vshll.u32 %v5211_v15, 16  ;;  %v2904_v37 = vld [vmem:[#allocation2 + $0x18] sm:$0xe]  ;;  %v1201_v19 = vld [vmem:[#allocation2 + $0x90] sm:$0xf] }
 0x335   : > { %v7710_v36 = vld [vmem:[#allocation2 + $0x84] sm:$0x1]  ;;  %v2462_v56 = vld [vmem:[#allocation2 + $0x80] sm:$0xf]  ;;  %v1196_v32 = vsel %vm7364_vm6, %v1062_v34, %v1195_v42  ;;  %v1199_v62 = vsel %vm7372_vm7, %v1063_v3, %v1198_v13  ;;  %v1071_v59 = vrot.slane %v1067_v61, 4 }
 0x336   : > { %v7712_v18 = vld [vmem:[#allocation2 + $0x84] sm:$0x1]  ;;  %v2660_v29 = vshll.u32 %v7710_v36, 16  ;;  %v1448_v30 = vrot.slane %v1447_v12, 4  ;;  %v7719_v33 = vld [vmem:[#allocation2 + $0x80] sm:$0xf]  ;;  %v1070_v16 = vor.u32 %v1068_v14, %v1067_v61 }
 0x337   : > { %v2644_v31 = vrot.slane %v2643_v21, 4  ;;  %v2651_v60 = vshrl.u32 %v2462_v56, 16  ;;  %v2654_v5 = vshll.u32 %v2462_v56, 16  ;;  %1197 = vst [vmem:[#allocation2 + $0x88] sm:$0xf] %v1196_v32  ;;  %v1464_v15 = vshll.u32 %v7712_v18, 16 }
 0x338   : > { %1200 = vst [vmem:[#allocation2 + $0x8c] sm:$0x1] %v1199_v62  ;;  %v2905_v35 = vld [vmem:[#allocation2 + $0x20] sm:$0xe]  ;;  %v1453_v12 = vsel %vm7396_vm8, %v1448_v30, %v1452_v4  ;;  %v2662_v34 = vrot.slane %v2660_v29, 5  ;;  %v1455_v42 = vshrl.u32 %v7719_v33, 16  ;;  %v1205_v4 = vsel %vm7372_vm7, %v1071_v59, %v1204_v41 }
 0x339   : > { %v1458_v3 = vshll.u32 %v7719_v33, 16  ;;  %v4992_v13 = vcombine.low %v1439_v23, %v1453_v12  ;;  %v2653_v56 = vrot.slane %v2651_v60, 4  ;;  %v2656_v32 = vrot.slane %v2654_v5, 5  ;;  %1206 = vst [vmem:[#allocation2 + $0x94] sm:$0x1] %v1205_v4 }
 0x33a   : > { %v1457_v62 = vrot.slane %v1455_v42, 4  ;;  %v8573_v30 = vrot.slane %v7446_v24, 5  ;;  %v8575_v23 = vrot.slane %v7449_v22, 5  ;;  %v5084_v61 = vrot.slane %v2904_v37, 9 }
 0x33b   : > { %v1460_v17 = vrot.slane %v1458_v3, 5  ;;  %5449 = vmatprep.mubr.bf16.mxu1 %v4992_v13  ;;  %v2657_v29 = vor.u32 %v2656_v32, %v2653_v56  ;;  %v1202_v14 = vsel %vm7364_vm6, %v1070_v16, %v1201_v19  ;;  %v5085_v41 = vrot.slane %v2905_v35, 9  ;;  %v2908_v13 = vld [vmem:[#allocation2 + $0x38] sm:$0xe] }
 0x33c   : > { %v7740_v6 = vsel %vm7728_vm11, %v8574_v7, %v8573_v30  ;;  %v7746_v60 = vsel %vm7728_vm11, %v5083_v46, %v8575_v23  ;;  %v2649_v1 = vsel %vm7396_vm8, %v2644_v31, %v2648_v20  ;;  %v1466_v59 = vrot.slane %v1464_v15, 5  ;;  %1203 = vst [vmem:[#allocation2 + $0x90] sm:$0xf] %v1202_v14  ;;  %v6232_v23 = vld [vmem:[#allocation2 + $0x14] sm:$0x1] }
 0x33d   : > { %v1461_v58 = vor.u32 %v1460_v17, %v1457_v62  ;;  %v2658_v7 = vrot.slane %v2657_v29, 4  ;;  %v8576_v17 = vrot.slane %v7471_v54, 5  ;;  %v7768_v37 = vsel %vm7728_vm11, %v5085_v41, %v8577_v50  ;;  %v2909_v62 = vld [vmem:[#allocation2 + $0x40] sm:$0xe] }
 0x33e   : > { %v7754_v22 = vld [vmem:[#allocation2 + $0x88] sm:$0xf]  ;;  %v5089_v50 = vrot.slane %v2909_v62, 9  ;;  %v1930_v24 = vrot.slane %v6232_v23, 5 }
 0x33f   : > { %v7756_v5 = vld [vmem:[#allocation2 + $0x8c] sm:$0x1]  ;;  %v1462_v46 = vrot.slane %v1461_v58, 4  ;;  %v7762_v16 = vsel %vm7728_vm11, %v5084_v61, %v8576_v17  ;;  %v2663_v31 = vsel %vm7396_vm8, %v2658_v7, %v2662_v34  ;;  %v1469_v15 = vshrl.u32 %v7754_v22, 16  ;;  %v2464_v35 = vld [vmem:[#allocation2 + $0x88] sm:$0xf] }
 0x340   : > { %v1472_v54 = vshll.u32 %v7754_v22, 16  ;;  %v1478_v19 = vshll.u32 %v7756_v5, 16  ;;  %v5072_v12 = vcombine.low %v2649_v1, %v2663_v31  ;;  %v7777_v42 = vld [vmem:[#allocation2 + $0x8c] sm:$0x1]  ;;  %v2665_v38 = vshrl.u32 %v2464_v35, 16 }
 0x341   : > { %v2668_v3 = vshll.u32 %v2464_v35, 16  ;;  %v1471_v56 = vrot.slane %v1469_v15, 4  ;;  %v7779_v4 = vld [vmem:[#allocation2 + $0x94] sm:$0x1]  ;;  %v2674_v30 = vshll.u32 %v7777_v42, 16  ;;  %v1467_v61 = vsel %vm7396_vm8, %v1462_v46, %v1466_v59 }
 0x342   : > { %v1474_v32 = vrot.slane %v1472_v54, 5  ;;  %5577 = vmatprep.mubr.bf16.mxu0 %v5072_v12  ;;  %v2667_v34 = vrot.slane %v2665_v38, 4  ;;  %v1480_v14 = vrot.slane %v1478_v19, 5  ;;  %v5088_v7 = vrot.slane %v2908_v13, 9  ;;  %v6224_v38 = vld [vmem:[#allocation2] sm:$0xf] }
 0x343   : > { %v2670_v29 = vrot.slane %v2668_v3, 5  ;;  %v2466_v41 = vld [vmem:[#allocation2 + $0x90] sm:$0xf]  ;;  %v2976_v17 = vrot.slane %v7517_v2, 5  ;;  %v2688_v35 = vshll.u32 %v7779_v4, 16  ;;  %v2676_v12 = vrot.slane %v2674_v30, 5 }
 0x344   : > { %v1475_v58 = vor.u32 %v1474_v32, %v1471_v56  ;;  %v2679_v15 = vshrl.u32 %v2466_v41, 16  ;;  %v2682_v54 = vshll.u32 %v2466_v41, 16  ;;  %v6225_v3 = vld [vmem:[#allocation2 + $0x8] sm:$0xf]  ;;  %v2980_v46 = vrot.slane %v7548_v26, 5 }
 0x345   : > { %v2671_v1 = vor.u32 %v2670_v29, %v2667_v34  ;;  %v5002_v20 = vcombine.low %v6224_v38, %v6225_v3  ;;  %v7790_v59 = vsel %vm7728_vm11, %v5088_v7, %v2976_v17  ;;  %v2690_v29 = vrot.slane %v2688_v35, 5  ;;  %v6226_v41 = vld [vmem:[#allocation2 + $0x4] sm:$0x1]  ;;  %v2907_v7 = vld [vmem:[#allocation2 + $0x30] sm:$0xe] }
 0x346   : > { %v1476_v31 = vrot.slane %v1475_v58, 4  ;;  %v2681_v13 = vrot.slane %v2679_v15, 4  ;;  %v2684_v56 = vrot.slane %v2682_v54, 5  ;;  %v7797_v62 = vsel %vm7728_vm11, %v5089_v50, %v2980_v46  ;;  %v2906_v58 = vld [vmem:[#allocation2 + $0x28] sm:$0xe] }
 0x347   : > { %v2672_v2 = vrot.slane %v2671_v1, 4  ;;  %v2910_v17 = vld [vmem:[#allocation2 + $0x58] sm:$0xe]  ;;  %v1869_v50 = vld [vmem:[#allocation2] sm:$0xe] }
 0x348   : > { %v1481_v19 = vsel %vm7396_vm8, %v1476_v31, %v1480_v14  ;;  %v2685_v34 = vor.u32 %v2684_v56, %v2681_v13  ;;  %v1922_v14 = vrot.slane %v6226_v41, 5  ;;  %v1870_v31 = vld [vmem:[#allocation2 + $0x8] sm:$0xe]  ;;  %v1871_v15 = vld [vmem:[#allocation2 + $0x10] sm:$0xe]  ;;  %v5086_v13 = vrot.slane %v2906_v58, 9 }
 0x349   : > { %v4993_v32 = vcombine.low %v1467_v61, %v1481_v19  ;;  %v2677_v1 = vsel %vm7396_vm8, %v2672_v2, %v2676_v12  ;;  %v6227_v54 = vld [vmem:[#allocation2 + $0xc] sm:$0x1]  ;;  %v6228_v3 = vld [vmem:[#allocation2 + $0x10] sm:$0xf]  ;;  %v6229_v46 = vld [vmem:[#allocation2 + $0x18] sm:$0xf]  ;;  %v8578_v58 = vcombine.low %v7740_v6, %v7746_v60  ;;  %v8579_v6 = vcombine.low %v7483_v25, %v7485_v44 }
 0x34a   : > { %v2686_v61 = vrot.slane %v2685_v34, 4  ;;  %v1926_v35 = vrot.slane %v6227_v54, 5  ;;  %v5003_v19 = vcombine.low %v6228_v3, %v6229_v46  ;;  %v2911_v56 = vld [vmem:[#allocation2 + $0x60] sm:$0xe]  ;;  %v6162_v41 = vld [vmem:[#allocation11 + $0x88] sm:$0xff]   ;;  %v1934_v54 = vrot.slane %v6233_v27, 5 }
 0x34b   : > { %5450 = vmatmul.mubr.bf16.gmra.mrb[12].mxu1 %v4993_v32  ;;  %v6230_v12 = vld [vmem:[#allocation2 + $0x2c] sm:$0x1]  ;;  %v6231_v34 = vld [vmem:[#allocation2 + $0x34] sm:$0x1]  ;;  %v1872_v30 = vld [vmem:[#allocation2 + $0x18] sm:$0xe] }
 0x34c   : > { %5469 = vmatprep.mubr.bf16.mxu1 %v5002_v20  ;;  %v2691_v38 = vsel %vm7396_vm8, %v2686_v61, %v2690_v29  ;;  %v2968_v2 = vrot.slane %v6230_v12, 5  ;;  %v5087_v20 = vrot.slane %v2907_v7, 9  ;;  %v2972_v26 = vrot.slane %v6231_v34, 5 }
 0x34d   : > { %v5073_v32 = vcombine.low %v2677_v1, %v2691_v38  ;;  %v5090_v10 = vrot.slane %v2910_v17, 9  ;;  %v2984_v29 = vrot.slane %v7586_v0, 5  ;;  %v5091_v1 = vrot.slane %v2911_v56, 9  ;;  %v6168_v56 = vld [vmem:[#allocation11 + $0x98] sm:$0xff]  }
 0x34e   : > { %v5018_v61 = vrot.slane %v1869_v50, 9  ;;  %v5019_v38 = vrot.slane %v1870_v31, 9  ;;  %v5020_v3 = vrot.slane %v1871_v15, 9  ;;  %v2969_v7 = vsel %vm7728_vm11, %v5086_v13, %v2968_v2  ;;  %v6163_v50 = vld [vmem:[#allocation11 + $0x188] sm:$0xff]   ;;  %v7828_v31 = vld [vmem:[#allocation2 + $0x68] sm:$0xe] }
 0x34f   : > { %5578 = vmatmul.mubr.bf16.gmra.mrb[12].mxu0 %v5073_v32  ;;  %v2973_v23 = vsel %vm7728_vm11, %v5087_v20, %v2972_v26  ;;  %v2988_v27 = vrot.slane %v7603_v51, 5  ;;  %v5021_v17 = vrot.slane %v1872_v30, 9  ;;  %v6165_v26 = vld [vmem:[#allocation11 + $0x90] sm:$0xff]   ;;  %v7830_v51 = vld [vmem:[#allocation2 + $0x70] sm:$0xe]  ;;  %v2985_v46 = vsel %vm7728_vm11, %v5090_v10, %v2984_v29 }
 0x350   : > { %5597 = vmatprep.mubr.bf16.mxu0 %v8578_v58  ;;  %v7822_v0 = vsel %vm7728_vm11, %v5018_v61, %v1922_v14  ;;  %v7826_v60 = vsel %vm7728_vm11, %v5019_v38, %v1926_v35  ;;  %v7836_v25 = vsel %vm7728_vm11, %v5020_v3, %v1930_v24  ;;  %v5100_v30 = vcombine.low %v2969_v7, %v2973_v23  ;;  %v7842_v14 = vld [vmem:[#allocation2 + $0x78] sm:$0xe]  ;;  %v1879_v35 = vld [vmem:[#allocation2 + $0x60] sm:$0xe]  ;;  %v1880_v13 = vld [vmem:[#allocation2 + $0x68] sm:$0xe] }
 0x351   : > { %v7840_v44 = vsel %vm7728_vm11, %v5021_v17, %v1934_v54  ;;  %v1881_v24 = vld [vmem:[#allocation2 + $0x70] sm:$0xe]  ;;  %v5092_v2 = vrot.slane %v7828_v31, 9  ;;  %v1882_v20 = vld [vmem:[#allocation2 + $0x78] sm:$0xe]  ;;  %v8580_v34 = vcombine.low %v7762_v16, %v7768_v37  ;;  %v2992_v10 = vrot.slane %v7641_v48, 5 }
 0x352   : > { %v5035_v15 = vcombine.low %v7836_v25, %v7840_v44  ;;  %v6234_v32 = vld [vmem:[#allocation2 + $0x50] sm:$0xf]  ;;  %v5093_v54 = vrot.slane %v7830_v51, 9  ;;  %v2996_v29 = vrot.slane %v7663_v45, 5  ;;  %v5028_v58 = vrot.slane %v1879_v35, 9  ;;  %v6166_v16 = vld [vmem:[#allocation11 + $0x190] sm:$0xff]  }
 0x353   : > { %5470 = vmatmul.mubr.bf16.vlgmr.msra.gmra.mrb[0].mxu1 %v5003_v19  ;;  %v2989_v19 = vsel %vm7728_vm11, %v5091_v1, %v2988_v27  ;;  %v5006_v12 = vcombine.low %v6234_v32, %v7578_v52  ;;  %v5094_v52 = vrot.slane %v7842_v14, 9  ;;  %v1962_v1 = vrot.slane %v7617_v40, 5  ;;  %v1883_v61 = vld [vmem:[#allocation2 + $0x80] sm:$0xe]  ;;  %v1884_v38 = vld [vmem:[#allocation2 + $0x88] sm:$0xe] }
 0x354   : > { %5486 = vmatpush3.bf16.msra.mxu1 %v7576_v63  ;;  %5473 = vmatprep.mubr.bf16.mxu1 %v8579_v6  ;;  %v5034_v63 = vcombine.low %v7822_v0, %v7826_v60  ;;  %v8581_v48 = vcombine.low %v7506_v11, %v7508_v53  ;;  %v3000_v37 = vrot.slane %v7703_v43, 5  ;;  %v5029_v45 = vrot.slane %v1880_v13, 9  ;;  %v2915_v7 = vld [vmem:[#allocation2 + $0x80] sm:$0xe]  ;;  %v6171_v11 = vld [vmem:[#allocation11 + $0xa0] sm:$0xff]  }
 0x355   : > { %5487 = vmatprep.subr.bf16.mxu1 %v6162_v41  ;;  %v1966_v3 = vrot.slane %v7637_v49, 5  ;;  %v7868_v40 = vsel %vm7728_vm11, %v5028_v58, %v1962_v1  ;;  %v1970_v23 = vrot.slane %v7669_v8, 5  ;;  %v5031_v27 = vrot.slane %v1882_v20, 9  ;;  %v6169_v51 = vld [vmem:[#allocation11 + $0x198] sm:$0xff]   ;;  %v2917_v32 = vld [vmem:[#allocation2 + $0x90] sm:$0xe] }
 0x356   : > { %v1974_v17 = vrot.slane %v7695_v57, 5  ;;  %v5032_v49 = vrot.slane %v1883_v61, 9  ;;  %v1978_v43 = vrot.slane %v7712_v18, 5  ;;  %v5033_v6 = vrot.slane %v1884_v38, 9  ;;  %v6177_v20 = vld [vmem:[#allocation11 + $0xb0] sm:$0xff]   ;;  %v6175_v58 = vld [vmem:[#allocation11 + $0x1a8] sm:$0xff]  }
 0x357   : > { %5598 = vmatmul.mubr.bf16.vlgmr.msra.gmra.mrb[0].mxu0 %v8580_v34  ;;  %v7874_v53 = vsel %vm7728_vm11, %v5029_v45, %v1966_v3  ;;  %v1982_v31 = vrot.slane %v7756_v5, 5  ;;  %v3004_v18 = vrot.slane %v7710_v36, 5  ;;  %v5008_v35 = vcombine.low %v7647_v28, %v7692_v47  ;;  %v6174_v36 = vld [vmem:[#allocation11 + $0xa8] sm:$0xff]   ;;  %v2916_v47 = vld [vmem:[#allocation2 + $0x88] sm:$0xe] }
 0x358   : > { %5488 = vmatpush3.bf16.msra.mxu1 %v6162_v41  ;;  %5614 = vmatpush3.bf16.msra.mxu0 %v7591_v39  ;;  %v5102_v41 = vcombine.low %v2985_v46, %v2989_v19  ;;  %v5030_v39 = vrot.slane %v1881_v24, 9  ;;  %v7885_v57 = vsel %vm7728_vm11, %v5031_v27, %v1974_v17  ;;  %v7893_v14 = vsel %vm7728_vm11, %v5032_v49, %v1978_v43  ;;  %v6172_v24 = vld [vmem:[#allocation11 + $0x1a0] sm:$0xff]   ;;  %v6235_v61 = vld [vmem:[#allocation2 + $0x24] sm:$0x1]  ;;  %v6183_v27 = vld [vmem:[#allocation2 + $0x10] ss:$8 sps:$4 sm:$0xff]  }
 0x359   : > { %5489 = vmatprep.subr.bf16.mxu1 %v6165_v26  ;;  %5601 = vmatprep.mubr.bf16.mxu0 %v5100_v30  ;;  %v5095_v30 = vrot.slane %v2915_v7, 9  ;;  %v7899_v46 = vsel %vm7728_vm11, %v5033_v6, %v1982_v31  ;;  %v8582_v5 = vcombine.low %v7790_v59, %v7797_v62  ;;  %v2993_v13 = vsel %vm7728_vm11, %v5092_v2, %v2992_v10  ;;  %v1874_v10 = vld [vmem:[#allocation2 + $0x28] sm:$0xe]  ;;  %v1877_v17 = vld [vmem:[#allocation2 + $0x50] sm:$0xe]  ;;  %v6181_v49 = vld [vmem:[#allocation11 + $0x1b8] sm:$0xff]  }
 0x35a   : > { %5615 = vmatprep.subr.bf16.mxu0 %v6163_v50  ;;  %v7881_v8 = vsel %vm7728_vm11, %v5030_v39, %v1970_v23  ;;  %v5041_v19 = vcombine.low %v7893_v14, %v7899_v46  ;;  %v2997_v28 = vsel %vm7728_vm11, %v5093_v54, %v2996_v29  ;;  %v8583_v59 = vcombine.low %v7605_v9, %v7633_v55  ;;  %v6182_v3 = vld [vmem:[#allocation11 + $0xc0] sm:$0xff]   ;;  %v1876_v23 = vld [vmem:[#allocation2 + $0x38] sm:$0xe]  ;;  %v6237_v60 = vld [vmem:[#allocation2 + $0x34] sm:$0x1] }
 0x35b   : > { %5474 = vmatmul.mubr.bf16.gmra.mrb[4].mxu1 %v8581_v48  ;;  %v3001_v62 = vsel %vm7728_vm11, %v5094_v52, %v3000_v37  ;;  %v5103_v2 = vcombine.low %v2993_v13, %v2997_v28  ;;  %v5096_v34 = vrot.slane %v2916_v47, 9  ;;  %v3008_v9 = vrot.slane %v7777_v42, 5  ;;  %v6180_v52 = vld [vmem:[#allocation11 + $0xb8] sm:$0xff]   ;;  %v6236_v48 = vld [vmem:[#allocation2 + $0x2c] sm:$0x1] }
 0x35c   : > { %5490 = vmatpush3.bf16.msra.mxu1 %v6165_v26  ;;  %5477 = vmatprep.mubr.bf16.mxu1 %v5006_v12  ;;  %v5039_v26 = vcombine.low %v7868_v40, %v7874_v53  ;;  %v1873_v12 = vld [vmem:[#allocation2 + $0x20] sm:$0xe]  ;;  %v5097_v55 = vrot.slane %v2917_v32, 9  ;;  %v3012_v29 = vrot.slane %v7779_v4, 5  ;;  %v1938_v38 = vrot.slane %v6235_v61, 5  ;;  %v6184_v47 = vld [vmem:[#allocation11 + $0x1c0] sm:$0xff]  }
 0x35d   : > { %5491 = vmatprep.subr.bf16.mxu1 %v6168_v56  ;;  %5616 = vmatpush3.bf16.msra.mxu0 %v6163_v50  ;;  %v5040_v50 = vcombine.low %v7881_v8, %v7885_v57  ;;  %v5022_v1 = vrot.slane %v1873_v12, 9  ;;  %v1942_v37 = vrot.slane %v6236_v48, 5  ;;  %v3009_v42 = vsel %vm7728_vm11, %v5096_v34, %v3008_v9  ;;  %v6238_v31 = vld [vmem:[#allocation2 + $0x3c] sm:$0x1]  ;;  %v6185_v32 = vld [vmem:[#allocation2 + $0x20] ss:$8 sps:$4 sm:$0xff]  }
 0x35e   : > { %5617 = vmatprep.subr.bf16.mxu0 %v6166_v16  ;;  %v3013_v4 = vsel %vm7728_vm11, %v5097_v55, %v3012_v29  ;;  %v5025_v6 = vrot.slane %v1876_v23, 9  ;;  %v6240_v13 = vld [vmem:[#allocation2 + $0x5c] sm:$0x1]  ;;  %v6189_v44 = vld [vmem:[#allocation2 + $0x30] ss:$8 sps:$4 sm:$0xff]   ;;  %v6192_v55 = vld [vmem:[#allocation11 + $0xd8] sm:$0xff]  }
 0x35f   : > { %5602 = vmatmul.mubr.bf16.gmra.mrb[4].mxu0 %v8582_v5  ;;  %v5105_v45 = vcombine.low %v3009_v42, %v3013_v4  ;;  %v1939_v39 = vsel %vm7728_vm11, %v5022_v1, %v1938_v38  ;;  %v1958_v28 = vrot.slane %v6240_v13, 5  ;;  %v6188_v12 = vld [vmem:[#allocation11 + $0xd0] sm:$0xff]   ;;  %v6194_v48 = vld [vmem:[#allocation11 + $0xe0] sm:$0xff]  }
 0x360   : > { %5492 = vmatpush3.bf16.msra.mxu1 %v6168_v56  ;;  %5605 = vmatprep.mubr.bf16.mxu0 %v5102_v41  ;;  %v3005_v56 = vsel %vm7728_vm11, %v5095_v30, %v3004_v18  ;;  %v5009_v41 = vcombine.low %v7719_v33, %v7754_v22  ;;  %v6178_v33 = vld [vmem:[#allocation11 + $0x1b0] sm:$0xff]   ;;  %v1875_v22 = vld [vmem:[#allocation2 + $0x30] sm:$0xe]  ;;  %v5026_v18 = vrot.slane %v1877_v17, 9  ;;  %v6191_v42 = vld [vmem:[#allocation2 + $0x40] ss:$8 sps:$4 sm:$0xff]  }
 0x361   : > { %5493 = vmatprep.subr.bf16.mxu1 %v6171_v11  ;;  %5618 = vmatpush3.bf16.msra.mxu0 %v6166_v16  ;;  %v5104_v54 = vcombine.low %v3001_v62, %v3005_v56  ;;  %v5023_v16 = vrot.slane %v1874_v10, 9  ;;  %v5024_v43 = vrot.slane %v1875_v22, 9  ;;  %v6186_v30 = vld [vmem:[#allocation11 + $0xc8] sm:$0xff]   ;;  %v6195_v4 = vld [vmem:[#allocation2 + $0x60] ss:$8 sps:$4 sm:$0xff]  }
 0x362   : > { %5619 = vmatprep.subr.bf16.mxu0 %v6169_v51  ;;  %v3481_v57 = vld [vmem:[#allocation2 + $0x48] sm:$0xf]  ;;  %v6208_v14 = vld [vmem:[#allocation2 + $0x18] ss:$8 sps:$4 sm:$0xff]  }
 0x363   : > { %5478 = vmatmul.mubr.bf16.gmra.mrb[8].mxu1 %v8583_v59  ;;  %v1943_v7 = vsel %vm7728_vm11, %v5023_v16, %v1942_v37  ;;  %v3469_v59 = vld [vmem:[#allocation2 + $0x18] sm:$0xf]  ;;  %v3471_v37 = vld [vmem:[#allocation2 + $0x20] sm:$0xf] }
 0x364   : > { %5494 = vmatpush3.bf16.msra.mxu1 %v6171_v11  ;;  %5481 = vmatprep.mubr.bf16.mxu1 %v5008_v35  ;;  %v1878_v11 = vld [vmem:[#allocation2 + $0x58] sm:$0xe]  ;;  %v5036_v0 = vcombine.low %v1939_v39, %v1943_v7  ;;  %v6239_v35 = vld [vmem:[#allocation2 + $0x54] sm:$0x1]  ;;  %v3514_v34 = vshrl.u32 %v3469_v59, 16  ;;  %v3517_v10 = vshll.u32 %v3469_v59, 16 }
 0x365   : > { %5495 = vmatprep.subr.bf16.mxu1 %v6174_v36  ;;  %5620 = vmatpush3.bf16.msra.mxu0 %v6169_v51  ;;  %v1950_v51 = vrot.slane %v6238_v31, 5  ;;  %v1954_v5 = vrot.slane %v6239_v35, 5  ;;  %v3475_v39 = vld [vmem:[#allocation2 + $0x30] sm:$0xf]  ;;  %v6193_v7 = vld [vmem:[#allocation11 + $0x1d8] sm:$0xff]   ;;  %v3528_v17 = vshrl.u32 %v3471_v37, 16 }
 0x366   : > { %5621 = vmatprep.subr.bf16.mxu0 %v6172_v24  ;;  %v3516_v38 = vrot.slane %v3514_v34, 4  ;;  %v3519_v16 = vrot.slane %v3517_v10, 5  ;;  %v3559_v31 = vshll.u32 %v3475_v39, 16  ;;  %v6200_v59 = vld [vmem:[#allocation11 + $0xf0] sm:$0xff]   ;;  %v6199_v34 = vld [vmem:[#allocation11 + $0x1e8] sm:$0xff]  }
 0x367   : > { %5606 = vmatmul.mubr.bf16.gmra.mrb[8].mxu0 %v5103_v2  ;;  %v1951_v56 = vsel %vm7728_vm11, %v5025_v6, %v1950_v51  ;;  %v1955_v2 = vsel %vm7728_vm11, %v5026_v18, %v1954_v5  ;;  %v3556_v6 = vshrl.u32 %v3475_v39, 16  ;;  %v6196_v5 = vld [vmem:[#allocation11 + $0x1e0] sm:$0xff]  }
 0x368   : > { %5496 = vmatpush3.bf16.msra.mxu1 %v6174_v36  ;;  %5609 = vmatprep.mubr.bf16.mxu0 %v5104_v54  ;;  %v5027_v36 = vrot.slane %v1878_v11, 9  ;;  %v6187_v54 = vld [vmem:[#allocation11 + $0x1c8] sm:$0xff]   ;;  %v3477_v11 = vld [vmem:[#allocation2 + $0x38] sm:$0xf]  ;;  %v3561_v40 = vrot.slane %v3559_v31, 5 }
 0x369   : > { %5497 = vmatprep.subr.bf16.mxu1 %v6177_v20  ;;  %5622 = vmatpush3.bf16.msra.mxu0 %v6172_v24  ;;  %v3467_v24 = vld [vmem:[#allocation2 + $0x10] sm:$0xf]  ;;  %v3570_v18 = vshrl.u32 %v3477_v11, 16  ;;  %v3573_v35 = vshll.u32 %v3477_v11, 16 }
 0x36a   : > { %5623 = vmatprep.subr.bf16.mxu0 %v6175_v58  ;;  %v1959_v25 = vsel %vm7728_vm11, %v5027_v36, %v1958_v28  ;;  %v3530_v28 = vrot.slane %v3528_v17, 4  ;;  %v6206_v10 = vld [vmem:[#allocation2 + $0x8] ss:$8 sps:$4 sm:$0xff]  }
 0x36b   : > { %5482 = vmatmul.mubr.bf16.gmra.mrb[12].mxu1 %v5009_v41  ;;  %v5038_v29 = vcombine.low %v1955_v2, %v1959_v25  ;;  %v7943_v41 = vld [vmem:[#allocation2 + $0x14] sm:$0x1]  ;;  %v6201_v25 = vld [vmem:[#allocation2 + $0x80] ss:$8 sps:$4 sm:$0xff]   ;;  %v3572_v53 = vrot.slane %v3570_v18, 4 }
 0x36c   : > { %5498 = vmatpush3.bf16.msra.mxu1 %v6177_v20  ;;  %5501 = vmatprep.mubr.bf16.mxu1 %v5034_v63  ;;  %v1946_v63 = vrot.slane %v6237_v60, 5  ;;  %v3503_v20 = vshll.u32 %v3467_v24, 16  ;;  %v3509_v22 = vshll.u32 %v7943_v41, 16  ;;  %v7958_v2 = vld [vmem:[#allocation2 + $0x34] sm:$0x1] }
 0x36d   : > { %5499 = vmatprep.subr.bf16.mxu1 %v6180_v52  ;;  %5624 = vmatpush3.bf16.msra.mxu0 %v6175_v58  ;;  %v6190_v58 = vld [vmem:[#allocation11 + $0x1d0] sm:$0xff]  }
 0x36e   : > { %5625 = vmatprep.subr.bf16.mxu0 %v6178_v33  ;;  %v1947_v62 = vsel %vm7728_vm11, %v5024_v43, %v1946_v63  ;;  %v3505_v61 = vrot.slane %v3503_v20, 5  ;;  %v3531_v43 = vshll.u32 %v3471_v37, 16  ;;  %v7951_v63 = vld [vmem:[#allocation2 + $0x2c] sm:$0x1]  ;;  %v3511_v51 = vrot.slane %v3509_v22, 5  ;;  %v6204_v22 = vld [vmem:[#allocation11 + $0xf8] sm:$0xff]  }
 0x36f   : > { %5610 = vmatmul.mubr.bf16.gmra.mrb[12].mxu0 %v5105_v45  ;;  %v5037_v9 = vcombine.low %v1947_v62, %v1951_v56  ;;  %v3479_v20 = vld [vmem:[#allocation2 + $0x40] sm:$0xf]  ;;  %v7975_v37 = vld [vmem:[#allocation2 + $0x44] sm:$0x1] }
 0x370   : > { %5500 = vmatpush3.bf16.msra.mxu1 %v6180_v52  ;;  %5629 = vmatprep.mubr.bf16.mxu0 %v6183_v27  ;;  %v7945_v52 = vld [vmem:[#allocation2 + $0x1c] sm:$0x1]  ;;  %v3520_v27 = vor.u32 %v3519_v16, %v3516_v38  ;;  %v3533_v62 = vrot.slane %v3531_v43, 5  ;;  %v3485_v38 = vld [vmem:[#allocation2 + $0x68] sm:$0xf] }
 0x371   : > { %5517 = vmatprep.subr.bf16.mxu1 %v6182_v3  ;;  %5626 = vmatpush3.bf16.msra.mxu0 %v6178_v33  ;;  %v3473_v33 = vld [vmem:[#allocation2 + $0x28] sm:$0xf]  ;;  %v3523_v45 = vshll.u32 %v7945_v52, 16  ;;  %v3629_v43 = vshll.u32 %v3485_v38, 16 }
 0x372   : > { %5627 = vmatprep.subr.bf16.mxu0 %v6181_v49  ;;  %v3545_v60 = vshll.u32 %v3473_v33, 16  ;;  %v3521_v13 = vrot.slane %v3520_v27, 4  ;;  %v7977_v27 = vld [vmem:[#allocation2 + $0x4c] sm:$0x1] }
 0x373   : > { %5502 = vmatmul.mubr.bf16.vlgmr.msra.gmra.mrb[0].mxu1 %v5035_v15  ;;  %v3500_v15 = vshrl.u32 %v3467_v24, 16  ;;  %v6197_v24 = vld [vmem:[#allocation2 + $0x70] ss:$8 sps:$4 sm:$0xff]  }
 0x374   : > { %5518 = vmatpush3.bf16.msra.mxu1 %v6182_v3  ;;  %5505 = vmatprep.mubr.bf16.mxu1 %v5036_v0  ;;  %v7949_v3 = vld [vmem:[#allocation2 + $0x24] sm:$0x1]  ;;  %v3542_v0 = vshrl.u32 %v3473_v33, 16  ;;  %v6202_v33 = vld [vmem:[#allocation11 + $0x1f0] sm:$0xff]  }
 0x375   : > { %5519 = vmatprep.subr.bf16.mxu1 %v6186_v30  ;;  %5628 = vmatpush3.bf16.msra.mxu0 %v6181_v49  ;;  %v3502_v1 = vrot.slane %v3500_v15, 4  ;;  %v6198_v49 = vld [vmem:[#allocation11 + $0xe8] sm:$0xff]   ;;  %v3558_v15 = vrot.slane %v3556_v6, 4 }
 0x376   : > { %5645 = vmatprep.subr.bf16.mxu0 %v6184_v47  ;;  %v3544_v56 = vrot.slane %v3542_v0, 4  ;;  %v6203_v0 = vld [vmem:[#allocation2 + $0x90] ss:$8 sps:$4 sm:$0xff]  }
 0x377   : > { %v3506_v23 = vor.u32 %v3505_v61, %v3502_v1  ;;  %v3565_v1 = vshll.u32 %v7958_v2, 16  ;;  %v3483_v61 = vld [vmem:[#allocation2 + $0x60] sm:$0xf]  ;;  %v3562_v16 = vor.u32 %v3561_v40, %v3558_v15 }
 0x378   : > { %5520 = vmatpush3.bf16.msra.mxu1 %v6186_v30  ;;  %5630 = vmatmul.mubr.bf16.vlgmr.msra.gmra.mrb[0].mxu0 %v6185_v32  ;;  %v3525_v30 = vrot.slane %v3523_v45, 5  ;;  %v3547_v32 = vrot.slane %v3545_v60, 5  ;;  %v3612_v17 = vshrl.u32 %v3483_v61, 16  ;;  %v3615_v11 = vshll.u32 %v3483_v61, 16  ;;  %v7982_v60 = vld [vmem:[#allocation11 + $0x200] sm:$0xff]   ;;  %v6205_v15 = vld [vmem:[#allocation11 + $0x1f8] sm:$0xff]  }
 0x379   : > { %5521 = vmatprep.subr.bf16.mxu1 %v6188_v12  ;;  %5646 = vmatpush3.bf16.msra.mxu0 %v6184_v47  ;;  %v3507_v36 = vrot.slane %v3506_v23, 4  ;;  %v3537_v47 = vshll.u32 %v7949_v3, 16  ;;  %v3601_v23 = vshll.u32 %v3481_v57, 16  ;;  %v3563_v18 = vrot.slane %v3562_v16, 4 }
 0x37a   : > { %5633 = vmatprep.mubr.bf16.mxu0 %v6189_v44  ;;  %5647 = vmatprep.subr.bf16.mxu0 %v6187_v54  ;;  %v7963_v44 = vld [vmem:[#allocation2 + $0x3c] sm:$0x1] }
 0x37b   : > { %5506 = vmatmul.mubr.bf16.gmra.mrb[4].mxu1 %v5037_v9  ;;  %v3512_v9 = vsel %vm7396_vm8, %v3507_v36, %v3511_v51  ;;  %v7969_v8 = vrot.slane %v3537_v47, 5  ;;  %v7988_v51 = vrot.slane %v3565_v1, 5  ;;  %v3607_v47 = vshll.u32 %v7977_v27, 16 }
 0x37c   : > { %5522 = vmatpush3.bf16.msra.mxu1 %v6188_v12  ;;  %5509 = vmatprep.mubr.bf16.mxu1 %v5038_v29  ;;  %v3551_v12 = vshll.u32 %v7951_v63, 16  ;;  %v3548_v29 = vor.u32 %v3547_v32, %v3544_v56  ;;  %v7992_v56 = vld [vmem:[#allocation2 + $0x64] sm:$0x1]  ;;  %v3614_v32 = vrot.slane %v3612_v17, 4  ;;  %v8019_v17 = vld [vmem:[#allocation11 + $0x210] sm:$0xff]  }
 0x37d   : > { %5523 = vmatprep.subr.bf16.mxu1 %v6192_v55  ;;  %5648 = vmatpush3.bf16.msra.mxu0 %v6187_v54  ;;  %v3621_v16 = vshll.u32 %v7992_v56, 16 }
 0x37e   : > { %5649 = vmatprep.subr.bf16.mxu0 %v6190_v58  ;;  %v7986_v31 = vrot.slane %v3548_v29, 4  ;;  %v8010_v29 = vld [vmem:[#allocation11 + $0x208] sm:$0xff]  }
 0x380   : > { %5524 = vmatpush3.bf16.msra.mxu1 %v6192_v55  ;;  %5634 = vmatmul.mubr.bf16.gmra.mrb[4].mxu0 %v6191_v42  ;;  %v3526_v55 = vsel %vm7396_vm8, %v3521_v13, %v3525_v30  ;;  %v3584_v42 = vshrl.u32 %v3479_v20, 16  ;;  %v3593_v30 = vshll.u32 %v7975_v37, 16  ;;  %v3487_v13 = vld [vmem:[#allocation2 + $0x70] sm:$0xf] }
 0x381   : > { %5525 = vmatprep.subr.bf16.mxu1 %v6194_v48  ;;  %5650 = vmatpush3.bf16.msra.mxu0 %v6190_v58  ;;  %v7971_v58 = vrot.slane %v3551_v12, 5  ;;  %v5130_v45 = vcombine.low %v3512_v9, %v3526_v55  ;;  %v3568_v9 = vsel %vm7396_vm8, %v3563_v18, %v7988_v51  ;;  %v8024_v18 = vld [vmem:[#allocation2 + $0x7c] sm:$0x1] }
 0x382   : > { %5637 = vmatprep.mubr.bf16.mxu0 %v6195_v4  ;;  %5651 = vmatprep.subr.bf16.mxu0 %v6193_v7  ;;  %v3587_v4 = vshll.u32 %v3479_v20, 16  ;;  %v3640_v20 = vshrl.u32 %v3487_v13, 16 }
 0x383   : > { %5510 = vmatmul.mubr.bf16.gmra.mrb[8].mxu1 %v5039_v26  ;;  %v3575_v26 = vrot.slane %v3573_v35, 5 }
 0x384   : > { %5526 = vmatpush3.bf16.msra.mxu1 %v6194_v48  ;;  %5513 = vmatprep.mubr.bf16.mxu1 %v5040_v50  ;;  %v3534_v50 = vor.u32 %v3533_v62, %v3530_v28  ;;  %v3579_v48 = vshll.u32 %v7963_v44, 16  ;;  %v3589_v36 = vrot.slane %v3587_v4, 5  ;;  %v3603_v28 = vrot.slane %v3601_v23, 5  ;;  %v6210_v62 = vld [vmem:[#allocation2 + $0x28] ss:$8 sps:$4 sm:$0xff]  }
 0x385   : > { %5527 = vmatprep.subr.bf16.mxu1 %v6198_v49  ;;  %5652 = vmatpush3.bf16.msra.mxu0 %v6193_v7  ;;  %v3576_v39 = vor.u32 %v3575_v26, %v3572_v53  ;;  %v3598_v7 = vshrl.u32 %v3481_v57, 16  ;;  %v7998_v53 = vrot.slane %v3593_v30, 5  ;;  %v8000_v26 = vld [vmem:[#allocation2 + $0x6c] sm:$0x1]  ;;  %v8022_v30 = vld [vmem:[#allocation2 + $0x74] sm:$0x1] }
 0x386   : > { %5653 = vmatprep.subr.bf16.mxu0 %v6196_v5  ;;  %v7984_v6 = vrot.slane %v3534_v50, 4  ;;  %v3581_v35 = vrot.slane %v3579_v48, 5  ;;  %v3491_v50 = vld [vmem:[#allocation2 + $0x80] sm:$0xf]  ;;  %v3635_v4 = vshll.u32 %v8000_v26, 16 }
 0x387   : > { %v3577_v46 = vrot.slane %v3576_v39, 4  ;;  %v3671_v39 = vshll.u32 %v3491_v50, 16 }
 0x388   : > { %5528 = vmatpush3.bf16.msra.mxu1 %v6198_v49  ;;  %5638 = vmatmul.mubr.bf16.gmra.mrb[8].mxu0 %v6197_v24  ;;  %v3626_v49 = vshrl.u32 %v3485_v38, 16  ;;  %v3489_v24 = vld [vmem:[#allocation2 + $0x78] sm:$0xf]  ;;  %v3540_v40 = vsel %vm7396_vm8, %v7984_v6, %v7969_v8  ;;  %v3493_v8 = vld [vmem:[#allocation2 + $0x88] sm:$0xf]  ;;  %v8012_v38 = vrot.slane %v3607_v47, 5 }
 0x389   : > { %5529 = vmatprep.subr.bf16.mxu1 %v6200_v59  ;;  %5654 = vmatpush3.bf16.msra.mxu0 %v6196_v5  ;;  %v3586_v5 = vrot.slane %v3584_v42, 4  ;;  %v3654_v55 = vshrl.u32 %v3489_v24, 16  ;;  %v3657_v57 = vshll.u32 %v3489_v24, 16  ;;  %v3685_v23 = vshll.u32 %v3493_v8, 16  ;;  %v6212_v6 = vld [vmem:[#allocation2 + $0x38] ss:$8 sps:$4 sm:$0xff]  }
 0x38a   : > { %5641 = vmatprep.mubr.bf16.mxu0 %v6201_v25  ;;  %5655 = vmatprep.subr.bf16.mxu0 %v6199_v34  ;;  %v3628_v12 = vrot.slane %v3626_v49, 4  ;;  %v3631_v25 = vrot.slane %v3629_v43, 5 }
 0x38b   : > { %5514 = vmatmul.mubr.bf16.gmra.mrb[12].mxu1 %v5041_v19  ;;  %v3600_v19 = vrot.slane %v3598_v7, 4  ;;  %v3590_v1 = vor.u32 %v3589_v36, %v3586_v5  ;;  %v3682_v7 = vshrl.u32 %v3493_v8, 16  ;;  %v3659_v49 = vrot.slane %v3657_v57, 5 }
 0x38c   : > { %5530 = vmatpush3.bf16.msra.mxu1 %v6200_v59  ;;  %5533 = vmatprep.mubr.bf16.mxu1 %v6206_v10  ;;  %v3617_v59 = vrot.slane %v3615_v11, 5  ;;  %v3554_v10 = vsel %vm7396_vm8, %v7986_v31, %v7971_v58  ;;  %v3582_v58 = vsel %vm7396_vm8, %v3577_v46, %v3581_v35  ;;  %v3632_v42 = vor.u32 %v3631_v25, %v3628_v12  ;;  %v6214_v35 = vld [vmem:[#allocation2 + $0x58] ss:$8 sps:$4 sm:$0xff]   ;;  %v3495_v46 = vld [vmem:[#allocation2 + $0x90] sm:$0xf] }
 0x38d   : > { %5531 = vmatprep.subr.bf16.mxu1 %v6204_v22  ;;  %5656 = vmatpush3.bf16.msra.mxu0 %v6199_v34  ;;  %v3643_v34 = vshll.u32 %v3487_v13, 16  ;;  %v3604_v61 = vor.u32 %v3603_v28, %v3600_v19  ;;  %v3656_v11 = vrot.slane %v3654_v55, 4  ;;  %v5131_v43 = vcombine.low %v3540_v40, %v3554_v10  ;;  %v8032_v40 = vld [vmem:[#allocation2 + $0x8c] sm:$0x1]  ;;  %v8041_v10 = vld [vmem:[#allocation11 + $0x218] sm:$0xff]  }
 0x38e   : > { %5657 = vmatprep.subr.bf16.mxu0 %v6202_v33  ;;  %v3618_v48 = vor.u32 %v3617_v59, %v3614_v32  ;;  %v3591_v31 = vrot.slane %v3590_v1, 4  ;;  %v3623_v36 = vrot.slane %v3621_v16, 5  ;;  %v3633_v13 = vrot.slane %v3632_v42, 4 }
 0x38f   : > { %v3605_v51 = vrot.slane %v3604_v61, 4  ;;  %v3673_v28 = vrot.slane %v3671_v39, 5  ;;  %v3684_v47 = vrot.slane %v3682_v7, 4  ;;  %v3687_v24 = vrot.slane %v3685_v23, 5  ;;  %v8055_v39 = vld [vmem:[#allocation2 + $0x94] sm:$0x1] }
 0x390   : > { %5532 = vmatpush3.bf16.msra.mxu1 %v6204_v22  ;;  %5642 = vmatmul.mubr.bf16.gmra.mrb[12].mxu0 %v6203_v0  ;;  %v3668_v22 = vshrl.u32 %v3491_v50, 16  ;;  %v5132_v0 = vcombine.low %v3568_v9, %v3582_v58  ;;  %v3619_v5 = vrot.slane %v3618_v48, 4  ;;  %v3649_v59 = vshll.u32 %v8022_v30, 16  ;;  %v8057_v7 = vld [vmem:[#allocation2 + $0x9c] sm:$0x1] }
 0x391   : > { %5757 = vmatprep.subr.bf16.mxu1 %v7982_v60  ;;  %5658 = vmatpush3.bf16.msra.mxu0 %v6202_v33  ;;  %v3642_v33 = vrot.slane %v3640_v20, 4  ;;  %v3660_v12 = vor.u32 %v3659_v49, %v3656_v11  ;;  %v3663_v25 = vshll.u32 %v8024_v18, 16  ;;  %v3596_v20 = vsel %vm7396_vm8, %v3591_v31, %v7998_v53  ;;  %v8061_v31 = vld [vmem:[#allocation11 + $0x228] sm:$0xff]  }
 0x392   : > { %5661 = vmatprep.mubr.bf16.mxu0 %v5130_v45  ;;  %5659 = vmatprep.subr.bf16.mxu0 %v6205_v15  ;;  %v3645_v45 = vrot.slane %v3643_v34, 5  ;;  %v3670_v19 = vrot.slane %v3668_v22, 4  ;;  %v3610_v34 = vsel %vm7396_vm8, %v3605_v51, %v8012_v38  ;;  %v3696_v9 = vshrl.u32 %v3495_v46, 16 }
 0x393   : > { %5534 = vmatmul.mubr.bf16.vlgmr.msra.gmra.mrb[0].mxu1 %v6208_v14  ;;  %v3637_v14 = vrot.slane %v3635_v4, 5  ;;  %v3699_v55 = vshll.u32 %v3495_v46, 16  ;;  %v3624_v57 = vsel %vm7396_vm8, %v3619_v5, %v3623_v36  ;;  %v3688_v38 = vor.u32 %v3687_v24, %v3684_v47  ;;  %v3934_v47 = vld [vmem:[#allocation2 + $0x18] sm:$0xe] }
 0x394   : > { %5765 = vmatpush3.bf16.msra.mxu1 %v7982_v60  ;;  %5537 = vmatprep.mubr.bf16.mxu1 %v6210_v62  ;;  %v3497_v62 = vld [vmem:[#allocation2 + $0x98] sm:$0xf]  ;;  %v3646_v32 = vor.u32 %v3645_v45, %v3642_v33  ;;  %v3674_v53 = vor.u32 %v3673_v28, %v3670_v19  ;;  %v3691_v16 = vshll.u32 %v8032_v40, 16  ;;  %v3651_v48 = vrot.slane %v3649_v59, 5  ;;  %v3933_v28 = vld [vmem:[#allocation2 + $0x10] sm:$0xe] }
 0x395   : > { %5758 = vmatprep.subr.bf16.mxu1 %v8010_v29  ;;  %5660 = vmatpush3.bf16.msra.mxu0 %v6205_v15  ;;  %v8030_v15 = vld [vmem:[#allocation2 + $0x84] sm:$0x1]  ;;  %v3638_v50 = vsel %vm7396_vm8, %v3633_v13, %v3637_v14  ;;  %v3710_v8 = vshrl.u32 %v3497_v62, 16  ;;  %v3713_v1 = vshll.u32 %v3497_v62, 16  ;;  %v3661_v42 = vrot.slane %v3660_v12, 4 }
 0x396   : > { %5677 = vmatprep.subr.bf16.mxu0 %v7982_v60  ;;  %v3677_v61 = vshll.u32 %v8030_v15, 16  ;;  %v3647_v58 = vrot.slane %v3646_v32, 4  ;;  %v3665_v4 = vrot.slane %v3663_v25, 5  ;;  %v5133_v22 = vcombine.low %v3596_v20, %v3610_v34  ;;  %v6218_v14 = vld [vmem:[#allocation2 + $0x78] ss:$8 sps:$4 sm:$0xff]  }
 0x397   : > { %v3698_v23 = vrot.slane %v3696_v9, 4  ;;  %v3701_v33 = vrot.slane %v3699_v55, 5  ;;  %v5134_v45 = vcombine.low %v3624_v57, %v3638_v50  ;;  %v3712_v11 = vrot.slane %v3710_v8, 4 }
 0x398   : > { %5766 = vmatpush3.bf16.msra.mxu1 %v8010_v29  ;;  %5662 = vmatmul.mubr.bf16.vlgmr.msra.gmra.mrb[0].mxu0 %v5131_v43  ;;  %v3715_v49 = vrot.slane %v3713_v1, 5  ;;  %v3941_v43 = vld [vmem:[#allocation2 + $0x60] sm:$0xe]  ;;  %v3675_v51 = vrot.slane %v3674_v53, 4  ;;  %v3689_v5 = vrot.slane %v3688_v38, 4  ;;  %v3693_v36 = vrot.slane %v3691_v16, 5 }
 0x399   : > { %5759 = vmatprep.subr.bf16.mxu1 %v8019_v17  ;;  %5678 = vmatpush3.bf16.msra.mxu0 %v7982_v60  ;;  %v8052_v60 = vld [vmem:[#allocation11 + $0x220] sm:$0xff]   ;;  %v3652_v13 = vsel %vm7396_vm8, %v3647_v58, %v3651_v48  ;;  %v3705_v46 = vshll.u32 %v8055_v39, 16  ;;  %v3719_v19 = vshll.u32 %v8057_v7, 16  ;;  %v5154_v24 = vrot.slane %v3941_v43, 9  ;;  %v3945_v48 = vld [vmem:[#allocation2 + $0x80] sm:$0xe] }
 0x39a   : > { %5665 = vmatprep.mubr.bf16.mxu0 %v5132_v0  ;;  %5679 = vmatprep.subr.bf16.mxu0 %v8010_v29  ;;  %v3942_v0 = vld [vmem:[#allocation2 + $0x68] sm:$0xe]  ;;  %v4015_v62 = vrot.slane %v7992_v56, 5  ;;  %v4019_v59 = vrot.slane %v8000_v26, 5  ;;  %v3702_v12 = vor.u32 %v3701_v33, %v3698_v23  ;;  %v3716_v25 = vor.u32 %v3715_v49, %v3712_v11  ;;  %v8081_v26 = vld [vmem:[#allocation11 + $0x230] sm:$0xff]   ;;  %v8096_v33 = vld [vmem:[#allocation11 + $0x238] sm:$0xff]  }
 0x39b   : > { %5538 = vmatmul.mubr.bf16.gmra.mrb[4].mxu1 %v6212_v6  ;;  %v6216_v6 = vld [vmem:[#allocation2 + $0x68] ss:$8 sps:$4 sm:$0xff]   ;;  %v5155_v32 = vrot.slane %v3942_v0, 9  ;;  %v3694_v34 = vsel %vm7396_vm8, %v3689_v5, %v3693_v36  ;;  %v5146_v9 = vrot.slane %v3933_v28, 9  ;;  %v3983_v56 = vrot.slane %v7943_v41, 5 }
 0x39c   : > { %5767 = vmatpush3.bf16.msra.mxu1 %v8019_v17  ;;  %5541 = vmatprep.mubr.bf16.mxu1 %v6214_v35  ;;  %v3679_v35 = vrot.slane %v3677_v61, 5  ;;  %v3987_v57 = vrot.slane %v7945_v52, 5  ;;  %v3707_v50 = vrot.slane %v3705_v46, 5  ;;  %v3721_v8 = vrot.slane %v3719_v19, 5  ;;  %v3943_v41 = vld [vmem:[#allocation2 + $0x70] sm:$0xe] }
 0x39d   : > { %5760 = vmatprep.subr.bf16.mxu1 %v8041_v10  ;;  %5680 = vmatpush3.bf16.msra.mxu0 %v8010_v29  ;;  %v3666_v29 = vsel %vm7396_vm8, %v3661_v42, %v3665_v4  ;;  %v4016_v1 = vsel %vm7728_vm11, %v5154_v24, %v4015_v62  ;;  %v4020_v53 = vsel %vm7728_vm11, %v5155_v32, %v4019_v59  ;;  %v3944_v61 = vld [vmem:[#allocation2 + $0x78] sm:$0xe]  ;;  %v3703_v16 = vrot.slane %v3702_v12, 4  ;;  %v3946_v42 = vld [vmem:[#allocation2 + $0x88] sm:$0xe] }
 0x39e   : > { %5681 = vmatprep.subr.bf16.mxu0 %v8019_v17  ;;  %v3680_v20 = vsel %vm7396_vm8, %v3675_v51, %v3679_v35  ;;  %v5135_v55 = vcombine.low %v3652_v13, %v3666_v29  ;;  %v3717_v58 = vrot.slane %v3716_v25, 4  ;;  %v4023_v52 = vrot.slane %v8022_v30, 5  ;;  %v3935_v30 = vld [vmem:[#allocation2 + $0x20] sm:$0xe]  ;;  %v3936_v5 = vld [vmem:[#allocation2 + $0x28] sm:$0xe] }
 0x39f   : > { %v5136_v38 = vcombine.low %v3680_v20, %v3694_v34  ;;  %v4027_v4 = vrot.slane %v8024_v18, 5  ;;  %v3984_v23 = vsel %vm7728_vm11, %v5146_v9, %v3983_v56  ;;  %v5156_v11 = vrot.slane %v3943_v41, 9  ;;  %v3937_v36 = vld [vmem:[#allocation2 + $0x30] sm:$0xe]  ;;  %v3938_v29 = vld [vmem:[#allocation2 + $0x38] sm:$0xe] }
 0x3a0   : > { %5768 = vmatpush3.bf16.msra.mxu1 %v8041_v10  ;;  %5666 = vmatmul.mubr.bf16.gmra.mrb[4].mxu0 %v5133_v22  ;;  %v6220_v22 = vld [vmem:[#allocation2 + $0x88] ss:$8 sps:$4 sm:$0xff]   ;;  %v5157_v49 = vrot.slane %v3944_v61, 9  ;;  %v5158_v43 = vrot.slane %v3945_v48, 9  ;;  %v4031_v18 = vrot.slane %v8030_v15, 5  ;;  %v5159_v0 = vrot.slane %v3946_v42, 9 }
 0x3a1   : > { %5761 = vmatprep.subr.bf16.mxu1 %v8052_v60  ;;  %5682 = vmatpush3.bf16.msra.mxu0 %v8019_v17  ;;  %v5147_v17 = vrot.slane %v3934_v47, 9  ;;  %v3708_v51 = vsel %vm7396_vm8, %v3703_v16, %v3707_v50  ;;  %v3722_v35 = vsel %vm7396_vm8, %v3717_v58, %v3721_v8  ;;  %v5148_v13 = vrot.slane %v3935_v30, 9  ;;  %v3948_v47 = vld [vmem:[#allocation2 + $0x98] sm:$0xe] }
 0x3a2   : > { %5669 = vmatprep.mubr.bf16.mxu0 %v5134_v45  ;;  %5683 = vmatprep.subr.bf16.mxu0 %v8041_v10  ;;  %v5166_v45 = vcombine.low %v4016_v1, %v4020_v53  ;;  %v5137_v54 = vcombine.low %v3708_v51, %v3722_v35  ;;  %v3991_v46 = vrot.slane %v7949_v3, 5  ;;  %v4032_v19 = vsel %vm7728_vm11, %v5158_v43, %v4031_v18 }
 0x3a3   : > { %5542 = vmatmul.mubr.bf16.gmra.mrb[8].mxu1 %v6216_v6  ;;  %v4035_v6 = vrot.slane %v8032_v40, 5  ;;  %v4024_v40 = vsel %vm7728_vm11, %v5156_v11, %v4023_v52  ;;  %v5149_v24 = vrot.slane %v3936_v5, 9  ;;  %v3995_v62 = vrot.slane %v7951_v63, 5 }
 0x3a4   : > { %5769 = vmatpush3.bf16.msra.mxu1 %v8052_v60  ;;  %5545 = vmatprep.mubr.bf16.mxu1 %v6218_v14  ;;  %v3947_v14 = vld [vmem:[#allocation2 + $0x90] sm:$0xe]  ;;  %v5150_v32 = vrot.slane %v3937_v36, 9  ;;  %v3999_v59 = vrot.slane %v7958_v2, 5  ;;  %v5151_v25 = vrot.slane %v3938_v29, 9  ;;  %v4003_v3 = vrot.slane %v7963_v44, 5 }
 0x3a5   : > { %5762 = vmatprep.subr.bf16.mxu1 %v8061_v31  ;;  %5684 = vmatpush3.bf16.msra.mxu0 %v8041_v10  ;;  %v3988_v10 = vsel %vm7728_vm11, %v5147_v17, %v3987_v57  ;;  %v4036_v28 = vsel %vm7728_vm11, %v5159_v0, %v4035_v6  ;;  %v5160_v20 = vrot.slane %v3947_v14, 9  ;;  %v4039_v9 = vrot.slane %v8055_v39, 5  ;;  %v3939_v44 = vld [vmem:[#allocation2 + $0x40] sm:$0xe] }
 0x3a6   : > { %5685 = vmatprep.subr.bf16.mxu0 %v8052_v60  ;;  %v5162_v15 = vcombine.low %v3984_v23, %v3988_v10  ;;  %v5168_v34 = vcombine.low %v4032_v19, %v4036_v28  ;;  %v5161_v56 = vrot.slane %v3948_v47, 9  ;;  %v3992_v63 = vsel %vm7728_vm11, %v5148_v13, %v3991_v46 }
 0x3a7   : > { %v3996_v2 = vsel %vm7728_vm11, %v5149_v24, %v3995_v62  ;;  %v4000_v39 = vsel %vm7728_vm11, %v5150_v32, %v3999_v59  ;;  %v5152_v50 = vrot.slane %v3939_v44, 9  ;;  %v4007_v1 = vrot.slane %v7975_v37, 5 }
 0x3a8   : > { %5770 = vmatpush3.bf16.msra.mxu1 %v8061_v31  ;;  %5670 = vmatmul.mubr.bf16.gmra.mrb[8].mxu0 %v5135_v55  ;;  %v3940_v55 = vld [vmem:[#allocation2 + $0x48] sm:$0xe]  ;;  %v5163_v57 = vcombine.low %v3992_v63, %v3996_v2  ;;  %v4011_v41 = vrot.slane %v7977_v27, 5 }
 0x3a9   : > { %5763 = vmatprep.subr.bf16.mxu1 %v8081_v26  ;;  %5686 = vmatpush3.bf16.msra.mxu0 %v8052_v60  ;;  %v4028_v60 = vsel %vm7728_vm11, %v5157_v49, %v4027_v4  ;;  %v5153_v53 = vrot.slane %v3940_v55, 9 }
 0x3aa   : > { %5673 = vmatprep.mubr.bf16.mxu0 %v5136_v38  ;;  %5687 = vmatprep.subr.bf16.mxu0 %v8061_v31  ;;  %v5167_v12 = vcombine.low %v4024_v40, %v4028_v60  ;;  %v4008_v38 = vsel %vm7728_vm11, %v5152_v50, %v4007_v1 }
 0x3ab   : > { %5546 = vmatmul.mubr.bf16.gmra.mrb[12].mxu1 %v6220_v22  ;;  %v4012_v16 = vsel %vm7728_vm11, %v5153_v53, %v4011_v41 }
 0x3ac   : > { %5771 = vmatpush3.bf16.msra.mxu1 %v8081_v26  ;;  %5701 = vmatprep.mubr.bf16.mxu1 %v5166_v45  ;;  %v5165_v58 = vcombine.low %v4008_v38, %v4012_v16 }
 0x3ad   : > { %5764 = vmatprep.subr.bf16.mxu1 %v8096_v33  ;;  %5688 = vmatpush3.bf16.msra.mxu0 %v8061_v31  ;;  %v4043_v31 = vrot.slane %v8057_v7, 5  ;;  %v4004_v7 = vsel %vm7728_vm11, %v5151_v25, %v4003_v3 }
 0x3ae   : > { %5689 = vmatprep.subr.bf16.mxu0 %v8081_v26  ;;  %v5164_v8 = vcombine.low %v4000_v39, %v4004_v7 }
 0x3af   : > { %v4044_v17 = vsel %vm7728_vm11, %v5161_v56, %v4043_v31 }
 0x3b0   : > { %5772 = vmatpush3.bf16.msra.mxu1 %v8096_v33  ;;  %5674 = vmatmul.mubr.bf16.gmra.mrb[12].mxu0 %v5137_v54 }
 0x3b1   : > { %5690 = vmatpush3.bf16.msra.mxu0 %v8081_v26  ;;  %5693 = vmatprep.mubr.bf16.mxu0 %v5162_v15  ;;  %v4040_v26 = vsel %vm7728_vm11, %v5160_v20, %v4039_v9 }
 0x3b2   : > { %5691 = vmatprep.subr.bf16.mxu0 %v8096_v33  ;;  %v5169_v61 = vcombine.low %v4040_v26, %v4044_v17 }
 0x3b3   : > { %5702 = vmatmul.mubr.bf16.vlgmr.msra.gmra.mrb[16].mxu1 %v5167_v12 }
 0x3b4   : > { %5705 = vmatprep.mubr.bf16.mxu1 %v5168_v34 }
 0x3b5   : > { %5692 = vmatpush3.bf16.msra.mxu0 %v8096_v33 }
 0x3b8   : > { %5694 = vmatmul.mubr.bf16.vlgmr.msra.gmra.mrb[0].mxu0 %v5163_v57 }
 0x3b9   : > { %5697 = vmatprep.mubr.bf16.mxu0 %v5164_v8 }
 0x3bb   : > { %5706 = vmatmul.mubr.bf16.gmra.mrb[20].mxu1 %v5169_v61 }
 0x3c0   : > { %5698 = vmatmul.mubr.bf16.gmra.mrb[4].mxu0 %v5165_v58 }
 0x466   : > { %v5535_v48 = vpop.f32.mrb[0].mxu1 }
 0x467   : > { %v2357_v42 = vpop.f32.mrb[1].mxu1 }
 0x468   : > { %v5536_v52 = vpop.f32.mrb[2].mxu1 }
 0x469   : > { %v2360_v4 = vpop.f32.mrb[3].mxu1 }
 0x46e   : > { %v5539_v37 = vpop.f32.mrb[4].mxu1 }
 0x46f   : > { %v2373_v22 = vpop.f32.mrb[5].mxu1 }
 0x470   : > { %v5540_v23 = vpop.f32.mrb[6].mxu1 }
 0x471   : > { %v2376_v27 = vpop.f32.mrb[7].mxu1 }
 0x476   : > { %v5543_v33 = vpop.f32.mrb[8].mxu1 }
 0x477   : > { %v2389_v10 = vpop.f32.mrb[9].mxu1 }
 0x478   : > { %v5544_v45 = vpop.f32.mrb[10].mxu1 }
 0x479   : > { %v2392_v11 = vpop.f32.mrb[11].mxu1 }
 0x47b   : > { %v5671_v49 = vpop.f32.mrb[8].mxu0 }
 0x47c   : > { %v5781_v30 = vadd.f32 %v5671_v49, %v5543_v33  ;;  %v3886_v43 = vpop.f32.mrb[9].mxu0 }
 0x47d   : > { %v5783_v21 = vadd.f32 %v3886_v43, %v2389_v10  ;;  %v5672_v18 = vpop.f32.mrb[10].mxu0 }
 0x47e   : > { %v5547_v0 = vpop.f32.mrb[12].mxu1  ;;  %v5785_v6 = vadd.f32 %v5672_v18, %v5544_v45  ;;  %v3889_v51 = vpop.f32.mrb[11].mxu0 }
 0x47f   : > { %v2405_v35 = vpop.f32.mrb[13].mxu1  ;;  %v5787_v5 = vadd.f32 %v3889_v51, %v2392_v11 }
 0x480   : > { %v5548_v36 = vpop.f32.mrb[14].mxu1 }
 0x481   : > { %v2408_v15 = vpop.f32.mrb[15].mxu1 }
 0x483   : > { %v5675_v13 = vpop.f32.mrb[12].mxu0 }
 0x484   : > { %v5789_v40 = vadd.f32 %v5675_v13, %v5547_v0  ;;  %v3902_v60 = vpop.f32.mrb[13].mxu0 }
 0x485   : > { %v5791_v29 = vadd.f32 %v3902_v60, %v2405_v35  ;;  %v5676_v14 = vpop.f32.mrb[14].mxu0 }
 0x486   : > { %v5703_v54 = vpop.f32.mrb[16].mxu1  ;;  %v5793_v46 = vadd.f32 %v5676_v14, %v5548_v36  ;;  %v3905_v19 = vpop.f32.mrb[15].mxu0 }
 0x487   : > { %v8149_v28 = vadd.f32 %v5781_v30, %v5703_v54  ;;  %v4208_v47 = vpop.f32.mrb[17].mxu1  ;;  %v5795_v24 = vadd.f32 %v3905_v19, %v2408_v15 }
 0x488   : > { %v8151_v62 = vadd.f32 %v5783_v21, %v4208_v47  ;;  %v5704_v32 = vpop.f32.mrb[18].mxu1 }
 0x489   : > { %v8153_v59 = vadd.f32 %v5785_v6, %v5704_v32  ;;  %v4211_v12 = vpop.f32.mrb[19].mxu1 }
 0x48a   : > { %v8155_v25 = vadd.f32 %v5787_v5, %v4211_v12  ;;  %v4292_v5 = vmul.f32 (!%p5178_p3), %v8151_v62, %v8151_v62 }
 0x48b   : > { %v5695_v3 = vpop.f32.mrb[0].mxu0 }
 0x48c   : > { %v8157_v20 = vadd.f32 %v5695_v3, %v5535_v48  ;;  %v4176_v34 = vpop.f32.mrb[1].mxu0  ;;  %v4293_v13 = vmul.f32 (!%p5178_p3), %v8155_v25, %v8155_v25 }
 0x48d   : > { %v8159_v9 = vadd.f32 %v4176_v34, %v2357_v42  ;;  %v5696_v56 = vpop.f32.mrb[2].mxu0 }
 0x48e   : > { %v5707_v31 = vpop.f32.mrb[20].mxu1  ;;  %v8161_v63 = vadd.f32 %v5696_v56, %v5536_v52  ;;  %v4179_v2 = vpop.f32.mrb[3].mxu0 }
 0x48f   : > { %v8163_v44 = vadd.f32 %v5789_v40, %v5707_v31  ;;  %v4224_v39 = vpop.f32.mrb[21].mxu1  ;;  %v8165_v7 = vadd.f32 %v4179_v2, %v2360_v4  ;;  %v4284_v42 = vmul.f32 (!%p5178_p3), %v8159_v9, %v8159_v9 }
 0x490   : > { %v8167_v55 = vadd.f32 %v5791_v29, %v4224_v39  ;;  %v5708_v26 = vpop.f32.mrb[22].mxu1  ;;  %v4294_v29 = vmul.f32 (!%p5178_p3), %v8149_v28, %v8149_v28 }
 0x491   : > { %v8169_v17 = vadd.f32 %v5793_v46, %v5708_v26  ;;  %v4227_v57 = vpop.f32.mrb[23].mxu1  ;;  %4258 = sbr.rel (%p5178_p3) target bundleno = 1220 (0x4c4), region = 116  ;;  %v4260_v48 = vadd.f32 (!%p5178_p3), %v8165_v7, %v8159_v9  ;;  %v4285_v52 = vmul.f32 (!%p5178_p3), %v8165_v7, %v8165_v7  ;;  %v4295_v46 = vmul.f32 (!%p5178_p3), %v8153_v59, %v8153_v59 }
 0x492   : > { %v8171_v50 = vadd.f32 %v5795_v24, %v4227_v57  ;;  %v4296_v24 = vmul.f32 (!%p5178_p3), %v8167_v55, %v8167_v55  ;;  %v4298_v31 = vmul.f32 (!%p5178_p3), %v8163_v44, %v8163_v44 }
 0x493   : > { %v5699_v8 = vpop.f32.mrb[4].mxu0  ;;  %v4261_v4 = vadd.f32 (!%p5178_p3), %v8157_v20, %v4260_v48  ;;  %v4299_v26 = vmul.f32 (!%p5178_p3), %v8169_v17, %v8169_v17 }
 0x494   : > { %v8173_v1 = vadd.f32 %v5699_v8, %v5539_v37  ;;  %v4192_v53 = vpop.f32.mrb[5].mxu0  ;;  %v4286_v37 = vmul.f32 (!%p5178_p3), %v8157_v20, %v8157_v20  ;;  %v4297_v3 = vmul.f32 (!%p5178_p3), %v8171_v50, %v8171_v50 }
 0x495   : > { %v8175_v41 = vadd.f32 %v4192_v53, %v2373_v22  ;;  %v5700_v61 = vpop.f32.mrb[6].mxu0  ;;  %v4262_v22 = vadd.f32 (!%p5178_p3), %v8161_v63, %v4261_v4 }
 0x496   : > { %v8177_v38 = vadd.f32 %v5700_v61, %v5540_v23  ;;  %v4195_v16 = vpop.f32.mrb[7].mxu0  ;;  %v4287_v23 = vmul.f32 (!%p5178_p3), %v8161_v63, %v8161_v63  ;;  %v4290_v21 = vmul.f32 (!%p5178_p3), %v8173_v1, %v8173_v1 }
 0x497   : > { %v8179_v58 = vadd.f32 %v4195_v16, %v2376_v27  ;;  %v4300_v27 = vadd.f32 (!%p5178_p3), %v4285_v52, %v4284_v42  ;;  %v4263_v33 = vadd.f32 (!%p5178_p3), %v8175_v41, %v4262_v22  ;;  %v4288_v10 = vmul.f32 (!%p5178_p3), %v8175_v41, %v8175_v41 }
 0x498   : > { %v4291_v6 = vmul.f32 %v8177_v38, %v8177_v38 }
 0x499   : > { %v4301_v45 = vadd.f32 %v4300_v27, %v4286_v37  ;;  %v4264_v11 = vadd.f32 %v8179_v58, %v4263_v33  ;;  %v4289_v49 = vmul.f32 %v8179_v58, %v8179_v58 }
 0x49b   : > { %v4302_v30 = vadd.f32 %v4301_v45, %v4287_v23  ;;  %v4265_v43 = vadd.f32 %v8173_v1, %v4264_v11  ;;  %v4259_v23 = vld [vmem:[#allocation4] sm:$0x1]  ;;  %v4283_v11 = vld [vmem:[#allocation4 + $0x1] sm:$0x1] }
 0x49d   : > { %v4303_v18 = vadd.f32 %v4302_v30, %v4288_v10  ;;  %v4266_v0 = vadd.f32 %v8177_v38, %v4265_v43 }
 0x49f   : > { %v4304_v51 = vadd.f32 %v4303_v18, %v4289_v49  ;;  %v4267_v35 = vadd.f32 %v8151_v62, %v4266_v0 }
 0x4a1   : > { %v4305_v36 = vadd.f32 %v4304_v51, %v4290_v21  ;;  %v4268_v15 = vadd.f32 %v8155_v25, %v4267_v35 }
 0x4a3   : > { %v4306_v40 = vadd.f32 %v4305_v36, %v4291_v6  ;;  %v4269_v60 = vadd.f32 %v8149_v28, %v4268_v15 }
 0x4a5   : > { %v4307_v14 = vadd.f32 %v4306_v40, %v4292_v5  ;;  %v4270_v54 = vadd.f32 %v8153_v59, %v4269_v60 }
 0x4a7   : > { %v4308_v19 = vadd.f32 %v4307_v14, %v4293_v13  ;;  %v4271_v47 = vadd.f32 %v8167_v55, %v4270_v54 }
 0x4a9   : > { %v4309_v32 = vadd.f32 %v4308_v19, %v4294_v29  ;;  %v4272_v12 = vadd.f32 %v8171_v50, %v4271_v47 }
 0x4ab   : > { %v4310_v34 = vadd.f32 %v4309_v32, %v4295_v46  ;;  %v4273_v56 = vadd.f32 %v8163_v44, %v4272_v12 }
 0x4ad   : > { %v4311_v2 = vadd.f32 %v4310_v34, %v4296_v24  ;;  %v4274_v39 = vadd.f32 %v8169_v17, %v4273_v56 }
 0x4af   : > { %v4312_v57 = vadd.f32 %v4311_v2, %v4297_v3  ;;  %v4275_v8 = vrot.slane %v4274_v39, 4 }
 0x4b1   : > { %v4313_v53 = vadd.f32 %v4312_v57, %v4298_v31  ;;  %v4276_v61 = vadd.f32 %v4275_v8, %v4274_v39 }
 0x4b3   : > { %v4314_v16 = vadd.f32 %v4313_v53, %v4299_v26  ;;  %v4277_v48 = vrot.slane %v4276_v61, 2 }
 0x4b5   : > { %v4315_v42 = vrot.slane %v4314_v16, 4  ;;  %v4278_v52 = vadd.f32 %v4277_v48, %v4276_v61 }
 0x4b7   : > { %v4316_v4 = vadd.f32 %v4315_v42, %v4314_v16  ;;  %v4279_v37 = vrot.slane %v4278_v52, 1 }
 0x4b9   : > { %v4317_v22 = vrot.slane %v4316_v4, 2  ;;  %v4280_v27 = vadd.f32 %v4279_v37, %v4278_v52 }
 0x4bb   : > { %v4318_v33 = vadd.f32 %v4317_v22, %v4316_v4  ;;  %v4281_v10 = vadd.f32 %v4280_v27, %v4259_v23 }
 0x4bd   : > { %v4319_v45 = vrot.slane %v4318_v33, 1  ;;  %4282 = vst [vmem:[#allocation4] sm:$0x1] %v4281_v10 }
 0x4bf   : > { %v4320_v49 = vadd.f32 %v4319_v45, %v4318_v33 }
 0x4c1   : > { %v4321_v30 = vadd.f32 %v4320_v49, %v4283_v11 }
 0x4c3   : > { %4322 = vst [vmem:[#allocation4 + $0x1] sm:$0x1] %v4321_v30 }
 0x4c4 PF: > { %s8586_s2 = sld [smem:[#allocation35_spill]] }
 0x4ca   : > { %p5179_p12 = scmp.lt.s32.totalorder %s8586_s2, 2 }
 0x4cb   : > { %v6241_v43 = vld [vmem:[#allocation12] sm:$0xff] (!%p5179_p12)   ;;  %v6242_v21 = vld [vmem:[#allocation12 + $0x8] sm:$0xff] (!%p5179_p12)   ;;  %v6243_v18 = vld [vmem:[#allocation12 + $0x10] sm:$0xff] (!%p5179_p12)   ;;  %s8588_s26 = sld [smem:[#allocation35_spill]] (!%p5179_p12) }
 0x4cc   : > { %4326 = sbr.rel (%p5179_p12) target bundleno = 1579 (0x62b), region = 120  ;;  %5709 = vmatprep.subr.bf16.mxu0 (!%p5179_p12), %v6241_v43  ;;  %5901 = vmatprep.subr.bf16.mxu1 (!%p5179_p12), %v6241_v43  ;;  %v6244_v0 = vld [vmem:[#allocation12 + $0x18] sm:$0xff] (!%p5179_p12)   ;;  %v6245_v15 = vld [vmem:[#allocation12 + $0x20] sm:$0xff] (!%p5179_p12)   ;;  %v6246_v60 = vld [vmem:[#allocation12 + $0x28] sm:$0xff] (!%p5179_p12)  }
 0x4cd   : > { %5710 = vmatpush3.bf16.msra.mxu0 (!%p5179_p12), %v6241_v43  ;;  %5909 = vmatpush3.bf16.msra.mxu1 (!%p5179_p12), %v6241_v43  ;;  %v4327_v6 = vld [vmem:[#allocation4] sm:$0x1] (!%p5179_p12)  ;;  %v4329_v51 = vld [vmem:[#allocation4 + $0x1] sm:$0x1] (!%p5179_p12)  ;;  %v6247_v29 = vld [vmem:[#allocation12 + $0x30] sm:$0xff] (!%p5179_p12)  }
 0x4ce   : > { %5711 = vmatprep.subr.bf16.mxu0 (!%p5179_p12), %v6242_v21  ;;  %5902 = vmatprep.subr.bf16.mxu1 (!%p5179_p12), %v6242_v21  ;;  %v4328_v35 = vmul.f32 (!%p5179_p12), 0.00390625, %v4327_v6  ;;  %v4330_v5 = vmul.f32 (!%p5179_p12), 0.00390625, %v4329_v51  ;;  %v6248_v14 = vld [vmem:[#allocation12 + $0x38] sm:$0xff] (!%p5179_p12)   ;;  %v4333_v54 = vld [vmem:[#allocation17] sm:$0x1] (!%p5179_p12)  ;;  %v8587_v32 = vld [vmem:[#allocation54_spill] sm:$0xff] (!%p5179_p12) }
 0x4cf   : > { %v4337_v47 = vld [vmem:[#allocation18] sm:$0x1] (!%p5179_p12) }
 0x4d0   : > { %v4331_v36 = vmul.f32 (!%p5179_p12), %v4328_v35, %v4328_v35 }
 0x4d1   : > { %5712 = vmatpush3.bf16.msra.mxu0 (!%p5179_p12), %v6242_v21  ;;  %5910 = vmatpush3.bf16.msra.mxu1 (!%p5179_p12), %v6242_v21  ;;  %p5188_p0 = scmp.ne.s32.totalorder (!%p5179_p12), %s8588_s26, 2 }
 0x4d2   : > { %5713 = vmatprep.subr.bf16.mxu0 (!%p5179_p12), %v6243_v18  ;;  %5903 = vmatprep.subr.bf16.mxu1 (!%p5179_p12), %v6243_v18  ;;  %v4332_v13 = vsub.f32 (!%p5179_p12), %v4330_v5, %v4331_v36 }
 0x4d4   : > { %v4334_v40 = vadd.f32 1e-05, %v4332_v13 }
 0x4d5   : > { %5714 = vmatpush3.bf16.msra.mxu0 %v6243_v18  ;;  %5911 = vmatpush3.bf16.msra.mxu1 %v6243_v18 }
 0x4d6   : > { %5715 = vmatprep.subr.bf16.mxu0 %v6244_v0  ;;  %5904 = vmatprep.subr.bf16.mxu1 %v6244_v0  ;;  %6249 = vrsqrt.f32 %v4334_v40 }
 0x4d9   : > { %5716 = vmatpush3.bf16.msra.mxu0 %v6244_v0  ;;  %5912 = vmatpush3.bf16.msra.mxu1 %v6244_v0 }
 0x4da   : > { %5717 = vmatprep.subr.bf16.mxu0 %v6245_v15  ;;  %5905 = vmatprep.subr.bf16.mxu1 %v6245_v15 }
 0x4dd   : > { %5718 = vmatpush3.bf16.msra.mxu0 %v6245_v15  ;;  %5913 = vmatpush3.bf16.msra.mxu1 %v6245_v15 }
 0x4de   : > { %5719 = vmatprep.subr.bf16.mxu0 %v6246_v60  ;;  %5906 = vmatprep.subr.bf16.mxu1 %v6246_v60 }
 0x4e0   : > { %v6250_v46 = vpop.eup %6249 }
 0x4e1   : > { %5720 = vmatpush3.bf16.msra.mxu0 %v6246_v60  ;;  %5914 = vmatpush3.bf16.msra.mxu1 %v6246_v60  ;;  %v4336_v19 = vmul.f32 %v6250_v46, %v4333_v54 }
 0x4e2   : > { %5721 = vmatprep.subr.bf16.mxu0 %v6247_v29  ;;  %5907 = vmatprep.subr.bf16.mxu1 %v6247_v29 }
 0x4e3   : > { %v4338_v24 = vmul.f32 %v4336_v19, %v4328_v35  ;;  %v4344_v12 = vrot.slane %v4336_v19, %v8587_v32 }
 0x4e5   : > { %5722 = vmatpush3.bf16.msra.mxu0 %v6247_v29  ;;  %5915 = vmatpush3.bf16.msra.mxu1 %v6247_v29  ;;  %v4339_v3 = vsub.f32 %v4337_v47, %v4338_v24  ;;  %v4346_v34 = vmul.f32 %v8159_v9, %v4344_v12  ;;  %v4347_v56 = vmul.f32 %v8165_v7, %v4344_v12 }
 0x4e6   : > { %5723 = vmatprep.subr.bf16.mxu0 %v6248_v14  ;;  %5908 = vmatprep.subr.bf16.mxu1 %v6248_v14  ;;  %v4354_v31 = vmul.f32 %v8151_v62, %v4344_v12  ;;  %v4355_v2 = vmul.f32 %v8155_v25, %v4344_v12  ;;  %v4348_v39 = vmul.f32 %v8157_v20, %v4344_v12 }
 0x4e7   : > { %v4349_v26 = vmul.f32 %v8161_v63, %v4344_v12  ;;  %v4356_v57 = vmul.f32 %v8149_v28, %v4344_v12  ;;  %v4366_v8 = vrot.slane %v4339_v3, %v8587_v32  ;;  %v4357_v53 = vmul.f32 %v8153_v59, %v4344_v12 }
 0x4e8   : > { %v4350_v61 = vmul.f32 %v8175_v41, %v4344_v12  ;;  %v4351_v9 = vmul.f32 %v8179_v58, %v4344_v12  ;;  %v4358_v7 = vmul.f32 %v8167_v55, %v4344_v12  ;;  %v4359_v62 = vmul.f32 %v8171_v50, %v4344_v12 }
 0x4e9   : > { %5724 = vmatpush3.bf16.msra.mxu0 %v6248_v14  ;;  %5916 = vmatpush3.bf16.msra.mxu1 %v6248_v14  ;;  %v4352_v25 = vmul.f32 %v8173_v1, %v4344_v12  ;;  %v4353_v20 = vmul.f32 %v8177_v38, %v4344_v12  ;;  %v4368_v16 = vadd.f32 %v4366_v8, %v4346_v34 }
 0x4ea   : > { %v4369_v63 = vadd.f32 %v4366_v8, %v4347_v56  ;;  %v4376_v48 = vadd.f32 %v4366_v8, %v4354_v31  ;;  %v4377_v28 = vadd.f32 %v4366_v8, %v4355_v2  ;;  %v4370_v42 = vadd.f32 %v4366_v8, %v4348_v39 }
 0x4eb   : > { %v4371_v52 = vadd.f32 %v4366_v8, %v4349_v26  ;;  %v4378_v4 = vadd.f32 %v4366_v8, %v4356_v57  ;;  %v4379_v59 = vadd.f32 %v4366_v8, %v4357_v53  ;;  %v4384_v37 = vmax.f32 %v4368_v16, 0.0 }
 0x4ec   : > { %v4385_v41 = vmax.f32 %v4369_v63, 0.0  ;;  %v4392_v22 = vmax.f32 %v4376_v48, 0.0  ;;  %v4393_v58 = vmax.f32 %v4377_v28, 0.0  ;;  %v4386_v23 = vmax.f32 %v4370_v42, 0.0 }
 0x4ed   : > { %v4387_v55 = vmax.f32 %v4371_v52, 0.0  ;;  %v4394_v27 = vmax.f32 %v4378_v4, 0.0  ;;  %v4395_v50 = vmax.f32 %v4379_v59, 0.0  ;;  %v4372_v10 = vadd.f32 %v4366_v8, %v4350_v61 }
 0x4ee   : > { %v4400_v33 = vpack.c.bf16 %v4385_v41, %v4384_v37  ;;  %v4404_v1 = vpack.c.bf16 %v4393_v58, %v4392_v22  ;;  %v4373_v38 = vadd.f32 %v4366_v8, %v4351_v9  ;;  %v4380_v49 = vadd.f32 %v4366_v8, %v4358_v7 }
 0x4ef   : > { %v4401_v45 = vpack.c.bf16 %v4387_v55, %v4386_v23  ;;  %v4405_v11 = vpack.c.bf16 %v4395_v50, %v4394_v27  ;;  %v4381_v30 = vadd.f32 %v4366_v8, %v4359_v62  ;;  %v4388_v43 = vmax.f32 %v4372_v10, 0.0 }
 0x4f0   : > { %5725 = vmatprep.mubr.bf16.mxu0 %v4400_v33  ;;  %5733 = vmatprep.mubr.bf16.mxu1 %v4404_v1  ;;  %v4389_v21 = vmax.f32 %v4373_v38, 0.0  ;;  %v4374_v18 = vadd.f32 %v4366_v8, %v4352_v25  ;;  %v4375_v0 = vadd.f32 %v4366_v8, %v4353_v20  ;;  %v4396_v6 = vmax.f32 %v4380_v49, 0.0 }
 0x4f1   : > { %5726 = vmatmul.mubr.bf16.vlgmr.msra.gmra.mrb[0].mxu0 %v4401_v45  ;;  %5734 = vmatmul.mubr.bf16.vlgmr.msra.gmra.mrb[0].mxu1 %v4405_v11  ;;  %v4397_v51 = vmax.f32 %v4381_v30, 0.0  ;;  %v4360_v35 = vmul.f32 %v8163_v44, %v4344_v12  ;;  %v4361_v5 = vmul.f32 %v8169_v17, %v4344_v12 }
 0x4f2   : > { %v4402_v36 = vpack.c.bf16 %v4389_v21, %v4388_v43  ;;  %v4390_v15 = vmax.f32 %v4374_v18, 0.0  ;;  %v4391_v13 = vmax.f32 %v4375_v0, 0.0 }
 0x4f3   : > { %v4406_v40 = vpack.c.bf16 %v4397_v51, %v4396_v6  ;;  %v4382_v60 = vadd.f32 %v4366_v8, %v4360_v35  ;;  %v4383_v29 = vadd.f32 %v4366_v8, %v4361_v5 }
 0x4f4   : > { %5729 = vmatprep.mubr.bf16.mxu0 %v4402_v36  ;;  %v4403_v14 = vpack.c.bf16 %v4391_v13, %v4390_v15 }
 0x4f5   : > { %5737 = vmatprep.mubr.bf16.mxu1 %v4406_v40  ;;  %v4398_v54 = vmax.f32 %v4382_v60, 0.0  ;;  %v4399_v46 = vmax.f32 %v4383_v29, 0.0 }
 0x4f7   : > { %v4407_v19 = vpack.c.bf16 %v4399_v46, %v4398_v54 }
 0x4f9   : > { %5730 = vmatmul.mubr.bf16.gmra.mrb[4].mxu0 %v4403_v14  ;;  %5738 = vmatmul.mubr.bf16.gmra.mrb[4].mxu1 %v4407_v19 }
 0x5c4   : > { %v8249_v47 = vpop.f32.mrb[0].mxu0  ;;  %v8251_v24 = vpop.f32.mrb[0].mxu1 }
 0x5c5   : > { %v8253_v44 = vpop.f32.mrb[1].mxu0  ;;  %v8255_v17 = vpop.f32.mrb[1].mxu1  ;;  %v4600_v25 = vmul.f32 (!%p5188_p0), %v8249_v47, %v8249_v47  ;;  %v4608_v11 = vmul.f32 (!%p5188_p0), %v8251_v24, %v8251_v24 }
 0x5c6   : > { %v8257_v32 = vpop.f32.mrb[2].mxu0  ;;  %v8259_v12 = vpop.f32.mrb[2].mxu1  ;;  %v4598_v9 = vmul.f32 (!%p5188_p0), %v8253_v44, %v8253_v44  ;;  %v4606_v50 = vmul.f32 (!%p5188_p0), %v8255_v17, %v8255_v17 }
 0x5c7   : > { %v8261_v3 = vpop.f32.mrb[3].mxu0  ;;  %v8263_v34 = vpop.f32.mrb[3].mxu1  ;;  %v4601_v16 = vmul.f32 (!%p5188_p0), %v8257_v32, %v8257_v32  ;;  %v4609_v43 = vmul.f32 (!%p5188_p0), %v8259_v12, %v8259_v12 }
 0x5c8   : > { %v4574_v61 = vadd.f32 (!%p5188_p0), %v8261_v3, %v8253_v44  ;;  %v4599_v7 = vmul.f32 (!%p5188_p0), %v8261_v3, %v8261_v3  ;;  %v4607_v10 = vmul.f32 (!%p5188_p0), %v8263_v34, %v8263_v34 }
 0x5c9   : > { %4572 = sbr.rel (%p5188_p0) target bundleno = 1527 (0x5f7), region = 124 }
 0x5ca   : > { %v4575_v62 = vadd.f32 (!%p5188_p0), %v8249_v47, %v4574_v61  ;;  %v4614_v63 = vadd.f32 (!%p5188_p0), %v4599_v7, %v4598_v9 }
 0x5cc   : > { %v8265_v56 = vpop.f32.mrb[4].mxu0  ;;  %v8267_v31 = vpop.f32.mrb[4].mxu1  ;;  %v4576_v20 = vadd.f32 (!%p5188_p0), %v8257_v32, %v4575_v62  ;;  %v4615_v42 = vadd.f32 (!%p5188_p0), %v4614_v63, %v4600_v25 }
 0x5cd   : > { %v8269_v2 = vpop.f32.mrb[5].mxu0  ;;  %v8271_v39 = vpop.f32.mrb[5].mxu1  ;;  %v4604_v41 = vmul.f32 (!%p5188_p0), %v8265_v56, %v8265_v56  ;;  %v4612_v15 = vmul.f32 (!%p5188_p0), %v8267_v31, %v8267_v31 }
 0x5ce   : > { %v8273_v26 = vpop.f32.mrb[6].mxu0  ;;  %v8275_v57 = vpop.f32.mrb[6].mxu1  ;;  %v4577_v48 = vadd.f32 (!%p5188_p0), %v4576_v20, %v8269_v2  ;;  %v4602_v28 = vmul.f32 (!%p5188_p0), %v8269_v2, %v8269_v2  ;;  %v4616_v59 = vadd.f32 (!%p5188_p0), %v4615_v42, %v4601_v16  ;;  %v4610_v0 = vmul.f32 (!%p5188_p0), %v8271_v39, %v8271_v39  ;;  %v4573_v16 = vld [vmem:[#allocation5] sm:$0x1] (!%p5188_p0) }
 0x5cf   : > { %v8277_v8 = vpop.f32.mrb[7].mxu0  ;;  %v8279_v53 = vpop.f32.mrb[7].mxu1  ;;  %v4605_v23 = vmul.f32 (!%p5188_p0), %v8273_v26, %v8273_v26  ;;  %v4613_v60 = vmul.f32 (!%p5188_p0), %v8275_v57, %v8275_v57 }
 0x5d0   : > { %v4578_v52 = vadd.f32 %v4577_v48, %v8277_v8  ;;  %v4603_v4 = vmul.f32 %v8277_v8, %v8277_v8  ;;  %v4617_v22 = vadd.f32 %v4616_v59, %v4602_v28  ;;  %v4611_v35 = vmul.f32 %v8279_v53, %v8279_v53 }
 0x5d2   : > { %v4579_v37 = vadd.f32 %v8265_v56, %v4578_v52  ;;  %v4618_v55 = vadd.f32 %v4617_v22, %v4603_v4  ;;  %v4597_v52 = vld [vmem:[#allocation5 + $0x1] sm:$0x1] }
 0x5d4   : > { %v4580_v58 = vadd.f32 %v8273_v26, %v4579_v37  ;;  %v4619_v33 = vadd.f32 %v4618_v55, %v4604_v41 }
 0x5d6   : > { %v4581_v27 = vadd.f32 %v4580_v58, %v8255_v17  ;;  %v4620_v38 = vadd.f32 %v4619_v33, %v4605_v23 }
 0x5d8   : > { %v4582_v1 = vadd.f32 %v4581_v27, %v8263_v34  ;;  %v4621_v49 = vadd.f32 %v4620_v38, %v4606_v50 }
 0x5da   : > { %v4583_v45 = vadd.f32 %v8251_v24, %v4582_v1  ;;  %v4622_v21 = vadd.f32 %v4621_v49, %v4607_v10 }
 0x5dc   : > { %v4584_v30 = vadd.f32 %v8259_v12, %v4583_v45  ;;  %v4623_v6 = vadd.f32 %v4622_v21, %v4608_v11 }
 0x5de   : > { %v4585_v18 = vadd.f32 %v4584_v30, %v8271_v39  ;;  %v4624_v5 = vadd.f32 %v4623_v6, %v4609_v43 }
 0x5e0   : > { %v4586_v51 = vadd.f32 %v4585_v18, %v8279_v53  ;;  %v4625_v13 = vadd.f32 %v4624_v5, %v4610_v0 }
 0x5e2   : > { %v4587_v36 = vadd.f32 %v8267_v31, %v4586_v51  ;;  %v4626_v29 = vadd.f32 %v4625_v13, %v4611_v35 }
 0x5e4   : > { %v4588_v40 = vadd.f32 %v8275_v57, %v4587_v36  ;;  %v4627_v54 = vadd.f32 %v4626_v29, %v4612_v15 }
 0x5e6   : > { %v4589_v14 = vrot.slane %v4588_v40, 4  ;;  %v4628_v19 = vadd.f32 %v4627_v54, %v4613_v60 }
 0x5e8   : > { %v4590_v46 = vadd.f32 %v4589_v14, %v4588_v40  ;;  %v4629_v9 = vrot.slane %v4628_v19, 4 }
 0x5ea   : > { %v4591_v61 = vrot.slane %v4590_v46, 2  ;;  %v4630_v62 = vadd.f32 %v4629_v9, %v4628_v19 }
 0x5ec   : > { %v4592_v7 = vadd.f32 %v4591_v61, %v4590_v46  ;;  %v4631_v20 = vrot.slane %v4630_v62, 2 }
 0x5ee   : > { %v4593_v25 = vrot.slane %v4592_v7, 1  ;;  %v4632_v48 = vadd.f32 %v4631_v20, %v4630_v62 }
 0x5f0   : > { %v4594_v63 = vadd.f32 %v4593_v25, %v4592_v7  ;;  %v4633_v42 = vrot.slane %v4632_v48, 1 }
 0x5f2   : > { %v4595_v28 = vadd.f32 %v4594_v63, %v4573_v16  ;;  %v4634_v4 = vadd.f32 %v4633_v42, %v4632_v48 }
 0x5f4   : > { %4596 = vst [vmem:[#allocation5] sm:$0x1] %v4595_v28  ;;  %v4635_v59 = vadd.f32 %v4634_v4, %v4597_v52 }
 0x5f6   : > { %4636 = vst [vmem:[#allocation5 + $0x1] sm:$0x1] %v4635_v59 }
 0x5f7 PF: > { %s8589_s20 = sld [smem:[#allocation35_spill]] }
 0x5fd   : > { %p5189_p6 = scmp.ne.s32.totalorder %s8589_s20, 3 }
 0x5fe   : > { %v4641_v37 = vld [vmem:[#allocation5] sm:$0x1] (!%p5189_p6)  ;;  %v4643_v41 = vld [vmem:[#allocation5 + $0x1] sm:$0x1] (!%p5189_p6)  ;;  %v4647_v50 = vld [vmem:[#allocation20] sm:$0x1] (!%p5189_p6) }
 0x5ff   : > { %4640 = sbr.rel (%p5189_p6) target bundleno = 1579 (0x62b), region = 128  ;;  %v4642_v22 = vmul.f32 (!%p5189_p6), 0.00390625, %v4641_v37  ;;  %v4644_v58 = vmul.f32 (!%p5189_p6), 0.00390625, %v4643_v41  ;;  %v4651_v10 = vld [vmem:[#allocation21] sm:$0x1] (!%p5189_p6)  ;;  %v8590_v45 = vld [vmem:[#allocation54_spill] sm:$0xff] (!%p5189_p6) }
 0x600   : > { %v8591_v14 = vld [vmem:[#allocation38_spill] sm:$0xff] (!%p5189_p6)  ;;  %v8592_v54 = vld [vmem:[#allocation39_spill] sm:$0xff] (!%p5189_p6) }
 0x601   : > { %v4645_v23 = vmul.f32 (!%p5189_p6), %v4642_v22, %v4642_v22  ;;  %v8594_v46 = vld [vmem:[#allocation43_spill] sm:$0xff] (!%p5189_p6)  ;;  %v8597_v7 = vld [vmem:[#allocation50_spill] sm:$0xff] (!%p5189_p6) }
 0x602   : > { %v8596_v61 = vld [vmem:[#allocation47_spill] sm:$0xff] (!%p5189_p6) }
 0x603   : > { %v4646_v55 = vsub.f32 (!%p5189_p6), %v4644_v58, %v4645_v23  ;;  %v8598_v25 = vld [vmem:[#allocation51_spill] sm:$0xff] (!%p5189_p6) }
 0x605   : > { %v4648_v27 = vadd.f32 (!%p5189_p6), 1e-05, %v4646_v55 }
 0x607   : > { %6251 = vrsqrt.f32 %v4648_v27 }
 0x611   : > { %v6252_v33 = vpop.eup %6251 }
 0x612   : > { %v4650_v1 = vmul.f32 %v6252_v33, %v4647_v50  ;;  %v8599_v33 = vld [vmem:[#allocation40_spill] sm:$0xff] }
 0x614   : > { %v4652_v38 = vmul.f32 %v4650_v1, %v4642_v22  ;;  %v4658_v11 = vrot.slane %v4650_v1, %v8590_v45 }
 0x616   : > { %v4653_v49 = vsub.f32 %v4651_v10, %v4652_v38  ;;  %v4660_v30 = vmul.f32 %v4658_v11, %v8253_v44  ;;  %v4661_v43 = vmul.f32 %v4658_v11, %v8261_v3  ;;  %v4662_v21 = vmul.f32 %v8249_v47, %v4658_v11  ;;  %v8600_v10 = vld [vmem:[#allocation41_spill] sm:$0xff] }
 0x617   : > { %v4663_v18 = vmul.f32 %v8257_v32, %v4658_v11  ;;  %v4664_v0 = vmul.f32 %v4658_v11, %v8269_v2  ;;  %v4665_v6 = vmul.f32 %v4658_v11, %v8277_v8  ;;  %v4666_v51 = vmul.f32 %v8265_v56, %v4658_v11 }
 0x618   : > { %v4680_v35 = vrot.slane %v4653_v49, %v8590_v45  ;;  %v4667_v5 = vmul.f32 %v8273_v26, %v4658_v11  ;;  %v4668_v36 = vmul.f32 %v4658_v11, %v8255_v17  ;;  %v4669_v44 = vmul.f32 %v4658_v11, %v8263_v34  ;;  %v8601_v45 = vld [vmem:[#allocation44_spill] sm:$0xff] }
 0x619   : > { %v4670_v3 = vmul.f32 %v8251_v24, %v4658_v11  ;;  %v4671_v47 = vmul.f32 %v8259_v12, %v4658_v11  ;;  %v4672_v32 = vmul.f32 %v4658_v11, %v8271_v39  ;;  %v4673_v2 = vmul.f32 %v4658_v11, %v8279_v53  ;;  %v8593_v24 = vld [vmem:[#allocation42_spill] sm:$0xff] }
 0x61a   : > { %v4682_v15 = vadd.f32 %v4680_v35, %v4660_v30  ;;  %v4683_v8 = vadd.f32 %v4680_v35, %v4661_v43  ;;  %v4684_v13 = vadd.f32 %v4680_v35, %v4662_v21  ;;  %v4685_v56 = vadd.f32 %v4680_v35, %v4663_v18  ;;  %v8595_v53 = vld [vmem:[#allocation46_spill] sm:$0xff]  ;;  %v8602_v30 = vld [vmem:[#allocation45_spill] sm:$0xff]  ;;  %v8603_v21 = vld [vmem:[#allocation48_spill] sm:$0xff] }
 0x61b   : > { %v4686_v40 = vadd.f32 %v4680_v35, %v4664_v0  ;;  %v4687_v60 = vadd.f32 %v4680_v35, %v4665_v6  ;;  %v4688_v29 = vadd.f32 %v4680_v35, %v4666_v51  ;;  %v4689_v26 = vadd.f32 %v4680_v35, %v4667_v5  ;;  %v8604_v0 = vld [vmem:[#allocation49_spill] sm:$0xff] }
 0x61c   : > { %v4698_v17 = vadd.f32 %v4682_v15, %v8591_v14  ;;  %v4699_v34 = vadd.f32 %v4683_v8, %v8592_v54  ;;  %v4700_v12 = vadd.f32 %v4684_v13, %v8593_v24  ;;  %v4701_v39 = vadd.f32 %v4685_v56, %v8594_v46 }
 0x61d   : > { %v4702_v19 = vadd.f32 %v4686_v40, %v8595_v53  ;;  %v4703_v9 = vadd.f32 %v4687_v60, %v8596_v61  ;;  %v4704_v62 = vadd.f32 %v4688_v29, %v8597_v7  ;;  %v4705_v20 = vadd.f32 %v4689_v26, %v8598_v25 }
 0x61e   : > { %v4714_v16 = vmax.f32 %v4698_v17, 0.0  ;;  %v4715_v63 = vmax.f32 %v4699_v34, 0.0  ;;  %v4716_v48 = vmax.f32 %v4700_v12, 0.0  ;;  %v4717_v28 = vmax.f32 %v4701_v39, 0.0 }
 0x61f   : > { %v4718_v42 = vmax.f32 %v4702_v19, 0.0  ;;  %v4719_v52 = vmax.f32 %v4703_v9, 0.0  ;;  %v4720_v4 = vmax.f32 %v4704_v62, 0.0  ;;  %v4721_v59 = vmax.f32 %v4705_v20, 0.0 }
 0x620   : > { %4730 = vst [vmem:[%s7152_s25] sm:$0xff] %v4714_v16  ;;  %4731 = vst [vmem:[%s7152_s25 + $0x8] sm:$0xff] %v4715_v63  ;;  %v4690_v37 = vadd.f32 %v4680_v35, %v4668_v36  ;;  %v4691_v41 = vadd.f32 %v4680_v35, %v4669_v44  ;;  %v4692_v22 = vadd.f32 %v4680_v35, %v4670_v3 }
 0x621   : > { %4732 = vst [vmem:[%s7152_s25 + $0x10] sm:$0xff] %v4716_v48  ;;  %4733 = vst [vmem:[%s7152_s25 + $0x18] sm:$0xff] %v4717_v28  ;;  %v4693_v58 = vadd.f32 %v4680_v35, %v4671_v47  ;;  %v4694_v23 = vadd.f32 %v4680_v35, %v4672_v32  ;;  %v4695_v55 = vadd.f32 %v4680_v35, %v4673_v2  ;;  %v8605_v47 = vld [vmem:[#allocation52_spill] sm:$0xff]  ;;  %v8606_v2 = vld [vmem:[#allocation53_spill] sm:$0xff] }
 0x622   : > { %4734 = vst [vmem:[%s7152_s25 + $0x20] sm:$0xff] %v4718_v42  ;;  %4735 = vst [vmem:[%s7152_s25 + $0x28] sm:$0xff] %v4719_v52  ;;  %v4674_v27 = vmul.f32 %v8267_v31, %v4658_v11  ;;  %v4675_v50 = vmul.f32 %v8275_v57, %v4658_v11  ;;  %v4706_v1 = vadd.f32 %v4690_v37, %v8599_v33 }
 0x623   : > { %4736 = vst [vmem:[%s7152_s25 + $0x30] sm:$0xff] %v4720_v4  ;;  %4737 = vst [vmem:[%s7152_s25 + $0x38] sm:$0xff] %v4721_v59  ;;  %v4707_v38 = vadd.f32 %v4691_v41, %v8600_v10  ;;  %v4708_v49 = vadd.f32 %v4692_v22, %v8601_v45  ;;  %v4709_v43 = vadd.f32 %v4693_v58, %v8602_v30 }
 0x624   : > { %v4710_v18 = vadd.f32 %v4694_v23, %v8603_v21  ;;  %v4711_v6 = vadd.f32 %v4695_v55, %v8604_v0  ;;  %v4696_v31 = vadd.f32 %v4680_v35, %v4674_v27  ;;  %v4697_v57 = vadd.f32 %v4680_v35, %v4675_v50 }
 0x625   : > { %v4722_v11 = vmax.f32 %v4706_v1, 0.0  ;;  %v4723_v51 = vmax.f32 %v4707_v38, 0.0  ;;  %v4724_v5 = vmax.f32 %v4708_v49, 0.0  ;;  %v4725_v36 = vmax.f32 %v4709_v43, 0.0 }
 0x626   : > { %v4726_v44 = vmax.f32 %v4710_v18, 0.0  ;;  %v4727_v3 = vmax.f32 %v4711_v6, 0.0  ;;  %v4712_v32 = vadd.f32 %v4696_v31, %v8605_v47  ;;  %v4713_v15 = vadd.f32 %v4697_v57, %v8606_v2 }
 0x627   : > { %4738 = vst [vmem:[%s7152_s25 + $0x40] sm:$0xff] %v4722_v11  ;;  %4739 = vst [vmem:[%s7152_s25 + $0x48] sm:$0xff] %v4723_v51 }
 0x628   : > { %4740 = vst [vmem:[%s7152_s25 + $0x50] sm:$0xff] %v4724_v5  ;;  %4741 = vst [vmem:[%s7152_s25 + $0x58] sm:$0xff] %v4725_v36  ;;  %v4728_v8 = vmax.f32 %v4712_v32, 0.0  ;;  %v4729_v35 = vmax.f32 %v4713_v15, 0.0 }
 0x629   : > { %4742 = vst [vmem:[%s7152_s25 + $0x60] sm:$0xff] %v4726_v44  ;;  %4743 = vst [vmem:[%s7152_s25 + $0x68] sm:$0xff] %v4727_v3 }
 0x62a   : > { %4744 = vst [vmem:[%s7152_s25 + $0x70] sm:$0xff] %v4728_v8  ;;  %4745 = vst [vmem:[%s7152_s25 + $0x78] sm:$0xff] %v4729_v35 }
 0x62b PF: > { %s8607_s13 = sld [smem:[#allocation35_spill]]  ;;  %s8608_s3 = sld [smem:[#allocation34_spill]] }
 0x62c   : > { %s4762_s16 = sshll.u32 %s7152_s25, 4  ;;  %s8610_s0 = sld [smem:[#allocation61_spill]]  ;;  %s8384_s16 = int_to_ptr.vmem [resolvable:$true] %s4762_s16 }
 0x62d   : > { %s8393_s26 = scalar_lea.sflag [#allocation8], %s510_s15  ;;  %s6535_s20 = scalar_lea.vmem %s8384_s16, 2048 }
 0x62e   : > { %p6536_p9 = scmp.ne.s32.totalorder %s8384_s16, %s6535_s20  ;;  %p8611_p10 = scmp.ne.s32.totalorder %s8530_s12, 0 }
 0x62f   : > { %s6695_s25 = smov [#allocation23]  }
 0x630   : > { %p6537_p2 = pnand %p6536_p9, %p8611_p10 }
 0x631   : > { %p4754_p5 = scmp.eq.s32.totalorder %s8607_s13, 3  ;;  %s6539_s13 = sshll.u32 %s6695_s25, 4  ;;  %s6540_s13 = int_to_ptr.vmem [resolvable:$false] %s6539_s13 }
 0x632   : > { %p6538_p1 = pneg %p6537_p2  ;;  %s6541_s4 = scalar_lea.vmem %s6540_s13, 4096 }
 0x633   : > { %s8636_s3 = smov (!%p4754_p5, %s8608_s3), 0  ;;  %p6542_p4 = scmp.lt.s32.totalorder %s8384_s16, %s6540_s13 }
 0x634   : > { %s5212_s30 = sshll.u32 %s8636_s3, 11  ;;  %p6543_p11 = scmp.lt.s32.totalorder %s6541_s4, %s6535_s20 }
 0x635   : > { %s8389_s2 = scalar_lea.hbm %s8610_s0, %s5212_s30 }
 0x636   : > { %p6544_p13 = por %p6543_p11, %p6542_p4 }
 0x638   : > { %p6545_p8 = pnand %p6544_p13, %p6538_p1 }
 0x63a   : > { %6548 = shalt.err (!%p6545_p8)
}
 0x63b   : > { %s6549_s15 = scalar_lea.hbm %s8389_s2, 2048  ;;  %s6553_s30 = scalar_lea.hbm %s8610_s0, 4096 }
 0x63c   : > { %p6550_p7 = scmp.ne.s32.totalorder %s8389_s2, %s6549_s15  ;;  %p6554_p0 = scmp.lt.u32.totalorder %s8389_s2, %s8610_s0 }
 0x63d   : > { %p6555_p6 = scmp.lt.u32.totalorder %s6553_s30, %s6549_s15  ;;  %p6557_p9 = scmp.lt.u32.totalorder %s6549_s15, %s8389_s2 }
 0x63e   : > { %p6551_p3 = pnand %p6550_p7, %p8611_p10 }
 0x63f   : > { %p6556_p5 = por %p6555_p6, %p6554_p0 }
 0x640   : > { %p6552_p12 = pneg %p6551_p3 }
 0x641   : > { %p6558_p2 = por %p6557_p9, %p6556_p5 }
 0x643   : > { %p6559_p1 = pnand %p6558_p2, %p6552_p12 }
 0x645   : > { %6562 = shalt.err (!%p6559_p1)
}
 0x646   : > { %s6696_s4 = smov 128   ;;  %s6697_s20 = smov 8  }
 0x647   : > { %5955 = dma.vmem_to_hbm [thread:$0]  (%p8611_p10), %s8384_s16, 2048, %s8389_s2, %s8393_s26, %s6696_s4, %s6696_s4, %s6697_s20  }
 0x648 PF: > { %s8612_s25 = sld [smem:[#allocation31_spill]]  ;;  %p6012_p4 = scmp.ge.s32.totalorder %s6677_s23, 2 }
 0x649   : > { %p8613_p11 = scmp.ne.s32.totalorder %s8531_s29, 0 }
 0x64b   : > { %p5990_p13 = pnand %p6012_p4, %p8613_p11 }
 0x64e   : > { %s4777_s13 = sand.u32 1, %s8612_s25  }
 0x64f   : > { %s4778_s15 = scalar_lea.sflag [#allocation8], %s4777_s13 }
 0x650   : > { %6632 = dma.done.wait (!%p5990_p13), %s4778_s15, 2048  }
 0x651   : > { %6634 = vsyncadd (!%p5990_p13), %s4778_s15, 4294965248  ;;  %s31_s23 = sadd.s32 1, %s6677_s23   ;;  %s8614_s13 = sld [smem:[#allocation32_spill]] }
 0x652   : > { %p28_p8 = scmp.ge.s32.totalorder %s31_s23, 10   ;;  %s8615_s3 = sld [smem:[#allocation33_spill]] }
 0x653   : > { %s8616_s12 = smov %s8628_s19  ;;  %s8617_s2 = smov %s8632_s14 }
 0x654   : > { %s8619_s15 = smov %s8634_s27  ;;  %s8620_s16 = smov %s6653_s17 }
 0x655   : > { %s8621_s17 = smov %s6657_s18  ;;  %s8622_s18 = smov %s7045_s10 }
 0x656   : > { %s8623_s19 = smov %s6669_s21  ;;  %s8624_s20 = smov %s6673_s22 }
 0x657   : > { %s8625_s21 = smov %s8616_s12  ;;  %s8626_s22 = smov %s8617_s2 }
 0x658   : > { %s8618_s14 = smov %s8615_s3  ;;  %30 = sbr.rel (!%p28_p8) target bundleno = 21 (0x15), region = 179 }
 0x65f   :  { %4783 = vsyncpa [#allocation7], 1 }
 0x660   :  { %4785 = vsyncpa [#allocation7 + $0x1], 1 }
 0x661   :  { %4786 = vsyncpa [#allocation10], 1 }
 0x662   :  { %4787 = vsyncpa [#allocation13], 1 }
 0x663   :  { %4788 = vsyncpa [#allocation16], 1 }
 0x664   :  { %4789 = vsyncpa [#allocation19], 1 }
 0x665   :  { %4790 = vsyncpa [#allocation22], 1 }
 0x666   :  { %4791 = vsyncpa [#allocation8], 1 }
 0x667   :  { %4793 = vsyncpa [#allocation8 + $0x1], 1 }

</bundles_post_ra>
